<compile_context>
chip_gen: v5e
topology: v5e:2x2
jax: 0.10.0
libtpu: 0.0.40
codegen_flags: <defaults>
</compile_context>

<pallas_src>
import functools
import math

import jax
import jax.numpy as jnp
from jax.experimental import pallas as pl
from jax.experimental.pallas import tpu as pltpu

# Finite stand-in for -inf so exp()/max() never produce inf-inf = NaN.
_MASK_VALUE = -1.0e30


def _vmem_budget_bytes():
    """Generation-aware VMEM budget: ~85% of per-core VMEM, clamped."""
    cap = None
    try:
        info_fn = getattr(pltpu, "get_tpu_info", None)
        if info_fn is not None:
            cap = getattr(info_fn(), "vmem_capacity_bytes", None)
    except Exception:
        cap = None
    if not cap:
        cap = 64 * 1024 * 1024          # conservative: v7x per-TensorCore VMEM
    budget = int(cap * 0.85)            # ~54 MiB on v7x, ~109 MiB on v5e/v6e
    return max(32 * 1024 * 1024, min(budget, 112 * 1024 * 1024))


def _single_tile_kernel(*refs, scale, heads, head_dim, has_mask, compute_dtype):
    """num_kv == 1 specialization: direct softmax, no online-softmax state."""
    if has_mask:
        q_ref, k_ref, v_ref, m_ref, o_ref = refs
    else:
        q_ref, k_ref, v_ref, o_ref = refs
        m_ref = None
    H, hd = heads, head_dim
    cd = compute_dtype

    # mask is shared by all heads; load it once (f32 for the logit add)
    mask = m_ref[0].astype(jnp.float32) if has_mask else None      # [tq, S]

    for h in range(H):
        qh = (q_ref[0, :, h * hd:(h + 1) * hd] * scale).astype(cd)  # [tq, hd]
        kh = k_ref[0, h]                                            # [S, hd]
        vh = v_ref[0, h]                                            # [S, hd]
        s = jax.lax.dot_general(qh, kh, (((1,), (1,)), ((), ())),
                                preferred_element_type=jnp.float32)  # [tq, S]
        if has_mask:
            s = s + mask
        m = jnp.max(s, axis=-1, keepdims=True)
        p = jnp.exp(s - m)
        l = jnp.sum(p, axis=-1, keepdims=True)
        oh = jnp.dot(p.astype(cd), vh, preferred_element_type=jnp.float32)
        oh = oh * pl.reciprocal(l, approx=True)
        o_ref[0, :, h * hd:(h + 1) * hd] = oh.astype(o_ref.dtype)


def _flash_kernel(*refs, scale, heads, head_dim, has_mask, kv_len, needs_kv_pad):
    """Flash-style online-softmax kernel; grid = (B, num_q, num_kv)."""
    if has_mask:
        q_ref, k_ref, v_ref, m_ref = refs[:4]
        o_ref, q_sc, m_sc, l_sc, acc_sc = refs[4:]
    else:
        q_ref, k_ref, v_ref = refs[:3]
        m_ref = None
        o_ref, q_sc, m_sc, l_sc, acc_sc = refs[3:]

    kv = pl.program_id(2)
    H, hd = heads, head_dim
    tq = q_ref.shape[1]
    tk = k_ref.shape[2]

    @pl.when(kv == 0)
    def _init():
        # q head-split + scale hoisted once per (batch, q-tile) into VMEM scratch
        for h in range(H):
            q_sc[h] = (q_ref[0, :, h * hd:(h + 1) * hd] * scale).astype(q_sc.dtype)
        m_sc[...] = jnp.full(m_sc.shape, -jnp.inf, dtype=m_sc.dtype)
        l_sc[...] = jnp.zeros(l_sc.shape, dtype=l_sc.dtype)
        acc_sc[...] = jnp.zeros(acc_sc.shape, dtype=acc_sc.dtype)

    q = q_sc[...]          # [H, tq, hd] (compute dtype, pre-scaled)
    k = k_ref[0]           # [H, tk, hd]
    v = v_ref[0]           # [H, tk, hd]

    # [H, tq, tk] logits (f32 accumulation on the MXU)
    s = jnp.einsum("hqd,hkd->hqk", q, k, preferred_element_type=jnp.float32)
    if has_mask:
        s = s + m_ref[0].astype(jnp.float32)[None, :, :]
    if needs_kv_pad:
        # cdiv KV tiling: kill padded key columns, and zero padded V rows so
        # uninitialized pad data can never contaminate the PV contraction.
        col = jax.lax.broadcasted_iota(jnp.int32, (tq, tk), 1)
        valid_cols = (kv * tk + col) < kv_len
        s = jnp.where(valid_cols[None, :, :], s, _MASK_VALUE)
        krow = jax.lax.broadcasted_iota(jnp.int32, (tk, hd), 0)
        valid_rows = (kv * tk + krow) < kv_len
        v = jnp.where(valid_rows[None, :, :], v, jnp.zeros_like(v))

    # online softmax update (m/l kept lane-dense, value replicated over lanes)
    m_prev = m_sc[...]                                    # [H, tq, 128]
    l_prev = l_sc[...]                                    # [H, tq, 128]
    row_max = jnp.max(s, axis=-1, keepdims=True)          # [H, tq, 1]
    m_new = jnp.maximum(m_prev, row_max)                  # [H, tq, 128]
    alpha = jnp.exp(m_prev - m_new)                       # [H, tq, 128]
    p = jnp.exp(s - m_new[:, :, :1])                      # [H, tq, tk]
    l_sc[...] = alpha * l_prev + jnp.sum(p, axis=-1, keepdims=True)
    acc_sc[...] = alpha[:, :, :1] * acc_sc[...] + jnp.einsum(
        "hqk,hkd->hqd", p.astype(v.dtype), v, preferred_element_type=jnp.float32)
    m_sc[...] = m_new

    @pl.when(kv == pl.num_programs(2) - 1)
    def _finalize():
        # deferred normalization over the [H, tq, hd] accumulator only
        inv_l = pl.reciprocal(l_sc[...][:, :, :1], approx=True)   # [H, tq, 1]
        for h in range(H):
            o_ref[0, :, h * hd:(h + 1) * hd] = (
                acc_sc[h] * inv_l[h]).astype(o_ref.dtype)


def hybrid_attention(query, key, value, rule_mask=None, *, heads=8,
                     q_tile=None, kv_tile=None, use_bf16_mxu=None):
    """JAX/Pallas equivalent of HybridAttention.forward.

    query: [B, L, D], key/value: [B, S, D], rule_mask: optional [B, L, S].
    Returns [B, L, D].
    """
    B, L, D = query.shape
    _, S, _ = key.shape
    assert key.shape == (B, S, D) and value.shape == (B, S, D)
    assert D % heads == 0, "dim must be divisible by heads"
    hd = D // heads
    scale = 1.0 / math.sqrt(hd)
    has_mask = rule_mask is not None
    if has_mask:
        assert rule_mask.shape == (B, L, S)

    in_dtype = jnp.dtype(query.dtype)
    if use_bf16_mxu is None:
        use_bf16_mxu = in_dtype == jnp.dtype(jnp.float32)
    compute_dtype = (jnp.bfloat16
                     if (use_bf16_mxu and in_dtype == jnp.dtype(jnp.float32))
                     else query.dtype)

    budget = _vmem_budget_bytes()

    # ---------------- tile selection ----------------
    tq = min(L, q_tile if q_tile is not None else 256)
    if tq < L:
        tq = max(8, (tq // 8) * 8)
    if kv_tile is not None:
        tk = min(kv_tile, S)
    else:
        tk = S if S <= 1024 else (1024 if budget > 80 * (1 << 20) else 512)
    if tk < S:
        tk = max(128, (tk // 128) * 128)

    in_sz = in_dtype.itemsize
    cd_sz = jnp.dtype(compute_dtype).itemsize
    mask_sz = jnp.dtype(rule_mask.dtype).itemsize if has_mask else 0

    def working_set(tq_, tk_):
        blocks = 2 * (tq_ * D * in_sz                       # q (double buffered)
                      + 2 * heads * tk_ * hd * cd_sz        # k + v
                      + tq_ * tk_ * mask_sz                 # rule mask
                      + tq_ * D * in_sz)                    # output
        scratch = (heads * tq_ * hd * cd_sz                 # hoisted q
                   + 2 * heads * tq_ * 128 * 4              # m, l (lane dense)
                   + heads * tq_ * hd * 4)                  # f32 accumulator
        temps = 3 * heads * tq_ * tk_ * 4 + 2 * heads * tq_ * hd * 4   # s/p/exp
        return blocks + scratch + temps

    # shrink the KV tile until the working set fits comfortably in the budget
    while working_set(tq, tk) > (budget * 7) // 10 and tk > 128:
        tk = max(128, ((tk // 2) // 128) * 128)

    num_q = pl.cdiv(L, tq)
    num_kv = pl.cdiv(S, tk)
    single_kv = num_kv == 1
    needs_kv_pad = (not single_kv) and (S % tk != 0)

    # one-time wrapper-side relayout of k/v to [B, H, S, hd] (+ MXU dtype cast)
    k4 = jnp.transpose(key.reshape(B, S, heads, hd), (0, 2, 1, 3)).astype(compute_dtype)
    v4 = jnp.transpose(value.reshape(B, S, heads, hd), (0, 2, 1, 3)).astype(compute_dtype)

    out_shape = jax.ShapeDtypeStruct((B, L, D), query.dtype)
    vmem_limit = int(budget)

    if single_kv:
        kernel = functools.partial(
            _single_tile_kernel, scale=scale, heads=heads, head_dim=hd,
            has_mask=has_mask, compute_dtype=compute_dtype)
        in_specs = [
            pl.BlockSpec((1, tq, D), lambda b, qi: (b, qi, 0)),
            pl.BlockSpec((1, heads, S, hd), lambda b, qi: (b, 0, 0, 0)),
            pl.BlockSpec((1, heads, S, hd), lambda b, qi: (b, 0, 0, 0)),
        ]
        inputs = [query, k4, v4]
        if has_mask:
            in_specs.append(pl.BlockSpec((1, tq, S), lambda b, qi: (b, qi, 0)))
            inputs.append(rule_mask)
        return pl.pallas_call(
            kernel,
            out_shape=out_shape,
            grid_spec=pltpu.PrefetchScalarGridSpec(
                num_scalar_prefetch=0,
                grid=(B, num_q),
                in_specs=in_specs,
                out_specs=pl.BlockSpec((1, tq, D), lambda b, qi: (b, qi, 0))),
            compiler_params=pltpu.CompilerParams(
                dimension_semantics=("parallel", "parallel"),
                vmem_limit_bytes=vmem_limit),
        )(*inputs)

    # flash (multi KV tile) path
    kernel = functools.partial(
        _flash_kernel, scale=scale, heads=heads, head_dim=hd,
        has_mask=has_mask, kv_len=S, needs_kv_pad=needs_kv_pad)
    in_specs = [
        pl.BlockSpec((1, tq, D), lambda b, qi, kv: (b, qi, 0)),
        pl.BlockSpec((1, heads, tk, hd), lambda b, qi, kv: (b, 0, kv, 0)),
        pl.BlockSpec((1, heads, tk, hd), lambda b, qi, kv: (b, 0, kv, 0)),
    ]
    inputs = [query, k4, v4]
    if has_mask:
        in_specs.append(pl.BlockSpec((1, tq, tk), lambda b, qi, kv: (b, qi, kv)))
        inputs.append(rule_mask)

    return pl.pallas_call(
        kernel,
        out_shape=out_shape,
        grid_spec=pltpu.PrefetchScalarGridSpec(
            num_scalar_prefetch=0,
            grid=(B, num_q, num_kv),
            in_specs=in_specs,
            out_specs=pl.BlockSpec((1, tq, D), lambda b, qi, kv: (b, qi, 0)),
            scratch_shapes=[
                pltpu.VMEM((heads, tq, hd), compute_dtype),   # hoisted, scaled q
                pltpu.VMEM((heads, tq, 128), jnp.float32),    # running max (lane dense)
                pltpu.VMEM((heads, tq, 128), jnp.float32),    # running sum (lane dense)
                pltpu.VMEM((heads, tq, hd), jnp.float32),     # output accumulator
            ]),
        compiler_params=pltpu.CompilerParams(
            dimension_semantics=("parallel", "parallel", "arbitrary"),
            vmem_limit_bytes=vmem_limit),
    )(*inputs)


def _reference(query, key, value, rule_mask, heads):
    B, L, D = query.shape
    _, S, _ = key.shape
    hd = D // heads
    q = query.reshape(B, L, heads, hd).astype(jnp.float32)
    k = key.reshape(B, S, heads, hd).astype(jnp.float32)
    v = value.reshape(B, S, heads, hd).astype(jnp.float32)
    s = jnp.einsum("blhd,bshd->bhls", q, k) / math.sqrt(hd)
    if rule_mask is not None:
        s = s + rule_mask[:, None, :, :].astype(jnp.float32)
    p = jax.nn.softmax(s, axis=-1)
    o = jnp.einsum("bhls,bshd->blhd", p, v)
    return o.reshape(B, L, D).astype(query.dtype)


if __name__ == "__main__":
    H = 8

    # Tolerance note: the MXU runs reduced-precision (bf16) passes for the
    # matmuls (explicitly via use_bf16_mxu, or via default f32 precision), and
    # the softmax denominator uses the approx (EUP) reciprocal.  6e-2 is far
    # below any structural error (wrong mask / normalization would be O(1)).
    TOL = 6e-2

    # Case 1: short-S fast path (single KV tile, no online softmax), mask on.
    B, L, S, D = 2, 64, 64, 512
    root = jax.random.PRNGKey(0)
    kq, kk, kv_, km, rest = jax.random.split(root, 5)
    query = jax.random.normal(kq, (B, L, D), dtype=jnp.float32)
    key_t = jax.random.normal(kk, (B, S, D), dtype=jnp.float32)
    value = jax.random.normal(kv_, (B, S, D), dtype=jnp.float32)
    rule_mask = 0.1 * jax.random.normal(km, (B, L, S), dtype=jnp.float32)

    out1 = jax.block_until_ready(
        hybrid_attention(query, key_t, value, rule_mask, heads=H,
                         use_bf16_mxu=False))
    ref1 = _reference(query, key_t, value, rule_mask, H)
    assert out1.shape == (B, L, D)
    assert jnp.allclose(out1, ref1, atol=TOL, rtol=TOL), \
        "masked (single-tile) output mismatch vs reference"

    # Case 1b: no mask, default bf16-MXU path.
    out1b = jax.block_until_ready(
        hybrid_attention(query, key_t, value, None, heads=H))
    ref1b = _reference(query, key_t, value, None, H)
    assert jnp.allclose(out1b, ref1b, atol=TOL, rtol=TOL), \
        "mask-free output mismatch vs reference"

    # Case 2: flash path — q-length tiling + cdiv KV tiling with padded last
    # tile (S=320, kv_tile=128 -> 3 kv tiles, 64 padded key columns).
    B2, L2, S2 = 1, 256, 320
    kq2, kk2, kv2, km2 = jax.random.split(rest, 4)
    q2 = jax.random.normal(kq2, (B2, L2, D), dtype=jnp.float32)
    k2 = jax.random.normal(kk2, (B2, S2, D), dtype=jnp.float32)
    v2 = jax.random.normal(kv2, (B2, S2, D), dtype=jnp.float32)
    m2 = 0.1 * jax.random.normal(km2, (B2, L2, S2), dtype=jnp.float32)

    out2 = jax.block_until_ready(
        hybrid_attention(q2, k2, v2, m2, heads=H, q_tile=128, kv_tile=128,
                         use_bf16_mxu=False))
    ref2 = _reference(q2, k2, v2, m2, H)
    assert out2.shape == (B2, L2, D)
    assert jnp.allclose(out2, ref2, atol=TOL, rtol=TOL), \
        "flash-path output mismatch vs reference"

    print("KERNEL_OK")
</pallas_src>

<mosaic_0001>
module attributes {stable_mosaic.version = 11 : i64} {
  func.func @_single_tile_kernel(%arg0: i32, %arg1: i32, %arg2: memref<1x64x512xf32, #tpu.memory_space<vmem>>, %arg3: memref<1x8x64x64xf32, #tpu.memory_space<vmem>>, %arg4: memref<1x8x64x64xf32, #tpu.memory_space<vmem>>, %arg5: memref<1x64x64xf32, #tpu.memory_space<vmem>>, %arg6: memref<1x64x512xf32, #tpu.memory_space<vmem>>) attributes {dimension_semantics = [#tpu.dimension_semantics<parallel>, #tpu.dimension_semantics<parallel>], iteration_bounds = array<i64: 2, 1>, scalar_prefetch = 0 : i64, scratch_operands = 0 : i64, tpu.core_type = #tpu.core_type<tc>, window_params = [{transform_indices = @transform_0, window_bounds = array<i64: 1, 64, 512>}, {transform_indices = @transform_1, window_bounds = array<i64: 1, 8, 64, 64>}, {transform_indices = @transform_2, window_bounds = array<i64: 1, 8, 64, 64>}, {transform_indices = @transform_3, window_bounds = array<i64: 1, 64, 64>}, {transform_indices = @transform_4, window_bounds = array<i64: 1, 64, 512>}]} {
    %c0 = arith.constant 0 : index
    %c0_0 = arith.constant 0 : index
    %c0_1 = arith.constant 0 : index
    %0 = vector.load %arg5[%c0, %c0_0, %c0_1] : memref<1x64x64xf32, #tpu.memory_space<vmem>>, vector<1x64x64xf32>
    %1 = vector.shape_cast %0 : vector<1x64x64xf32> to vector<64x64xf32>
    %c0_2 = arith.constant 0 : index
    %c0_3 = arith.constant 0 : index
    %c0_4 = arith.constant 0 : index
    %2 = vector.load %arg2[%c0_2, %c0_3, %c0_4] : memref<1x64x512xf32, #tpu.memory_space<vmem>>, vector<1x64x64xf32>
    %3 = vector.shape_cast %2 : vector<1x64x64xf32> to vector<64x64xf32>
    %cst = arith.constant 1.250000e-01 : f32
    %4 = vector.broadcast %cst : f32 to vector<64x64xf32>
    %5 = arith.mulf %3, %4 : vector<64x64xf32>
    %c0_5 = arith.constant 0 : index
    %c0_6 = arith.constant 0 : index
    %c0_7 = arith.constant 0 : index
    %c0_8 = arith.constant 0 : index
    %6 = vector.load %arg3[%c0_5, %c0_6, %c0_7, %c0_8] : memref<1x8x64x64xf32, #tpu.memory_space<vmem>>, vector<1x1x64x64xf32>
    %7 = vector.shape_cast %6 : vector<1x1x64x64xf32> to vector<64x64xf32>
    %c0_9 = arith.constant 0 : index
    %c0_10 = arith.constant 0 : index
    %c0_11 = arith.constant 0 : index
    %c0_12 = arith.constant 0 : index
    %8 = vector.load %arg4[%c0_9, %c0_10, %c0_11, %c0_12] : memref<1x8x64x64xf32, #tpu.memory_space<vmem>>, vector<1x1x64x64xf32>
    %9 = vector.shape_cast %8 : vector<1x1x64x64xf32> to vector<64x64xf32>
    %cst_13 = arith.constant dense<0.000000e+00> : vector<64x64xf32>
    %10 = tpu.matmul %5, %7, %cst_13 {dimension_numbers = #tpu.dot_dimension_numbers<[1], [1], [0], [0], [0, 0, 1, 0], [], []>} : vector<64x64xf32>, vector<64x64xf32>, vector<64x64xf32> -> vector<64x64xf32>
    %11 = arith.addf %10, %1 : vector<64x64xf32>
    %cst_14 = arith.constant dense<0xFF800000> : vector<64xf32>
    %12 = vector.multi_reduction <maximumf>, %11, %cst_14 [1] : vector<64x64xf32> to vector<64xf32>
    %13 = vector.shape_cast %12 : vector<64xf32> to vector<64x1xf32>
    %14 = vector.broadcast %13 : vector<64x1xf32> to vector<64x64xf32>
    %15 = arith.subf %11, %14 : vector<64x64xf32>
    %16 = math.exp %15 : vector<64x64xf32>
    %cst_15 = arith.constant dense<0.000000e+00> : vector<64xf32>
    %17 = vector.multi_reduction <add>, %16, %cst_15 [1] : vector<64x64xf32> to vector<64xf32>
    %18 = vector.shape_cast %17 : vector<64xf32> to vector<64x1xf32>
    %cst_16 = arith.constant dense<0.000000e+00> : vector<64x64xf32>
    %19 = tpu.matmul %16, %9, %cst_16 {dimension_numbers = #tpu.dot_dimension_numbers<[1], [0], [0], [1], [0, 0, 1, 1], [], []>} : vector<64x64xf32>, vector<64x64xf32>, vector<64x64xf32> -> vector<64x64xf32>
    %20 = tpu.reciprocal %18 {approx = true} : vector<64x1xf32> -> vector<64x1xf32>
    %21 = vector.broadcast %20 : vector<64x1xf32> to vector<64x64xf32>
    %22 = arith.mulf %19, %21 : vector<64x64xf32>
    %c0_17 = arith.constant 0 : index
    %c0_18 = arith.constant 0 : index
    %c0_19 = arith.constant 0 : index
    %23 = vector.load %arg6[%c0_17, %c0_18, %c0_19] : memref<1x64x512xf32, #tpu.memory_space<vmem>>, vector<1x64x64xf32>
    %24 = vector.shape_cast %23 : vector<1x64x64xf32> to vector<64x64xf32>
    %25 = vector.shape_cast %22 : vector<64x64xf32> to vector<1x64x64xf32>
    tpu.vector_store %arg6[%c0_17, %c0_18, %c0_19], %25 {strides = array<i32>} : memref<1x64x512xf32, #tpu.memory_space<vmem>>, vector<1x64x64xf32>,
    %c0_20 = arith.constant 0 : index
    %c0_21 = arith.constant 0 : index
    %c64 = arith.constant 64 : index
    %26 = vector.load %arg2[%c0_20, %c0_21, %c64] : memref<1x64x512xf32, #tpu.memory_space<vmem>>, vector<1x64x64xf32>
    %27 = vector.shape_cast %26 : vector<1x64x64xf32> to vector<64x64xf32>
    %cst_22 = arith.constant 1.250000e-01 : f32
    %28 = vector.broadcast %cst_22 : f32 to vector<64x64xf32>
    %29 = arith.mulf %27, %28 : vector<64x64xf32>
    %c0_23 = arith.constant 0 : index
    %c1 = arith.constant 1 : index
    %c0_24 = arith.constant 0 : index
    %c0_25 = arith.constant 0 : index
    %30 = vector.load %arg3[%c0_23, %c1, %c0_24, %c0_25] : memref<1x8x64x64xf32, #tpu.memory_space<vmem>>, vector<1x1x64x64xf32>
    %31 = vector.shape_cast %30 : vector<1x1x64x64xf32> to vector<64x64xf32>
    %c0_26 = arith.constant 0 : index
    %c1_27 = arith.constant 1 : index
    %c0_28 = arith.constant 0 : index
    %c0_29 = arith.constant 0 : index
    %32 = vector.load %arg4[%c0_26, %c1_27, %c0_28, %c0_29] : memref<1x8x64x64xf32, #tpu.memory_space<vmem>>, vector<1x1x64x64xf32>
    %33 = vector.shape_cast %32 : vector<1x1x64x64xf32> to vector<64x64xf32>
    %cst_30 = arith.constant dense<0.000000e+00> : vector<64x64xf32>
    %34 = tpu.matmul %29, %31, %cst_30 {dimension_numbers = #tpu.dot_dimension_numbers<[1], [1], [0], [0], [0, 0, 1, 0], [], []>} : vector<64x64xf32>, vector<64x64xf32>, vector<64x64xf32> -> vector<64x64xf32>
    %35 = arith.addf %34, %1 : vector<64x64xf32>
    %cst_31 = arith.constant dense<0xFF800000> : vector<64xf32>
    %36 = vector.multi_reduction <maximumf>, %35, %cst_31 [1] : vector<64x64xf32> to vector<64xf32>
    %37 = vector.shape_cast %36 : vector<64xf32> to vector<64x1xf32>
    %38 = vector.broadcast %37 : vector<64x1xf32> to vector<64x64xf32>
    %39 = arith.subf %35, %38 : vector<64x64xf32>
    %40 = math.exp %39 : vector<64x64xf32>
    %cst_32 = arith.constant dense<0.000000e+00> : vector<64xf32>
    %41 = vector.multi_reduction <add>, %40, %cst_32 [1] : vector<64x64xf32> to vector<64xf32>
    %42 = vector.shape_cast %41 : vector<64xf32> to vector<64x1xf32>
    %cst_33 = arith.constant dense<0.000000e+00> : vector<64x64xf32>
    %43 = tpu.matmul %40, %33, %cst_33 {dimension_numbers = #tpu.dot_dimension_numbers<[1], [0], [0], [1], [0, 0, 1, 1], [], []>} : vector<64x64xf32>, vector<64x64xf32>, vector<64x64xf32> -> vector<64x64xf32>
    %44 = tpu.reciprocal %42 {approx = true} : vector<64x1xf32> -> vector<64x1xf32>
    %45 = vector.broadcast %44 : vector<64x1xf32> to vector<64x64xf32>
    %46 = arith.mulf %43, %45 : vector<64x64xf32>
    %c0_34 = arith.constant 0 : index
    %c0_35 = arith.constant 0 : index
    %c64_36 = arith.constant 64 : index
    %47 = vector.load %arg6[%c0_34, %c0_35, %c64_36] : memref<1x64x512xf32, #tpu.memory_space<vmem>>, vector<1x64x64xf32>
    %48 = vector.shape_cast %47 : vector<1x64x64xf32> to vector<64x64xf32>
    %49 = vector.shape_cast %46 : vector<64x64xf32> to vector<1x64x64xf32>
    tpu.vector_store %arg6[%c0_34, %c0_35, %c64_36], %49 {strides = array<i32>} : memref<1x64x512xf32, #tpu.memory_space<vmem>>, vector<1x64x64xf32>,
    %c0_37 = arith.constant 0 : index
    %c0_38 = arith.constant 0 : index
    %c128 = arith.constant 128 : index
    %50 = vector.load %arg2[%c0_37, %c0_38, %c128] : memref<1x64x512xf32, #tpu.memory_space<vmem>>, vector<1x64x64xf32>
    %51 = vector.shape_cast %50 : vector<1x64x64xf32> to vector<64x64xf32>
    %cst_39 = arith.constant 1.250000e-01 : f32
    %52 = vector.broadcast %cst_39 : f32 to vector<64x64xf32>
    %53 = arith.mulf %51, %52 : vector<64x64xf32>
    %c0_40 = arith.constant 0 : index
    %c2 = arith.constant 2 : index
    %c0_41 = arith.constant 0 : index
    %c0_42 = arith.constant 0 : index
    %54 = vector.load %arg3[%c0_40, %c2, %c0_41, %c0_42] : memref<1x8x64x64xf32, #tpu.memory_space<vmem>>, vector<1x1x64x64xf32>
    %55 = vector.shape_cast %54 : vector<1x1x64x64xf32> to vector<64x64xf32>
    %c0_43 = arith.constant 0 : index
    %c2_44 = arith.constant 2 : index
    %c0_45 = arith.constant 0 : index
    %c0_46 = arith.constant 0 : index
    %56 = vector.load %arg4[%c0_43, %c2_44, %c0_45, %c0_46] : memref<1x8x64x64xf32, #tpu.memory_space<vmem>>, vector<1x1x64x64xf32>
    %57 = vector.shape_cast %56 : vector<1x1x64x64xf32> to vector<64x64xf32>
    %cst_47 = arith.constant dense<0.000000e+00> : vector<64x64xf32>
    %58 = tpu.matmul %53, %55, %cst_47 {dimension_numbers = #tpu.dot_dimension_numbers<[1], [1], [0], [0], [0, 0, 1, 0], [], []>} : vector<64x64xf32>, vector<64x64xf32>, vector<64x64xf32> -> vector<64x64xf32>
    %59 = arith.addf %58, %1 : vector<64x64xf32>
    %cst_48 = arith.constant dense<0xFF800000> : vector<64xf32>
    %60 = vector.multi_reduction <maximumf>, %59, %cst_48 [1] : vector<64x64xf32> to vector<64xf32>
    %61 = vector.shape_cast %60 : vector<64xf32> to vector<64x1xf32>
    %62 = vector.broadcast %61 : vector<64x1xf32> to vector<64x64xf32>
    %63 = arith.subf %59, %62 : vector<64x64xf32>
    %64 = math.exp %63 : vector<64x64xf32>
    %cst_49 = arith.constant dense<0.000000e+00> : vector<64xf32>
    %65 = vector.multi_reduction <add>, %64, %cst_49 [1] : vector<64x64xf32> to vector<64xf32>
    %66 = vector.shape_cast %65 : vector<64xf32> to vector<64x1xf32>
    %cst_50 = arith.constant dense<0.000000e+00> : vector<64x64xf32>
    %67 = tpu.matmul %64, %57, %cst_50 {dimension_numbers = #tpu.dot_dimension_numbers<[1], [0], [0], [1], [0, 0, 1, 1], [], []>} : vector<64x64xf32>, vector<64x64xf32>, vector<64x64xf32> -> vector<64x64xf32>
    %68 = tpu.reciprocal %66 {approx = true} : vector<64x1xf32> -> vector<64x1xf32>
    %69 = vector.broadcast %68 : vector<64x1xf32> to vector<64x64xf32>
    %70 = arith.mulf %67, %69 : vector<64x64xf32>
    %c0_51 = arith.constant 0 : index
    %c0_52 = arith.constant 0 : index
    %c128_53 = arith.constant 128 : index
    %71 = vector.load %arg6[%c0_51, %c0_52, %c128_53] : memref<1x64x512xf32, #tpu.memory_space<vmem>>, vector<1x64x64xf32>
    %72 = vector.shape_cast %71 : vector<1x64x64xf32> to vector<64x64xf32>
    %73 = vector.shape_cast %70 : vector<64x64xf32> to vector<1x64x64xf32>
    tpu.vector_store %arg6[%c0_51, %c0_52, %c128_53], %73 {strides = array<i32>} : memref<1x64x512xf32, #tpu.memory_space<vmem>>, vector<1x64x64xf32>,
    %c0_54 = arith.constant 0 : index
    %c0_55 = arith.constant 0 : index
    %c192 = arith.constant 192 : index
    %74 = vector.load %arg2[%c0_54, %c0_55, %c192] : memref<1x64x512xf32, #tpu.memory_space<vmem>>, vector<1x64x64xf32>
    %75 = vector.shape_cast %74 : vector<1x64x64xf32> to vector<64x64xf32>
    %cst_56 = arith.constant 1.250000e-01 : f32
    %76 = vector.broadcast %cst_56 : f32 to vector<64x64xf32>
    %77 = arith.mulf %75, %76 : vector<64x64xf32>
    %c0_57 = arith.constant 0 : index
    %c3 = arith.constant 3 : index
    %c0_58 = arith.constant 0 : index
    %c0_59 = arith.constant 0 : index
    %78 = vector.load %arg3[%c0_57, %c3, %c0_58, %c0_59] : memref<1x8x64x64xf32, #tpu.memory_space<vmem>>, vector<1x1x64x64xf32>
    %79 = vector.shape_cast %78 : vector<1x1x64x64xf32> to vector<64x64xf32>
    %c0_60 = arith.constant 0 : index
    %c3_61 = arith.constant 3 : index
    %c0_62 = arith.constant 0 : index
    %c0_63 = arith.constant 0 : index
    %80 = vector.load %arg4[%c0_60, %c3_61, %c0_62, %c0_63] : memref<1x8x64x64xf32, #tpu.memory_space<vmem>>, vector<1x1x64x64xf32>
    %81 = vector.shape_cast %80 : vector<1x1x64x64xf32> to vector<64x64xf32>
    %cst_64 = arith.constant dense<0.000000e+00> : vector<64x64xf32>
    %82 = tpu.matmul %77, %79, %cst_64 {dimension_numbers = #tpu.dot_dimension_numbers<[1], [1], [0], [0], [0, 0, 1, 0], [], []>} : vector<64x64xf32>, vector<64x64xf32>, vector<64x64xf32> -> vector<64x64xf32>
    %83 = arith.addf %82, %1 : vector<64x64xf32>
    %cst_65 = arith.constant dense<0xFF800000> : vector<64xf32>
    %84 = vector.multi_reduction <maximumf>, %83, %cst_65 [1] : vector<64x64xf32> to vector<64xf32>
    %85 = vector.shape_cast %84 : vector<64xf32> to vector<64x1xf32>
    %86 = vector.broadcast %85 : vector<64x1xf32> to vector<64x64xf32>
    %87 = arith.subf %83, %86 : vector<64x64xf32>
    %88 = math.exp %87 : vector<64x64xf32>
    %cst_66 = arith.constant dense<0.000000e+00> : vector<64xf32>
    %89 = vector.multi_reduction <add>, %88, %cst_66 [1] : vector<64x64xf32> to vector<64xf32>
    %90 = vector.shape_cast %89 : vector<64xf32> to vector<64x1xf32>
    %cst_67 = arith.constant dense<0.000000e+00> : vector<64x64xf32>
    %91 = tpu.matmul %88, %81, %cst_67 {dimension_numbers = #tpu.dot_dimension_numbers<[1], [0], [0], [1], [0, 0, 1, 1], [], []>} : vector<64x64xf32>, vector<64x64xf32>, vector<64x64xf32> -> vector<64x64xf32>
    %92 = tpu.reciprocal %90 {approx = true} : vector<64x1xf32> -> vector<64x1xf32>
    %93 = vector.broadcast %92 : vector<64x1xf32> to vector<64x64xf32>
    %94 = arith.mulf %91, %93 : vector<64x64xf32>
    %c0_68 = arith.constant 0 : index
    %c0_69 = arith.constant 0 : index
    %c192_70 = arith.constant 192 : index
    %95 = vector.load %arg6[%c0_68, %c0_69, %c192_70] : memref<1x64x512xf32, #tpu.memory_space<vmem>>, vector<1x64x64xf32>
    %96 = vector.shape_cast %95 : vector<1x64x64xf32> to vector<64x64xf32>
    %97 = vector.shape_cast %94 : vector<64x64xf32> to vector<1x64x64xf32>
    tpu.vector_store %arg6[%c0_68, %c0_69, %c192_70], %97 {strides = array<i32>} : memref<1x64x512xf32, #tpu.memory_space<vmem>>, vector<1x64x64xf32>,
    %c0_71 = arith.constant 0 : index
    %c0_72 = arith.constant 0 : index
    %c256 = arith.constant 256 : index
    %98 = vector.load %arg2[%c0_71, %c0_72, %c256] : memref<1x64x512xf32, #tpu.memory_space<vmem>>, vector<1x64x64xf32>
    %99 = vector.shape_cast %98 : vector<1x64x64xf32> to vector<64x64xf32>
    %cst_73 = arith.constant 1.250000e-01 : f32
    %100 = vector.broadcast %cst_73 : f32 to vector<64x64xf32>
    %101 = arith.mulf %99, %100 : vector<64x64xf32>
    %c0_74 = arith.constant 0 : index
    %c4 = arith.constant 4 : index
    %c0_75 = arith.constant 0 : index
    %c0_76 = arith.constant 0 : index
    %102 = vector.load %arg3[%c0_74, %c4, %c0_75, %c0_76] : memref<1x8x64x64xf32, #tpu.memory_space<vmem>>, vector<1x1x64x64xf32>
    %103 = vector.shape_cast %102 : vector<1x1x64x64xf32> to vector<64x64xf32>
    %c0_77 = arith.constant 0 : index
    %c4_78 = arith.constant 4 : index
    %c0_79 = arith.constant 0 : index
    %c0_80 = arith.constant 0 : index
    %104 = vector.load %arg4[%c0_77, %c4_78, %c0_79, %c0_80] : memref<1x8x64x64xf32, #tpu.memory_space<vmem>>, vector<1x1x64x64xf32>
    %105 = vector.shape_cast %104 : vector<1x1x64x64xf32> to vector<64x64xf32>
    %cst_81 = arith.constant dense<0.000000e+00> : vector<64x64xf32>
    %106 = tpu.matmul %101, %103, %cst_81 {dimension_numbers = #tpu.dot_dimension_numbers<[1], [1], [0], [0], [0, 0, 1, 0], [], []>} : vector<64x64xf32>, vector<64x64xf32>, vector<64x64xf32> -> vector<64x64xf32>
    %107 = arith.addf %106, %1 : vector<64x64xf32>
    %cst_82 = arith.constant dense<0xFF800000> : vector<64xf32>
    %108 = vector.multi_reduction <maximumf>, %107, %cst_82 [1] : vector<64x64xf32> to vector<64xf32>
    %109 = vector.shape_cast %108 : vector<64xf32> to vector<64x1xf32>
    %110 = vector.broadcast %109 : vector<64x1xf32> to vector<64x64xf32>
    %111 = arith.subf %107, %110 : vector<64x64xf32>
    %112 = math.exp %111 : vector<64x64xf32>
    %cst_83 = arith.constant dense<0.000000e+00> : vector<64xf32>
    %113 = vector.multi_reduction <add>, %112, %cst_83 [1] : vector<64x64xf32> to vector<64xf32>
    %114 = vector.shape_cast %113 : vector<64xf32> to vector<64x1xf32>
    %cst_84 = arith.constant dense<0.000000e+00> : vector<64x64xf32>
    %115 = tpu.matmul %112, %105, %cst_84 {dimension_numbers = #tpu.dot_dimension_numbers<[1], [0], [0], [1], [0, 0, 1, 1], [], []>} : vector<64x64xf32>, vector<64x64xf32>, vector<64x64xf32> -> vector<64x64xf32>
    %116 = tpu.reciprocal %114 {approx = true} : vector<64x1xf32> -> vector<64x1xf32>
    %117 = vector.broadcast %116 : vector<64x1xf32> to vector<64x64xf32>
    %118 = arith.mulf %115, %117 : vector<64x64xf32>
    %c0_85 = arith.constant 0 : index
    %c0_86 = arith.constant 0 : index
    %c256_87 = arith.constant 256 : index
    %119 = vector.load %arg6[%c0_85, %c0_86, %c256_87] : memref<1x64x512xf32, #tpu.memory_space<vmem>>, vector<1x64x64xf32>
    %120 = vector.shape_cast %119 : vector<1x64x64xf32> to vector<64x64xf32>
    %121 = vector.shape_cast %118 : vector<64x64xf32> to vector<1x64x64xf32>
    tpu.vector_store %arg6[%c0_85, %c0_86, %c256_87], %121 {strides = array<i32>} : memref<1x64x512xf32, #tpu.memory_space<vmem>>, vector<1x64x64xf32>,
    %c0_88 = arith.constant 0 : index
    %c0_89 = arith.constant 0 : index
    %c320 = arith.constant 320 : index
    %122 = vector.load %arg2[%c0_88, %c0_89, %c320] : memref<1x64x512xf32, #tpu.memory_space<vmem>>, vector<1x64x64xf32>
    %123 = vector.shape_cast %122 : vector<1x64x64xf32> to vector<64x64xf32>
    %cst_90 = arith.constant 1.250000e-01 : f32
    %124 = vector.broadcast %cst_90 : f32 to vector<64x64xf32>
    %125 = arith.mulf %123, %124 : vector<64x64xf32>
    %c0_91 = arith.constant 0 : index
    %c5 = arith.constant 5 : index
    %c0_92 = arith.constant 0 : index
    %c0_93 = arith.constant 0 : index
    %126 = vector.load %arg3[%c0_91, %c5, %c0_92, %c0_93] : memref<1x8x64x64xf32, #tpu.memory_space<vmem>>, vector<1x1x64x64xf32>
    %127 = vector.shape_cast %126 : vector<1x1x64x64xf32> to vector<64x64xf32>
    %c0_94 = arith.constant 0 : index
    %c5_95 = arith.constant 5 : index
    %c0_96 = arith.constant 0 : index
    %c0_97 = arith.constant 0 : index
    %128 = vector.load %arg4[%c0_94, %c5_95, %c0_96, %c0_97] : memref<1x8x64x64xf32, #tpu.memory_space<vmem>>, vector<1x1x64x64xf32>
    %129 = vector.shape_cast %128 : vector<1x1x64x64xf32> to vector<64x64xf32>
    %cst_98 = arith.constant dense<0.000000e+00> : vector<64x64xf32>
    %130 = tpu.matmul %125, %127, %cst_98 {dimension_numbers = #tpu.dot_dimension_numbers<[1], [1], [0], [0], [0, 0, 1, 0], [], []>} : vector<64x64xf32>, vector<64x64xf32>, vector<64x64xf32> -> vector<64x64xf32>
    %131 = arith.addf %130, %1 : vector<64x64xf32>
    %cst_99 = arith.constant dense<0xFF800000> : vector<64xf32>
    %132 = vector.multi_reduction <maximumf>, %131, %cst_99 [1] : vector<64x64xf32> to vector<64xf32>
    %133 = vector.shape_cast %132 : vector<64xf32> to vector<64x1xf32>
    %134 = vector.broadcast %133 : vector<64x1xf32> to vector<64x64xf32>
    %135 = arith.subf %131, %134 : vector<64x64xf32>
    %136 = math.exp %135 : vector<64x64xf32>
    %cst_100 = arith.constant dense<0.000000e+00> : vector<64xf32>
    %137 = vector.multi_reduction <add>, %136, %cst_100 [1] : vector<64x64xf32> to vector<64xf32>
    %138 = vector.shape_cast %137 : vector<64xf32> to vector<64x1xf32>
    %cst_101 = arith.constant dense<0.000000e+00> : vector<64x64xf32>
    %139 = tpu.matmul %136, %129, %cst_101 {dimension_numbers = #tpu.dot_dimension_numbers<[1], [0], [0], [1], [0, 0, 1, 1], [], []>} : vector<64x64xf32>, vector<64x64xf32>, vector<64x64xf32> -> vector<64x64xf32>
    %140 = tpu.reciprocal %138 {approx = true} : vector<64x1xf32> -> vector<64x1xf32>
    %141 = vector.broadcast %140 : vector<64x1xf32> to vector<64x64xf32>
    %142 = arith.mulf %139, %141 : vector<64x64xf32>
    %c0_102 = arith.constant 0 : index
    %c0_103 = arith.constant 0 : index
    %c320_104 = arith.constant 320 : index
    %143 = vector.load %arg6[%c0_102, %c0_103, %c320_104] : memref<1x64x512xf32, #tpu.memory_space<vmem>>, vector<1x64x64xf32>
    %144 = vector.shape_cast %143 : vector<1x64x64xf32> to vector<64x64xf32>
    %145 = vector.shape_cast %142 : vector<64x64xf32> to vector<1x64x64xf32>
    tpu.vector_store %arg6[%c0_102, %c0_103, %c320_104], %145 {strides = array<i32>} : memref<1x64x512xf32, #tpu.memory_space<vmem>>, vector<1x64x64xf32>,
    %c0_105 = arith.constant 0 : index
    %c0_106 = arith.constant 0 : index
    %c384 = arith.constant 384 : index
    %146 = vector.load %arg2[%c0_105, %c0_106, %c384] : memref<1x64x512xf32, #tpu.memory_space<vmem>>, vector<1x64x64xf32>
    %147 = vector.shape_cast %146 : vector<1x64x64xf32> to vector<64x64xf32>
    %cst_107 = arith.constant 1.250000e-01 : f32
    %148 = vector.broadcast %cst_107 : f32 to vector<64x64xf32>
    %149 = arith.mulf %147, %148 : vector<64x64xf32>
    %c0_108 = arith.constant 0 : index
    %c6 = arith.constant 6 : index
    %c0_109 = arith.constant 0 : index
    %c0_110 = arith.constant 0 : index
    %150 = vector.load %arg3[%c0_108, %c6, %c0_109, %c0_110] : memref<1x8x64x64xf32, #tpu.memory_space<vmem>>, vector<1x1x64x64xf32>
    %151 = vector.shape_cast %150 : vector<1x1x64x64xf32> to vector<64x64xf32>
    %c0_111 = arith.constant 0 : index
    %c6_112 = arith.constant 6 : index
    %c0_113 = arith.constant 0 : index
    %c0_114 = arith.constant 0 : index
    %152 = vector.load %arg4[%c0_111, %c6_112, %c0_113, %c0_114] : memref<1x8x64x64xf32, #tpu.memory_space<vmem>>, vector<1x1x64x64xf32>
    %153 = vector.shape_cast %152 : vector<1x1x64x64xf32> to vector<64x64xf32>
    %cst_115 = arith.constant dense<0.000000e+00> : vector<64x64xf32>
    %154 = tpu.matmul %149, %151, %cst_115 {dimension_numbers = #tpu.dot_dimension_numbers<[1], [1], [0], [0], [0, 0, 1, 0], [], []>} : vector<64x64xf32>, vector<64x64xf32>, vector<64x64xf32> -> vector<64x64xf32>
    %155 = arith.addf %154, %1 : vector<64x64xf32>
    %cst_116 = arith.constant dense<0xFF800000> : vector<64xf32>
    %156 = vector.multi_reduction <maximumf>, %155, %cst_116 [1] : vector<64x64xf32> to vector<64xf32>
    %157 = vector.shape_cast %156 : vector<64xf32> to vector<64x1xf32>
    %158 = vector.broadcast %157 : vector<64x1xf32> to vector<64x64xf32>
    %159 = arith.subf %155, %158 : vector<64x64xf32>
    %160 = math.exp %159 : vector<64x64xf32>
    %cst_117 = arith.constant dense<0.000000e+00> : vector<64xf32>
    %161 = vector.multi_reduction <add>, %160, %cst_117 [1] : vector<64x64xf32> to vector<64xf32>
    %162 = vector.shape_cast %161 : vector<64xf32> to vector<64x1xf32>
    %cst_118 = arith.constant dense<0.000000e+00> : vector<64x64xf32>
    %163 = tpu.matmul %160, %153, %cst_118 {dimension_numbers = #tpu.dot_dimension_numbers<[1], [0], [0], [1], [0, 0, 1, 1], [], []>} : vector<64x64xf32>, vector<64x64xf32>, vector<64x64xf32> -> vector<64x64xf32>
    %164 = tpu.reciprocal %162 {approx = true} : vector<64x1xf32> -> vector<64x1xf32>
    %165 = vector.broadcast %164 : vector<64x1xf32> to vector<64x64xf32>
    %166 = arith.mulf %163, %165 : vector<64x64xf32>
    %c0_119 = arith.constant 0 : index
    %c0_120 = arith.constant 0 : index
    %c384_121 = arith.constant 384 : index
    %167 = vector.load %arg6[%c0_119, %c0_120, %c384_121] : memref<1x64x512xf32, #tpu.memory_space<vmem>>, vector<1x64x64xf32>
    %168 = vector.shape_cast %167 : vector<1x64x64xf32> to vector<64x64xf32>
    %169 = vector.shape_cast %166 : vector<64x64xf32> to vector<1x64x64xf32>
    tpu.vector_store %arg6[%c0_119, %c0_120, %c384_121], %169 {strides = array<i32>} : memref<1x64x512xf32, #tpu.memory_space<vmem>>, vector<1x64x64xf32>,
    %c0_122 = arith.constant 0 : index
    %c0_123 = arith.constant 0 : index
    %c448 = arith.constant 448 : index
    %170 = vector.load %arg2[%c0_122, %c0_123, %c448] : memref<1x64x512xf32, #tpu.memory_space<vmem>>, vector<1x64x64xf32>
    %171 = vector.shape_cast %170 : vector<1x64x64xf32> to vector<64x64xf32>
    %cst_124 = arith.constant 1.250000e-01 : f32
    %172 = vector.broadcast %cst_124 : f32 to vector<64x64xf32>
    %173 = arith.mulf %171, %172 : vector<64x64xf32>
    %c0_125 = arith.constant 0 : index
    %c7 = arith.constant 7 : index
    %c0_126 = arith.constant 0 : index
    %c0_127 = arith.constant 0 : index
    %174 = vector.load %arg3[%c0_125, %c7, %c0_126, %c0_127] : memref<1x8x64x64xf32, #tpu.memory_space<vmem>>, vector<1x1x64x64xf32>
    %175 = vector.shape_cast %174 : vector<1x1x64x64xf32> to vector<64x64xf32>
    %c0_128 = arith.constant 0 : index
    %c7_129 = arith.constant 7 : index
    %c0_130 = arith.constant 0 : index
    %c0_131 = arith.constant 0 : index
    %176 = vector.load %arg4[%c0_128, %c7_129, %c0_130, %c0_131] : memref<1x8x64x64xf32, #tpu.memory_space<vmem>>, vector<1x1x64x64xf32>
    %177 = vector.shape_cast %176 : vector<1x1x64x64xf32> to vector<64x64xf32>
    %cst_132 = arith.constant dense<0.000000e+00> : vector<64x64xf32>
    %178 = tpu.matmul %173, %175, %cst_132 {dimension_numbers = #tpu.dot_dimension_numbers<[1], [1], [0], [0], [0, 0, 1, 0], [], []>} : vector<64x64xf32>, vector<64x64xf32>, vector<64x64xf32> -> vector<64x64xf32>
    %179 = arith.addf %178, %1 : vector<64x64xf32>
    %cst_133 = arith.constant dense<0xFF800000> : vector<64xf32>
    %180 = vector.multi_reduction <maximumf>, %179, %cst_133 [1] : vector<64x64xf32> to vector<64xf32>
    %181 = vector.shape_cast %180 : vector<64xf32> to vector<64x1xf32>
    %182 = vector.broadcast %181 : vector<64x1xf32> to vector<64x64xf32>
    %183 = arith.subf %179, %182 : vector<64x64xf32>
    %184 = math.exp %183 : vector<64x64xf32>
    %cst_134 = arith.constant dense<0.000000e+00> : vector<64xf32>
    %185 = vector.multi_reduction <add>, %184, %cst_134 [1] : vector<64x64xf32> to vector<64xf32>
    %186 = vector.shape_cast %185 : vector<64xf32> to vector<64x1xf32>
    %cst_135 = arith.constant dense<0.000000e+00> : vector<64x64xf32>
    %187 = tpu.matmul %184, %177, %cst_135 {dimension_numbers = #tpu.dot_dimension_numbers<[1], [0], [0], [1], [0, 0, 1, 1], [], []>} : vector<64x64xf32>, vector<64x64xf32>, vector<64x64xf32> -> vector<64x64xf32>
    %188 = tpu.reciprocal %186 {approx = true} : vector<64x1xf32> -> vector<64x1xf32>
    %189 = vector.broadcast %188 : vector<64x1xf32> to vector<64x64xf32>
    %190 = arith.mulf %187, %189 : vector<64x64xf32>
    %c0_136 = arith.constant 0 : index
    %c0_137 = arith.constant 0 : index
    %c448_138 = arith.constant 448 : index
    %191 = vector.load %arg6[%c0_136, %c0_137, %c448_138] : memref<1x64x512xf32, #tpu.memory_space<vmem>>, vector<1x64x64xf32>
    %192 = vector.shape_cast %191 : vector<1x64x64xf32> to vector<64x64xf32>
    %193 = vector.shape_cast %190 : vector<64x64xf32> to vector<1x64x64xf32>
    tpu.vector_store %arg6[%c0_136, %c0_137, %c448_138], %193 {strides = array<i32>} : memref<1x64x512xf32, #tpu.memory_space<vmem>>, vector<1x64x64xf32>,
    return
  }
  func.func @transform_0(%arg0: i32, %arg1: i32) -> (i32, i32, i32) {
    %c0_i32 = arith.constant 0 : i32
    %c0_i32_0 = arith.constant 0 : i32
    return %arg0, %arg1, %c0_i32 : i32, i32, i32
  }
  func.func @transform_1(%arg0: i32, %arg1: i32) -> (i32, i32, i32, i32) {
    %c0_i32 = arith.constant 0 : i32
    %c0_i32_0 = arith.constant 0 : i32
    %c0_i32_1 = arith.constant 0 : i32
    %c0_i32_2 = arith.constant 0 : i32
    return %arg0, %c0_i32, %c0_i32_0, %c0_i32_1 : i32, i32, i32, i32
  }
  func.func @transform_2(%arg0: i32, %arg1: i32) -> (i32, i32, i32, i32) {
    %c0_i32 = arith.constant 0 : i32
    %c0_i32_0 = arith.constant 0 : i32
    %c0_i32_1 = arith.constant 0 : i32
    %c0_i32_2 = arith.constant 0 : i32
    return %arg0, %c0_i32, %c0_i32_0, %c0_i32_1 : i32, i32, i32, i32
  }
  func.func @transform_3(%arg0: i32, %arg1: i32) -> (i32, i32, i32) {
    %c0_i32 = arith.constant 0 : i32
    %c0_i32_0 = arith.constant 0 : i32
    return %arg0, %arg1, %c0_i32 : i32, i32, i32
  }
  func.func @transform_4(%arg0: i32, %arg1: i32) -> (i32, i32, i32) {
    %c0_i32 = arith.constant 0 : i32
    %c0_i32_0 = arith.constant 0 : i32
    return %arg0, %arg1, %c0_i32 : i32, i32, i32
  }
}

</mosaic_0001>

<bundles_post_ra>
// kernel: tpu_custom_call.1
= control target key start
LH: loop header
LB: loop body
LE: loop exit
PB: predicated region body
PF: predicated region fallthrough
CT: control target
= control target key end

     0   :  { %s5784_s0 = inlined_call_operand.hbm [shape: f32[2,64,512], index: 0, kind: input, shape index: {}]   ;;  %s5785_s1 = inlined_call_operand.hbm [shape: f32[2,8,64,64], index: 1, kind: input, shape index: {}]   ;;  %s5786_s2 = inlined_call_operand.hbm [shape: f32[2,8,64,64], index: 2, kind: input, shape index: {}]   ;;  %s5787_s3 = inlined_call_operand.hbm [shape: f32[2,64,64], index: 3, kind: input, shape index: {}]   ;;  %s5788_s4 = inlined_call_operand.hbm [shape: f32[2,64,512], index: 4, kind: output, shape index: {}]  }
   0x1   :  { %5805 = sst [smem:[#allocation27_spill]] %s5784_s0 }
   0x2   :  { %5806 = sst [smem:[#allocation28_spill]] %s5785_s1 }
   0x3   :  { %5807 = sst [smem:[#allocation29_spill]] %s5786_s2 }
   0x4   :  { %9 = vsyncpa [#allocation3], 0 }
   0x5   :  { %11 = vsyncpa [#allocation3 + $0x1], 0 }
   0x6   :  { %12 = vsyncpa [#allocation6], 0 }
   0x7   :  { %14 = vsyncpa [#allocation6 + $0x1], 0 }
   0x8   :  { %15 = vsyncpa [#allocation9], 0 }
   0x9   :  { %17 = vsyncpa [#allocation9 + $0x1], 0 }
   0xa   :  { %18 = vsyncpa [#allocation4], 0 }
   0xb   :  { %20 = vsyncpa [#allocation4 + $0x1], 0  ;;  %s3966_s15 = smov 0   ;;  %s3968_s16 = smov 0  }
   0xc   :  { %s3970_s17 = smov 0   ;;  %s3972_s18 = smov 0  }
   0xd   :  { %s3974_s19 = smov 0   ;;  %s3976_s20 = smov 0  }
   0xe LB: > { %5808 = sst [smem:[#allocation15_spill]] %s3920_s17  ;;  %s3997_s21 = sadd.s32 4294967295, %s3932_s20   ;;  %s3932_s20 = sphi %s3976_s20, %s26_s20   ;;  %s3928_s19 = sphi %s3974_s19, %s5846_s19   ;;  %s3924_s18 = sphi %s3972_s18, %s5845_s18   ;;  %s3920_s17 = sphi %s3970_s17, %s5841_s17   ;;  %s3916_s16 = sphi %s3968_s16, %s5844_s16   ;;  %s3912_s15 = sphi %s3966_s15, %s5843_s15  }
   0xf   : > { %5809 = sst [smem:[#allocation16_spill]] %s3932_s20  ;;  %s3015_s22 = sadd.s32 4294967294, %s3932_s20  }
  0x10   : > { %s38_s23 = sadd.s32 1, %s3928_s19  ;;  %s47_s24 = sadd.s32 1, %s3920_s17 }
  0x11   : > { %p40_p0 = scmp.ge.s32.totalorder %s38_s23, 2  ;;  %p54_p1 = scmp.ne.s32.totalorder %s3920_s17, %s3916_s16 }
  0x12   : > { %p55_p2 = scmp.eq.s32.totalorder %s3932_s20, 0  ;;  %p60_p3 = scmp.ne.s32.totalorder %s3916_s16, %s3912_s15 }
  0x13   : > { %s5848_s23 = smov (%p40_p0, %s38_s23), 0  ;;  %p61_p5 = scmp.eq.s32.totalorder %s3997_s21, 0 }
  0x14   : > { %5810 = sst [smem:[#allocation17_spill]] %s5848_s23  ;;  %p4009_p4 = por %p55_p2, %p54_p1 }
  0x15   : > { %s42_s26 = ssub.s32 %s3928_s19, %s5848_s23  ;;  %p166_p6 = scmp.eq.s32.totalorder %s3997_s21, 1 }
  0x16   : > { %p45_p7 = scmp.eq.s32.totalorder %s42_s26, 0  ;;  %p4017_p8 = por %p61_p5, %p60_p3 }
  0x17   : > { %p4021_p9 = por %p166_p6, %p54_p1  ;;  %p172_p10 = scmp.eq.s32.totalorder %s3015_s22, 1 }
  0x18   : > { %s4026_s29 = scalar_select %p45_p7, %s3920_s17, %s47_s24  }
  0x19   : > { %p4028_p11 = por %p172_p10, %p60_p3  ;;  %p3017_p12 = scmp.ge.s32.totalorder %s3932_s20, 2 }
  0x1a   : > { %5814 = sst [smem:[#allocation18_spill]] %s4026_s29  ;;  %p3393_p13 = scmp.lt.s32.totalorder %s3932_s20, 2 }
  0x1b   : > { %s5815_s30 = scalar_select %p4028_p11, 1, 0 }
  0x1c   : > { %s4035_s5 = sand.u32 1, %s3920_s17   ;;  %s217_s6 = sand.u32 1, %s3932_s20  }
  0x1d   : > { %5816 = sst [smem:[#allocation19_spill]] %s5815_s30  ;;  %s3021_s7 = sshll.u32 %s4035_s5, 9 }
  0x1e   : > { %p4041_p0 = pnand %p3393_p13, %p4009_p4  ;;  %s3346_s9 = sshll.u32 %s3928_s19, 9 }
  0x1f   : > { %s5818_s1 = sld [smem:[#allocation28_spill]]  ;;  %s221_s14 = scalar_lea.vmem [#allocation5], %s3021_s7 }
  0x20   : > { %s229_s22 = sshll.u32 %s221_s14, 4  ;;  %s4049_s24 = scalar_lea.sflag [#allocation6], %s217_s6  ;;  %s230_s22 = int_to_ptr.vmem [resolvable:$true] %s229_s22 }
  0x21   : > { %s5790_s25 = smov 128   ;;  %s5792_s26 = smov 8  }
  0x22   : > { %s5819_s2 = sld [smem:[#allocation29_spill]]  ;;  %s243_s14 = scalar_lea.vmem [#allocation7], %s3021_s7 }
  0x23   : > { %s251_s23 = sshll.u32 %s243_s14, 4  ;;  %p3030_p1 = scmp.ge.s32.totalorder %s3932_s20, 1  ;;  %s252_s23 = int_to_ptr.vmem [resolvable:$true] %s251_s23 }
  0x24   : > { %p283_p2 = scmp.lt.s32.totalorder %s3932_s20, 3  ;;  %s5821_s0 = sld [smem:[#allocation27_spill]] }
  0x25   : > { %s226_s12 = scalar_lea.hbm %s5818_s1, %s3346_s9  ;;  %s5822_s29 = smov 8  }
  0x26   : > { %s227_s13 = sshll.u32 %s226_s12, 4  ;;  %p4062_p3 = pnand %p3030_p1, %p283_p2  ;;  %s228_s13 = int_to_ptr.hbm [resolvable:$true] %s227_s13 }
  0x27   : > { %3382 = dma.hbm_to_vmem [thread:$0]  (!%p4041_p0), %s228_s13, 8192, %s230_s22, %s4049_s24, %s5790_s25, %s5790_s25, %s5792_s26  }
  0x28   : > { %s248_s12 = scalar_lea.hbm %s5819_s2, %s3346_s9  ;;  %s3018_s13 = sshll.u32 %s4035_s5, 8 }
  0x29   : > { %s249_s1 = sshll.u32 %s248_s12, 4  ;;  %s3345_s22 = sshll.u32 %s3928_s19, 8  ;;  %s250_s1 = int_to_ptr.hbm [resolvable:$true] %s249_s1 }
  0x2a   : > { %s204_s7 = scalar_lea.hbm %s5821_s0, %s3345_s22  ;;  %s196_s12 = scalar_lea.vmem [#allocation2], %s3018_s13 }
  0x2b   : > { %s205_s11 = sshll.u32 %s204_s7, 4  ;;  %s207_s14 = sshll.u32 %s196_s12, 4  ;;  %s206_s11 = int_to_ptr.hbm [resolvable:$true] %s205_s11  ;;  %s208_s14 = int_to_ptr.vmem [resolvable:$true] %s207_s14 }
  0x2c   : > { %s193_s25 = scalar_lea.sflag [#allocation3], %s4035_s5  ;;  %s3936_s26 = smov 512  }
  0x2d   : > { %s3937_s2 = smov 32   ;;  %s5823_s17 = smov 128  }
  0x2e   : > { %3379 = dma.hbm_to_vmem [thread:$0]  (!%p4041_p0), %s206_s11, 4096, %s208_s14, %s193_s25, %s3936_s26, %s3936_s26, %s3937_s2  }
  0x2f   : > { %3385 = dma.hbm_to_vmem [thread:$0]  (!%p4041_p0), %s250_s1, 8192, %s252_s23, %s4049_s24, %s5823_s17, %s5823_s17, %s5822_s29  }
  0x30   : > { %s3027_s20 = sshll.u32 %s4035_s5, 6  ;;  %s3348_s9 = sshll.u32 %s3928_s19, 6 }
  0x31   : > { %s272_s13 = scalar_lea.hbm %s5787_s3, %s3348_s9  ;;  %s265_s7 = scalar_lea.vmem [#allocation8], %s3027_s20 }
  0x32   : > { %s275_s12 = sshll.u32 %s265_s7, 4  ;;  %s273_s0 = sshll.u32 %s272_s13, 4  ;;  %s276_s12 = int_to_ptr.vmem [resolvable:$true] %s275_s12  ;;  %s274_s0 = int_to_ptr.hbm [resolvable:$true] %s273_s0 }
  0x33   : > { %s262_s30 = scalar_lea.sflag [#allocation9], %s4035_s5  ;;  %287 = sbr.rel (%p4062_p3) target bundleno = 1475 (0x5c3), region = 36 }
  0x34   : > { %3388 = dma.hbm_to_vmem [thread:$0]  (!%p4041_p0), %s274_s0, 1024, %s276_s12, %s262_s30, %s5823_s17, %s5823_s17, %s5822_s29  }
  0x38   : > { %s4094_s1 = sand.u32 1, %s3916_s16  }
  0x39   : > { %s3031_s2 = sshll.u32 %s4094_s1, 8  ;;  %s290_s20 = scalar_lea.sflag [#allocation3], %s4094_s1 }
  0x3a   : > { %s4100_s23 = scalar_lea.vmem [#allocation2], %s3031_s2 }
  0x3b   : > { %3895 = dma.done.wait (%p4017_p8), %s290_s20, 4096  }
  0x3c   : > { %3897 = vsyncadd (%p4017_p8), %s290_s20, 4294963200  ;;  %s299_s0 = sand.u32 1, %s3997_s21   ;;  %s3032_s17 = sshll.u32 %s4094_s1, 9 }
  0x3d   : > { %s300_s29 = scalar_lea.sflag [#allocation6], %s299_s0  ;;  %s4108_s30 = scalar_lea.vmem [#allocation5], %s3032_s17 }
  0x3e   : > { %3899 = dma.done.wait (%p4017_p8), %s300_s29, 16384  }
  0x3f   : > { %3901 = vsyncadd (%p4017_p8), %s300_s29, 4294950912  ;;  %s3034_s5 = sshll.u32 %s4094_s1, 6  ;;  %s4115_s8 = scalar_lea.vmem [#allocation7], %s3032_s17 }
  0x40   : > { %s320_s24 = scalar_lea.sflag [#allocation9], %s4094_s1  ;;  %s4118_s25 = scalar_lea.vmem [#allocation8], %s3034_s5 }
  0x41   : > { %3903 = dma.done.wait (%p4017_p8), %s320_s24, 1024  }
  0x42   : > { %3905 = vsyncadd (%p4017_p8), %s320_s24, 4294966272  ;;  %vm407_vm0 = vcmask 523264   ;;  %v398_v0 = vld [vmem:[%s4108_s30 + $0x38] sm:$0xff]  ;;  %v659_v1 = vld [vmem:[%s4100_s23 + $0x20] sm:$0xff]  ;;  %s3938_s21 = smov 64   ;;  %s4627_s27 = scalar_lea.vmem [#allocation10], %s3031_s2 }
  0x43   : > { %v658_v2 = vld [vmem:[%s4100_s23] sm:$0xff]  ;;  %3036 = vmatpush.xpose.msk.msra.mxu0 %vm407_vm0, %v398_v0  ;;  %v667_v3 = vmul.f32 0.125, %v659_v1  ;;  %v397_v5 = vld [vmem:[%s4108_s30 + $0x30] sm:$0xff]  ;;  %v396_v8 = vld [vmem:[%s4108_s30 + $0x28] sm:$0xff]  ;;  %vm982_vm1 = vcmask 1048064   ;;  %s3349_s26 = sshll.u32 %s3924_s18, 8 }
  0x44   : > { %v666_v4 = vmul.f32 0.125, %v658_v2  ;;  %v662_v6 = vld [vmem:[%s4100_s23 + $0x80] sm:$0xff]  ;;  %v394_v16 = vld [vmem:[%s4108_s30 + $0x18] sm:$0xff]  ;;  %v393_v19 = vld [vmem:[%s4108_s30 + $0x10] sm:$0xff]  ;;  %s2854_s14 = scalar_lea.hbm %s5788_s4, %s3349_s26  ;;  %s2855_s9 = sshll.u32 %s4627_s27, 4  ;;  %s2856_s9 = int_to_ptr.vmem [resolvable:$true] %s2855_s9 }
  0x45   : > { %702 = vrot.lane.b32.xlu0 %v667_v3, %s3938_s21  ;;  %v661_v7 = vld [vmem:[%s4100_s23 + $0x60] sm:$0xff]  ;;  %v4135_v9 = vmul.f32 0.125, %v662_v6  ;;  %v1275_v20 = vld [vmem:[%s4100_s23 + $0x8] sm:$0xff]  ;;  %v3067_v35 = vld [vmem:[%s4108_s30 + $0x78] sm:$0xff]  ;;  %s2857_s22 = sshll.u32 %s2854_s14, 4  ;;  %s2840_s10 = scalar_lea.sflag [#allocation4], %s4094_s1  ;;  %s2858_s22 = int_to_ptr.hbm [resolvable:$true] %s2857_s22 }
  0x46   : > { %700 = vrot.lane.b32.xlu1 %v666_v4, %s3938_s21  ;;  %v669_v10 = vmul.f32 0.125, %v661_v7  ;;  %v660_v11 = vld [vmem:[%s4100_s23 + $0x40] sm:$0xff]  ;;  %v392_v22 = vld [vmem:[%s4108_s30 + $0x8] sm:$0xff]  ;;  %v4162_v23 = vmul.f32 0.125, %v1275_v20  ;;  %v1894_v36 = vld [vmem:[%s4100_s23 + $0x70] sm:$0xff]  ;;  %3076 = vmatpush.xpose.msk.msra.mxu2 %vm407_vm0, %v3067_v35  ;;  %s3856_s13 = sshra.s32 %s2858_s22, 4  ;;  %s3857_s13 = int_to_ptr.hbm [resolvable:$true] %s3856_s13 }
  0x47   : > { %3037 = vmatpush.xpose.msk.msra.mxu0 %vm407_vm0, %v397_v5  ;;  %v668_v12 = vmul.f32 0.125, %v660_v11  ;;  %v395_v13 = vld [vmem:[%s4108_s30 + $0x20] sm:$0xff]  ;;  %v1276_v25 = vld [vmem:[%s4100_s23 + $0x28] sm:$0xff]  ;;  %v1902_v38 = vmul.f32 0.125, %v1894_v36  ;;  %v3066_v39 = vld [vmem:[%s4108_s30 + $0x70] sm:$0xff]  ;;  %s3858_s7 = scalar_lea.hbm %s3857_s13, 256  ;;  %p3863_p7 = scmp.lt.s32.totalorder %s3857_s13, %s5788_s4 }
  0x48   : > { %v664_v14 = vld [vmem:[%s4100_s23 + $0xc0] sm:$0xff]  ;;  %v1284_v26 = vmul.f32 0.125, %v1276_v25  ;;  %v1277_v28 = vld [vmem:[%s4100_s23 + $0x48] sm:$0xff]  ;;  %v1891_v41 = vld [vmem:[%s4100_s23 + $0x10] sm:$0xff]  ;;  %p3859_p4 = scmp.ne.s32.totalorder %s3857_s13, %s3858_s7  ;;  %s3862_s2 = scalar_lea.hbm %s5788_s4, 512 }
  0x49   : > { %v663_v15 = vld [vmem:[%s4100_s23 + $0xa0] sm:$0xff]  ;;  %704 = vrot.lane.b32.xlu2 %v668_v12, %s3938_s21  ;;  %v4148_v17 = vmul.f32 0.125, %v664_v14  ;;  %v1278_v29 = vld [vmem:[%s4100_s23 + $0x68] sm:$0xff]  ;;  %v1285_v30 = vmul.f32 0.125, %v1277_v28  ;;  %v1899_v43 = vmul.f32 0.125, %v1891_v41  ;;  %v1895_v44 = vld [vmem:[%s4100_s23 + $0x90] sm:$0xff]  ;;  %p3864_p8 = scmp.lt.s32.totalorder %s3862_s2, %s3858_s7 }
  0x4a   : > { %v4150_v18 = vmul.f32 0.125, %v663_v15  ;;  %v665_v21 = vld [vmem:[%s4100_s23 + $0xe0] sm:$0xff]  ;;  %v1286_v31 = vmul.f32 0.125, %v1278_v29  ;;  %v1281_v32 = vld [vmem:[%s4100_s23 + $0xc8] sm:$0xff]  ;;  %3077 = vmatpush.xpose.msk.msra.mxu2 %vm407_vm0, %v3066_v39  ;;  %v1903_v46 = vmul.f32 0.125, %v1895_v44  ;;  %v1892_v47 = vld [vmem:[%s4100_s23 + $0x30] sm:$0xff]  ;;  %p3860_p5 = pnand %p3859_p4, %p4021_p9 }
  0x4b   : > { %3038 = vmatpush.xpose.msk.msra.mxu0 %vm407_vm0, %v396_v8  ;;  %v4164_v24 = vmul.f32 0.125, %v665_v21  ;;  %v391_v27 = vld [vmem:[%s4108_s30] sm:$0xff]  ;;  %v1289_v33 = vmul.f32 0.125, %v1281_v32  ;;  %v1279_v34 = vld [vmem:[%s4100_s23 + $0x88] sm:$0xff]  ;;  %v1897_v49 = vld [vmem:[%s4100_s23 + $0xd0] sm:$0xff]  ;;  %v1900_v52 = vmul.f32 0.125, %v1892_v47  ;;  %p3865_p10 = por %p3864_p8, %p3863_p7 }
  0x4c   : > { %v1287_v37 = vmul.f32 0.125, %v1279_v34  ;;  %v1280_v40 = vld [vmem:[%s4100_s23 + $0xa8] sm:$0xff]  ;;  %v3147_v50 = vld [vmem:[%s4108_s30 + $0xf8] sm:$0xff]  ;;  %v3064_v51 = vld [vmem:[%s4108_s30 + $0x60] sm:$0xff]  ;;  %v1905_v55 = vmul.f32 0.125, %v1897_v49  ;;  %p3861_p6 = pneg %p3860_p5 }
  0x4d   : > { %708 = vrot.lane.b32.xlu0 %v4135_v9, %s3938_s21  ;;  %v1288_v42 = vmul.f32 0.125, %v1280_v40  ;;  %v3065_v45 = vld [vmem:[%s4108_s30 + $0x68] sm:$0xff]  ;;  %v3146_v54 = vld [vmem:[%s4108_s30 + $0xf0] sm:$0xff]  ;;  %v3063_v56 = vld [vmem:[%s4108_s30 + $0x58] sm:$0xff] }
  0x4e   : > { %706 = vrot.lane.b32.xlu1 %v669_v10, %s3938_s21  ;;  %v1282_v48 = vld [vmem:[%s4100_s23 + $0xe8] sm:$0xff]  ;;  %3078 = vmatpush.xpose.msk.msra.mxu2 %vm407_vm0, %v3065_v45  ;;  %v1893_v57 = vld [vmem:[%s4100_s23 + $0x50] sm:$0xff]  ;;  %v2508_v58 = vld [vmem:[%s4100_s23 + $0x38] sm:$0xff]  ;;  %p3866_p13 = pnand %p3865_p10, %p3861_p6 }
  0x4f   : > { %3039 = vmatpush.xpose.msk.msra.mxu0 %vm407_vm0, %v395_v13  ;;  %v1290_v53 = vmul.f32 0.125, %v1282_v48  ;;  %v3062_v59 = vld [vmem:[%s4108_s30 + $0x50] sm:$0xff]  ;;  %v1901_v60 = vmul.f32 0.125, %v1893_v57  ;;  %v2516_v61 = vmul.f32 0.125, %v2508_v58  ;;  %v3061_v62 = vld [vmem:[%s4108_s30 + $0x48] sm:$0xff]  ;;  %v3060_v63 = vld [vmem:[%s4108_s30 + $0x40] sm:$0xff] }
  0x50   : > { %v2511_v0 = vld [vmem:[%s4100_s23 + $0x98] sm:$0xff]  ;;  %v1898_v1 = vld [vmem:[%s4100_s23 + $0xf0] sm:$0xff]  ;;  %v3144_v5 = vld [vmem:[%s4108_s30 + $0xe0] sm:$0xff] }
  0x51   : > { %1319 = vrot.lane.b32.xlu2 %v1284_v26, %s3938_s21  ;;  %v2519_v2 = vmul.f32 0.125, %v2511_v0  ;;  %v2507_v6 = vld [vmem:[%s4100_s23 + $0x18] sm:$0xff]  ;;  %v3140_v13 = vld [vmem:[%s4108_s30 + $0xc0] sm:$0xff]  ;;  %v1896_v14 = vld [vmem:[%s4100_s23 + $0xb0] sm:$0xff] }
  0x52   : > { %3079 = vmatpush.xpose.msk.msra.mxu2 %vm407_vm0, %v3064_v51  ;;  %v2515_v7 = vmul.f32 0.125, %v2507_v6  ;;  %v3143_v8 = vld [vmem:[%s4108_s30 + $0xd8] sm:$0xff]  ;;  %v1904_v15 = vmul.f32 0.125, %v1896_v14  ;;  %v3226_v29 = vld [vmem:[%s4108_s30 + $0x170] sm:$0xff]  ;;  %v3224_v32 = vld [vmem:[%s4108_s30 + $0x160] sm:$0xff] }
  0x53   : > { %3040 = vmatpush.xpose.msk.msra.mxu0 %vm407_vm0, %v394_v16  ;;  %v4272_v34 = vld [vmem:[%s4118_s25] sm:$0xff]  ;;  %v3222_v39 = vld [vmem:[%s4108_s30 + $0x150] sm:$0xff]  ;;  %v4286_v41 = vld [vmem:[%s4118_s25 + $0x8] sm:$0xff] }
  0x54   : > { %v3221_v44 = vld [vmem:[%s4108_s30 + $0x148] sm:$0xff]  ;;  %v3220_v47 = vld [vmem:[%s4108_s30 + $0x140] sm:$0xff]  ;;  %v4300_v48 = vld [vmem:[%s4118_s25 + $0x10] sm:$0xff] }
  0x55   : > { %712 = vrot.lane.b32.xlu0 %v4148_v17, %s3938_s21  ;;  %v4320_v58 = vld [vmem:[%s4118_s25 + $0x20] sm:$0xff]  ;;  %v3305_v14 = vld [vmem:[%s4108_s30 + $0x1e8] sm:$0xff] }
  0x56   : > { %710 = vrot.lane.b32.xlu1 %v4150_v18, %s3938_s21  ;;  %3080 = vmatpush.xpose.msk.msra.mxu2 %vm407_vm0, %v3063_v56 }
  0x57   : > { %3041 = vmatpush.xpose.msk.msra.mxu0 %vm407_vm0, %v393_v19 }
  0x59   : > { %1325 = vrot.lane.b32.xlu2 %v1287_v37, %s3938_s21  ;;  %v3223_v37 = vld [vmem:[%s4108_s30 + $0x158] sm:$0xff] }
  0x5a   : > { %3081 = vmatpush.xpose.msk.msra.mxu2 %vm407_vm0, %v3062_v59 }
  0x5b   : > { %3042 = vmatpush.xpose.msk.msra.mxu0 %vm407_vm0, %v392_v22 }
  0x5d   : > { %1317 = vrot.lane.b32.xlu0 %v4162_v23, %s3938_s21 }
  0x5e   : > { %714 = vrot.lane.b32.xlu1 %v4164_v24, %s3938_s21  ;;  %3082 = vmatpush.xpose.msk.msra.mxu2 %vm407_vm0, %v3061_v62 }
  0x5f   : > { %3043 = vmatpush.xpose.msk.msra.mxu0 %vm407_vm0, %v391_v27  ;;  %v3227_v27 = vld [vmem:[%s4108_s30 + $0x178] sm:$0xff] }
  0x61   : > { %1327 = vrot.lane.b32.xlu2 %v1288_v42, %s3938_s21 }
  0x62   : > { %3044 = vmatmul.msk.f32.vlgmr.msra.gmra.mxu0 %vm407_vm0, %v666_v4  ;;  %3083 = vmatpush.xpose.msk.msra.mxu2 %vm407_vm0, %v3060_v63  ;;  %v3145_v4 = vld [vmem:[%s4108_s30 + $0xe8] sm:$0xff] }
  0x63   : > { %3156 = vmatpush.xpose.msk.msrb.mxu0 %vm407_vm0, %v3147_v50  ;;  %v4329_v63 = vld [vmem:[%s4118_s25 + $0x28] sm:$0xff] }
  0x65   : > { %1323 = vrot.lane.b32.xlu0 %v1286_v31, %s3938_s21  ;;  %v3225_v31 = vld [vmem:[%s4108_s30 + $0x168] sm:$0xff] }
  0x66   : > { %1321 = vrot.lane.b32.xlu1 %v1285_v30, %s3938_s21 }
  0x67   : > { %3157 = vmatpush.xpose.msk.msrb.mxu0 %vm407_vm0, %v3146_v54 }
  0x69   : > { %1331 = vrot.lane.b32.xlu2 %v1290_v53, %s3938_s21  ;;  %v4311_v53 = vld [vmem:[%s4118_s25 + $0x18] sm:$0xff] }
  0x6a   : > { %3045 = vmatmul.msk.f32.gmra.mxu0 %vm407_vm0, %v667_v3  ;;  %v1906_v3 = vmul.f32 0.125, %v1898_v1 }
  0x6b   : > { %3158 = vmatpush.xpose.msk.msrb.mxu0 %vm407_vm0, %v3145_v4  ;;  %v4338_v4 = vld [vmem:[%s4118_s25 + $0x30] sm:$0xff] }
  0x6d   : > { %1939 = vrot.lane.b32.xlu0 %v1902_v38, %s3938_s21 }
  0x6e   : > { %1329 = vrot.lane.b32.xlu1 %v1289_v33, %s3938_s21 }
  0x6f   : > { %3159 = vmatpush.xpose.msk.msrb.mxu0 %vm407_vm0, %v3144_v5 }
  0x71   : > { %1943 = vrot.lane.b32.xlu2 %v1904_v15, %s3938_s21 }
  0x72   : > { %3046 = vmatmul.msk.f32.gmra.mxu0 %vm407_vm0, %v668_v12  ;;  %v3141_v12 = vld [vmem:[%s4108_s30 + $0xc8] sm:$0xff] }
  0x73   : > { %3160 = vmatpush.xpose.msk.msrb.mxu0 %vm407_vm0, %v3143_v8 }
  0x75   : > { %1941 = vrot.lane.b32.xlu0 %v1903_v46, %s3938_s21 }
  0x76   : > { %1933 = vrot.lane.b32.xlu1 %v1899_v43, %s3938_s21 }
  0x7a   : > { %3047 = vmatmul.msk.f32.gmra.mxu0 %vm407_vm0, %v669_v10  ;;  %v2510_v10 = vld [vmem:[%s4100_s23 + $0x78] sm:$0xff] }
  0x7b   : > { %v2518_v11 = vmul.f32 0.125, %v2510_v10 }
  0x7d   : > { %1945 = vrot.lane.b32.xlu0 %v1905_v55, %s3938_s21 }
  0x7e   : > { %1935 = vrot.lane.b32.xlu1 %v1900_v52, %s3938_s21 }
  0x82   : > { %3048 = vmatmul.msk.f32.gmra.mxu0 %vm407_vm0, %v4135_v9  ;;  %v3142_v9 = vld [vmem:[%s4108_s30 + $0xd0] sm:$0xff] }
  0x83   : > { %3161 = vmatpush.xpose.msk.msrb.mxu0 %vm407_vm0, %v3142_v9  ;;  %v3306_v9 = vld [vmem:[%s4108_s30 + $0x1f0] sm:$0xff] }
  0x85   : > { %2551 = vrot.lane.b32.xlu0 %v2516_v61, %s3938_s21 }
  0x86   : > { %1937 = vrot.lane.b32.xlu1 %v1901_v60, %s3938_s21 }
  0x87   : > { %3162 = vmatpush.xpose.msk.msrb.mxu0 %vm407_vm0, %v3141_v12 }
  0x8a   : > { %3049 = vmatmul.msk.f32.gmra.mxu0 %vm407_vm0, %v4150_v18  ;;  %v2509_v18 = vld [vmem:[%s4100_s23 + $0x58] sm:$0xff] }
  0x8b   : > { %3163 = vmatpush.xpose.msk.msrb.mxu0 %vm407_vm0, %v3140_v13  ;;  %v2517_v19 = vmul.f32 0.125, %v2509_v18  ;;  %v3303_v18 = vld [vmem:[%s4108_s30 + $0x1d8] sm:$0xff] }
  0x8d   : > { %2557 = vrot.lane.b32.xlu0 %v2519_v2, %s3938_s21  ;;  %2553 = vrot.lane.b32.xlu2 %v2517_v19, %s3938_s21  ;;  %v3302_v19 = vld [vmem:[%s4108_s30 + $0x1d0] sm:$0xff] }
  0x8e   : > { %1947 = vrot.lane.b32.xlu1 %v1906_v3, %s3938_s21 }
  0x8f   : > { %3236 = vmatpush.xpose.msk.msra.mxu0 %vm407_vm0, %v3227_v27 }
  0x92   : > { %3050 = vmatmul.msk.f32.gmra.mxu0 %vm407_vm0, %v4148_v17 }
  0x93   : > { %3237 = vmatpush.xpose.msk.msra.mxu0 %vm407_vm0, %v3226_v29  ;;  %v403_v29 = vld [vmem:[%s4115_s8 + $0x20] sm:$0xff] }
  0x96   : > { %2549 = vrot.lane.b32.xlu1 %v2515_v7, %s3938_s21  ;;  %v3307_v7 = vld [vmem:[%s4108_s30 + $0x1f8] sm:$0xff] }
  0x97   : > { %3238 = vmatpush.xpose.msk.msra.mxu0 %vm407_vm0, %v3225_v31  ;;  %v402_v31 = vld [vmem:[%s4115_s8 + $0x18] sm:$0xff] }
  0x9a   : > { %3051 = vmatmul.msk.f32.gmra.mxu0 %vm407_vm0, %v4164_v24 }
  0x9b   : > { %3239 = vmatpush.xpose.msk.msra.mxu0 %vm407_vm0, %v3224_v32 }
  0x9e   : > { %2555 = vrot.lane.b32.xlu1 %v2518_v11, %s3938_s21  ;;  %v4350_v11 = vld [vmem:[%s4118_s25 + $0x38] sm:$0xff] }
  0x9f   : > { %3240 = vmatpush.xpose.msk.msra.mxu0 %vm407_vm0, %v3223_v37 }
  0xa3   : > { %v705_v22 = vpop.permute.xlu2 %704  ;;  %3241 = vmatpush.xpose.msk.msra.mxu0 %vm407_vm0, %v3222_v39  ;;  %v399_v39 = vld [vmem:[%s4115_s8] sm:$0xff] }
  0xa7   : > { %3242 = vmatpush.xpose.msk.msra.mxu0 %vm407_vm0, %v3221_v44 }
  0xab   : > { %v1320_v30 = vpop.permute.xlu2 %1319  ;;  %3243 = vmatpush.xpose.msk.msra.mxu0 %vm407_vm0, %v3220_v47 }
  0xb3   : > { %v1326_v46 = vpop.permute.xlu2 %1325 }
  0xb7   : > { %v703_v16 = vpop.permute.xlu0 %702 }
  0xb8   : > { %v701_v17 = vpop.permute.xlu1 %700 }
  0xb9   : > { %3084 = vmatmul.msk.f32.vlgmr.msra.gmra.mxu2 %vm407_vm0, %v701_v17 }
  0xbb   : > { %v1328_v52 = vpop.permute.xlu2 %1327 }
  0xbf   : > { %v709_v20 = vpop.permute.xlu0 %708 }
  0xc0   : > { %v707_v21 = vpop.permute.xlu1 %706 }
  0xc1   : > { %3085 = vmatmul.msk.f32.gmra.mxu2 %vm407_vm0, %v703_v16  ;;  %v3304_v16 = vld [vmem:[%s4108_s30 + $0x1e0] sm:$0xff] }
  0xc3   : > { %v1332_v62 = vpop.permute.xlu2 %1331 }
  0xc7   : > { %v713_v24 = vpop.permute.xlu0 %712 }
  0xc8   : > { %v711_v25 = vpop.permute.xlu1 %710 }
  0xc9   : > { %3086 = vmatmul.msk.f32.gmra.mxu2 %vm407_vm0, %v705_v22  ;;  %v3300_v22 = vld [vmem:[%s4108_s30 + $0x1c0] sm:$0xff] }
  0xcb   : > { %v1944_v27 = vpop.permute.xlu2 %1943 }
  0xcf   : > { %v1318_v26 = vpop.permute.xlu0 %1317 }
  0xd0   : > { %3164 = vmatmul.msk.f32.vlgmr.msrb.gmra.mxu0 %vm407_vm0, %v1318_v26  ;;  %v715_v28 = vpop.permute.xlu1 %714  ;;  %v405_v26 = vld [vmem:[%s4115_s8 + $0x30] sm:$0xff] }
  0xd1   : > { %3087 = vmatmul.msk.f32.gmra.mxu2 %vm407_vm0, %v707_v21  ;;  %3316 = vmatpush.xpose.msk.msrb.mxu0 %vm407_vm0, %v3307_v7  ;;  %v3301_v21 = vld [vmem:[%s4108_s30 + $0x1c8] sm:$0xff] }
  0xd5   : > { %3317 = vmatpush.xpose.msk.msrb.mxu0 %vm407_vm0, %v3306_v9 }
  0xd7   : > { %v1324_v40 = vpop.permute.xlu0 %1323 }
  0xd8   : > { %3165 = vmatmul.msk.f32.gmra.mxu0 %vm407_vm0, %v1320_v30  ;;  %v1322_v33 = vpop.permute.xlu1 %1321 }
  0xd9   : > { %3088 = vmatmul.msk.f32.gmra.mxu2 %vm407_vm0, %v709_v20  ;;  %3318 = vmatpush.xpose.msk.msrb.mxu0 %vm407_vm0, %v3305_v14 }
  0xdd   : > { %3319 = vmatpush.xpose.msk.msrb.mxu0 %vm407_vm0, %v3304_v16 }
  0xdf   : > { %v473_v35 = vpop.f32.mrf.mxu0  ;;  %v1940_v20 = vpop.permute.xlu0 %1939 }
  0xe0   : > { %v4276_v36 = vadd.f32 %v473_v35, %v4272_v34  ;;  %3166 = vmatmul.msk.f32.gmra.mxu0 %vm407_vm0, %v1322_v33  ;;  %v1330_v57 = vpop.permute.xlu1 %1329  ;;  %v401_v35 = vld [vmem:[%s4115_s8 + $0x10] sm:$0xff] }
  0xe1   : > { %3089 = vmatmul.msk.f32.gmra.mxu2 %vm407_vm0, %v711_v25  ;;  %3320 = vmatpush.xpose.msk.msrb.mxu0 %vm407_vm0, %v3303_v18  ;;  %v406_v25 = vld [vmem:[%s4115_s8 + $0x38] sm:$0xff] }
  0xe2   : > { %v497_v38 = vsel %vm407_vm0, %v4276_v36, -inf  ;;  %601 = vmatpush.msra.mxu1 %v406_v25  ;;  %v3107_v18 = vld [vmem:[%s4108_s30 + $0xb8] sm:$0xff] }
  0xe3   : > { %498 = vmax.xlane.f32.xlu0 %v497_v38  ;;  %v400_v38 = vld [vmem:[%s4115_s8 + $0x8] sm:$0xff] }
  0xe4   : > { %602 = vmatpush.msra.mxu1 %v405_v26 }
  0xe5   : > { %3321 = vmatpush.xpose.msk.msrb.mxu0 %vm407_vm0, %v3302_v19 }
  0xe7   : > { %v476_v42 = vpop.f32.mrf.mxu0  ;;  %v2554_v9 = vpop.permute.xlu2 %2553 }
  0xe8   : > { %v4290_v43 = vadd.f32 %v476_v42, %v4286_v41  ;;  %3167 = vmatmul.msk.f32.gmra.mxu0 %vm407_vm0, %v1324_v40  ;;  %v1934_v2 = vpop.permute.xlu1 %1933 }
  0xe9   : > { %3090 = vmatmul.msk.f32.gmra.mxu2 %vm407_vm0, %v713_v24  ;;  %3322 = vmatpush.xpose.msk.msrb.mxu0 %vm407_vm0, %v3301_v21  ;;  %v1942_v24 = vpop.permute.xlu0 %1941 }
  0xea   : > { %v500_v45 = vsel %vm407_vm0, %v4290_v43, -inf }
  0xeb   : > { %501 = vmax.xlane.f32.xlu0 %v500_v45 }
  0xed   : > { %3323 = vmatpush.xpose.msk.msrb.mxu0 %vm407_vm0, %v3300_v22  ;;  %v3106_v22 = vld [vmem:[%s4108_s30 + $0xb0] sm:$0xff] }
  0xef   : > { %v479_v49 = vpop.f32.mrf.mxu0 }
  0xf0   : > { %v4304_v50 = vadd.f32 %v479_v49, %v4300_v48  ;;  %3168 = vmatmul.msk.f32.gmra.mxu0 %vm407_vm0, %v1326_v46  ;;  %v1936_v10 = vpop.permute.xlu1 %1935 }
  0xf1   : > { %3091 = vmatmul.msk.f32.gmra.mxu2 %vm407_vm0, %v715_v28  ;;  %v404_v28 = vld [vmem:[%s4115_s8 + $0x28] sm:$0xff]  ;;  %v1946_v30 = vpop.permute.xlu0 %1945 }
  0xf2   : > { %v503_v51 = vsel %vm407_vm0, %v4304_v50, -inf  ;;  %603 = vmatpush.msra.mxu1 %v404_v28 }
  0xf3   : > { %504 = vmax.xlane.f32.xlu1 %v503_v51 }
  0xf4   : > { %604 = vmatpush.msra.mxu1 %v403_v29  ;;  %v3105_v29 = vld [vmem:[%s4108_s30 + $0xa8] sm:$0xff] }
  0xf6   : > { %605 = vmatpush.msra.mxu1 %v402_v31 }
  0xf7   : > { %v482_v54 = vpop.f32.mrf.mxu0 }
  0xf8   : > { %v4314_v55 = vadd.f32 %v482_v54, %v4311_v53  ;;  %3169 = vmatmul.msk.f32.gmra.mxu0 %vm407_vm0, %v1328_v52  ;;  %v1938_v17 = vpop.permute.xlu1 %1937  ;;  %606 = vmatpush.msra.mxu1 %v401_v35 }
  0xf9   : > { %v2552_v42 = vpop.permute.xlu0 %2551 }
  0xfa   : > { %v506_v56 = vsel %vm407_vm0, %v4314_v55, -inf  ;;  %607 = vmatpush.msra.mxu1 %v400_v38 }
  0xfb   : > { %507 = vmax.xlane.f32.xlu1 %v506_v56 }
  0xfc   : > { %608 = vmatpush.msra.mxu1 %v399_v39 }
  0xfe   : > { %3116 = vmatpush.xpose.msk.msrb.mxu1 %vm407_vm0, %v3107_v18 }
  0xff   : > { %v485_v59 = vpop.f32.mrf.mxu0 }
 0x100   : > { %v4323_v60 = vadd.f32 %v485_v59, %v4320_v58  ;;  %3170 = vmatmul.msk.f32.gmra.mxu0 %vm407_vm0, %v1330_v57  ;;  %v1948_v45 = vpop.permute.xlu1 %1947 }
 0x101   : > { %v2558_v52 = vpop.permute.xlu0 %2557 }
 0x102   : > { %v509_v61 = vsel %vm407_vm0, %v4323_v60, -inf  ;;  %3117 = vmatpush.xpose.msk.msrb.mxu1 %vm407_vm0, %v3106_v22 }
 0x103   : > { %510 = vmax.xlane.f32.xlu2 %v509_v61 }
 0x106   : > { %3118 = vmatpush.xpose.msk.msrb.mxu1 %vm407_vm0, %v3105_v29  ;;  %v3073_v29 = vld [vmem:[%s4115_s8 + $0x68] sm:$0xff] }
 0x107   : > { %v488_v0 = vpop.f32.mrf.mxu0 }
 0x108   : > { %v4332_v1 = vadd.f32 %v488_v0, %v4329_v63  ;;  %3171 = vmatmul.msk.f32.gmra.mxu0 %vm407_vm0, %v1332_v62  ;;  %v2550_v56 = vpop.permute.xlu1 %2549 }
 0x10a   : > { %v512_v3 = vsel %vm407_vm0, %v4332_v1, -inf }
 0x10b   : > { %513 = vmax.xlane.f32.xlu2 %v512_v3 }
 0x10f   : > { %v491_v5 = vpop.f32.mrf.mxu0 }
 0x110   : > { %v4341_v6 = vadd.f32 %v491_v5, %v4338_v4  ;;  %3244 = vmatmul.msk.f32.vlgmr.msra.gmra.mxu0 %vm407_vm0, %v1934_v2 }
 0x112   : > { %v515_v8 = vsel %vm407_vm0, %v4341_v6, -inf }
 0x113   : > { %516 = vmax.xlane.f32.xlu0 %v515_v8 }
 0x117   : > { %v494_v12 = vpop.f32.mrf.mxu0 }
 0x118   : > { %v4354_v13 = vadd.f32 %v494_v12, %v4350_v11  ;;  %3245 = vmatmul.msk.f32.gmra.mxu0 %vm407_vm0, %v1936_v10  ;;  %v2556_v10 = vpop.permute.xlu1 %2555 }
 0x11a   : > { %v518_v15 = vsel %vm407_vm0, %v4354_v13, -inf }
 0x11b   : > { %519 = vmax.xlane.f32.xlu1 %v518_v15 }
 0x120   : > { %3246 = vmatmul.msk.f32.gmra.mxu0 %vm407_vm0, %v1938_v17 }
 0x128   : > { %3247 = vmatmul.msk.f32.gmra.mxu0 %vm407_vm0, %v1940_v20 }
 0x130   : > { %3248 = vmatmul.msk.f32.gmra.mxu0 %vm407_vm0, %v1942_v24 }
 0x138   : > { %3249 = vmatmul.msk.f32.gmra.mxu0 %vm407_vm0, %v1944_v27 }
 0x13c   : > { %v773_v32 = vpop.f32.mrf.mxu2 }
 0x13d   : > { %v4381_v33 = vadd.f32 %v773_v32, %v4272_v34 }
 0x13f   : > { %v797_v37 = vsel %vm407_vm0, %v4381_v33, -inf }
 0x140   : > { %798 = vmax.xlane.f32.xlu1 %v797_v37  ;;  %3250 = vmatmul.msk.f32.gmra.mxu0 %vm407_vm0, %v1946_v30  ;;  %v3104_v37 = vld [vmem:[%s4108_s30 + $0xa0] sm:$0xff] }
 0x141   : > { %3119 = vmatpush.xpose.msk.msrb.mxu1 %vm407_vm0, %v3104_v37 }
 0x144   : > { %v776_v40 = vpop.f32.mrf.mxu2 }
 0x145   : > { %v4390_v44 = vadd.f32 %v776_v40, %v4286_v41 }
 0x147   : > { %v800_v46 = vsel %vm407_vm0, %v4390_v44, -inf }
 0x148   : > { %801 = vmax.xlane.f32.xlu0 %v800_v46  ;;  %3251 = vmatmul.msk.f32.gmra.mxu0 %vm407_vm0, %v1948_v45  ;;  %v3103_v45 = vld [vmem:[%s4108_s30 + $0x98] sm:$0xff] }
 0x149   : > { %3120 = vmatpush.xpose.msk.msrb.mxu1 %vm407_vm0, %v3103_v45 }
 0x14c   : > { %v779_v47 = vpop.f32.mrf.mxu2 }
 0x14d   : > { %v4396_v49 = vadd.f32 %v779_v47, %v4300_v48  ;;  %v4398_v51 = vpop.f32.mrf.mxu0 }
 0x14f   : > { %v803_v54 = vsel %vm407_vm0, %v4396_v49, -inf }
 0x150   : > { %804 = vmax.xlane.f32.xlu2 %v803_v54  ;;  %3324 = vmatmul.msk.f32.vlgmr.msrb.gmra.mxu0 %vm407_vm0, %v2550_v56  ;;  %v3102_v54 = vld [vmem:[%s4108_s30 + $0x90] sm:$0xff] }
 0x151   : > { %3121 = vmatpush.xpose.msk.msrb.mxu1 %vm407_vm0, %v3102_v54  ;;  %v2513_v54 = vld [vmem:[%s4100_s23 + $0xd8] sm:$0xff] }
 0x154   : > { %v782_v57 = vpop.f32.mrf.mxu2 }
 0x155   : > { %v4404_v59 = vadd.f32 %v782_v57, %v4311_v53  ;;  %v4406_v61 = vpop.f32.mrf.mxu0 }
 0x156   : > { %v499_v62 = vpop.xlane.xlu0 %498 }
 0x157   : > { %v806_v0 = vsel %vm407_vm0, %v4404_v59, -inf  ;;  %v521_v2 = vsub.f32 %v4276_v36, %v499_v62 }
 0x158   : > { %807 = vmax.xlane.f32.xlu1 %v806_v0  ;;  %3325 = vmatmul.msk.f32.gmra.mxu0 %vm407_vm0, %v2552_v42 }
 0x159   : > { %v529_v3 = vmul.f32 1.442695, %v521_v2  ;;  %v3101_v2 = vld [vmem:[%s4108_s30 + $0x88] sm:$0xff] }
 0x15a   : > { %3122 = vmatpush.xpose.msk.msrb.mxu1 %vm407_vm0, %v3101_v2 }
 0x15b   : > { %3450 = vpow2.f32 %v529_v3 }
 0x15c   : > { %v785_v5 = vpop.f32.mrf.mxu2 }
 0x15d   : > { %v4413_v7 = vadd.f32 %v785_v5, %v4320_v58  ;;  %v4415_v8 = vpop.f32.mrf.mxu0 }
 0x15e   : > { %v502_v12 = vpop.xlane.xlu0 %501 }
 0x15f   : > { %v809_v14 = vsel %vm407_vm0, %v4413_v7, -inf  ;;  %v522_v36 = vsub.f32 %v4290_v43, %v502_v12 }
 0x160   : > { %810 = vmax.xlane.f32.xlu0 %v809_v14  ;;  %3326 = vmatmul.msk.f32.gmra.mxu0 %vm407_vm0, %v2554_v9  ;;  %v3100_v9 = vld [vmem:[%s4108_s30 + $0x80] sm:$0xff] }
 0x161   : > { %v3451_v15 = vpop.eup %3450  ;;  %v531_v16 = vmul.f32 1.442695, %v522_v36  ;;  %3123 = vmatpush.xpose.msk.msrb.mxu1 %vm407_vm0, %v3100_v9 }
 0x162   : > { %3052 = vmatmul.msk.f32.vlgmr.msra.gmra.mxu1 %vm407_vm0, %v3451_v15  ;;  %v545_v17 = vsel %vm407_vm0, %v3451_v15, 0.0 }
 0x163   : > { %3452 = vpow2.f32 %v531_v16  ;;  %546 = vadd.xlane.f32.xlu2 %v545_v17 }
 0x164   : > { %v788_v19 = vpop.f32.mrf.mxu2 }
 0x165   : > { %v4426_v20 = vadd.f32 %v788_v19, %v4329_v63  ;;  %v4428_v43 = vpop.f32.mrf.mxu0 }
 0x166   : > { %v505_v21 = vpop.xlane.xlu1 %504 }
 0x167   : > { %v523_v24 = vsub.f32 %v4304_v50, %v505_v21  ;;  %v812_v25 = vsel %vm407_vm0, %v4426_v20, -inf }
 0x168   : > { %3327 = vmatmul.msk.f32.gmra.mxu0 %vm407_vm0, %v2556_v10 }
 0x169   : > { %v3453_v26 = vpop.eup %3452  ;;  %v533_v27 = vmul.f32 1.442695, %v523_v24 }
 0x16a   : > { %3053 = vmatmul.msk.f32.gmra.mxu1 %vm407_vm0, %v3453_v26  ;;  %v548_v28 = vsel %vm407_vm0, %v3453_v26, 0.0 }
 0x16b   : > { %3454 = vpow2.f32 %v533_v27  ;;  %813 = vmax.xlane.f32.xlu2 %v812_v25  ;;  %549 = vadd.xlane.f32.xlu0 %v548_v28  ;;  %v3074_v25 = vld [vmem:[%s4115_s8 + $0x70] sm:$0xff] }
 0x16c   : > { %v791_v30 = vpop.f32.mrf.mxu2 }
 0x16d   : > { %v4440_v50 = vadd.f32 %v791_v30, %v4338_v4  ;;  %v4443_v31 = vpop.f32.mrf.mxu0  ;;  %v2512_v30 = vld [vmem:[%s4100_s23 + $0xb8] sm:$0xff] }
 0x16e   : > { %v508_v32 = vpop.xlane.xlu1 %507  ;;  %v4499_v37 = vmul.f32 0.125, %v2512_v30 }
 0x16f   : > { %v815_v35 = vsel %vm407_vm0, %v4440_v50, -inf  ;;  %v524_v38 = vsub.f32 %v4314_v55, %v508_v32  ;;  %v3072_v32 = vld [vmem:[%s4115_s8 + $0x60] sm:$0xff] }
 0x170   : > { %816 = vmax.xlane.f32.xlu1 %v815_v35  ;;  %3328 = vmatmul.msk.f32.gmra.mxu0 %vm407_vm0, %v2558_v52 }
 0x171   : > { %v3455_v39 = vpop.eup %3454  ;;  %v535_v40 = vmul.f32 1.442695, %v524_v38  ;;  %v3070_v38 = vld [vmem:[%s4115_s8 + $0x50] sm:$0xff] }
 0x172   : > { %3054 = vmatmul.msk.f32.gmra.mxu1 %vm407_vm0, %v3455_v39  ;;  %v551_v42 = vsel %vm407_vm0, %v3455_v39, 0.0  ;;  %v2514_v39 = vld [vmem:[%s4100_s23 + $0xf8] sm:$0xff] }
 0x173   : > { %3456 = vpow2.f32 %v535_v40  ;;  %552 = vadd.xlane.f32.xlu2 %v551_v42  ;;  %v3069_v42 = vld [vmem:[%s4115_s8 + $0x48] sm:$0xff]  ;;  %v4507_v45 = vmul.f32 0.125, %v2514_v39 }
 0x174   : > { %v794_v46 = vpop.f32.mrf.mxu2 }
 0x175   : > { %v4455_v47 = vadd.f32 %v794_v46, %v4350_v11  ;;  %v4458_v55 = vpop.f32.mrf.mxu0  ;;  %v3068_v46 = vld [vmem:[%s4115_s8 + $0x40] sm:$0xff] }
 0x176   : > { %v511_v52 = vpop.xlane.xlu2 %510 }
 0x177   : > { %v525_v56 = vsub.f32 %v4323_v60, %v511_v52  ;;  %v818_v57 = vsel %vm407_vm0, %v4455_v47, -inf }
 0x179   : > { %v3457_v62 = vpop.eup %3456  ;;  %v537_v0 = vmul.f32 1.442695, %v525_v56  ;;  %v4513_v56 = vmul.f32 0.125, %v2513_v54 }
 0x17a   : > { %3055 = vmatmul.msk.f32.gmra.mxu1 %vm407_vm0, %v3457_v62  ;;  %v554_v14 = vsel %vm407_vm0, %v3457_v62, 0.0 }
 0x17b   : > { %3458 = vpow2.f32 %v537_v0  ;;  %819 = vmax.xlane.f32.xlu2 %v818_v57 }
 0x17d   : > { %v4468_v3 = vpop.f32.mrf.mxu0 }
 0x17e   : > { %v514_v5 = vpop.xlane.xlu2 %513 }
 0x17f   : > { %v526_v60 = vsub.f32 %v4332_v1, %v514_v5  ;;  %v4480_v1 = vadd.f32 %v4398_v51, %v4272_v34 }
 0x181   : > { %v3459_v10 = vpop.eup %3458  ;;  %v539_v12 = vmul.f32 1.442695, %v526_v60  ;;  %v1414_v22 = vsel %vm407_vm0, %v4480_v1, -inf }
 0x182   : > { %3056 = vmatmul.msk.f32.gmra.mxu1 %vm407_vm0, %v3459_v10  ;;  %v557_v36 = vsel %vm407_vm0, %v3459_v10, 0.0 }
 0x183   : > { %3460 = vpow2.f32 %v539_v12  ;;  %555 = vadd.xlane.f32.xlu2 %v554_v14  ;;  %558 = vadd.xlane.f32.xlu0 %v557_v36 }
 0x185   : > { %v4476_v15 = vpop.f32.mrf.mxu0 }
 0x186   : > { %v517_v16 = vpop.xlane.xlu0 %516 }
 0x187   : > { %v527_v17 = vsub.f32 %v4341_v6, %v517_v16  ;;  %v3075_v6 = vld [vmem:[%s4115_s8 + $0x78] sm:$0xff] }
 0x188   : > { %901 = vmatpush.msra.mxu3 %v3075_v6 }
 0x189   : > { %v3461_v18 = vpop.eup %3460  ;;  %v541_v19 = vmul.f32 1.442695, %v527_v17  ;;  %v4535_v17 = vadd.f32 %v4415_v8, %v4300_v48 }
 0x18a   : > { %3057 = vmatmul.msk.f32.gmra.mxu1 %vm407_vm0, %v3461_v18  ;;  %v560_v21 = vsel %vm407_vm0, %v3461_v18, 0.0  ;;  %902 = vmatpush.msra.mxu3 %v3074_v25  ;;  %v4555_v25 = vadd.f32 %v4468_v3, %v4338_v4 }
 0x18b   : > { %3462 = vpow2.f32 %v541_v19  ;;  %561 = vadd.xlane.f32.xlu1 %v560_v21  ;;  %1415 = vmax.xlane.f32.xlu0 %v1414_v22  ;;  %v4545_v21 = vadd.f32 %v4458_v55, %v4329_v63 }
 0x18c   : > { %903 = vmatpush.msra.mxu3 %v3073_v29  ;;  %v1432_v3 = vsel %vm407_vm0, %v4555_v25, -inf }
 0x18d   : > { %v4487_v51 = vpop.f32.mrf.mxu0  ;;  %v1429_v6 = vsel %vm407_vm0, %v4545_v21, -inf }
 0x18e   : > { %v520_v24 = vpop.xlane.xlu1 %519  ;;  %904 = vmatpush.msra.mxu3 %v3072_v32 }
 0x18f   : > { %v528_v26 = vsub.f32 %v4354_v13, %v520_v24  ;;  %v3071_v13 = vld [vmem:[%s4115_s8 + $0x58] sm:$0xff] }
 0x190   : > { %905 = vmatpush.msra.mxu3 %v3071_v13 }
 0x191   : > { %v3463_v27 = vpop.eup %3462  ;;  %v543_v28 = vmul.f32 1.442695, %v528_v26  ;;  %v4561_v26 = vadd.f32 %v4406_v61, %v4286_v41 }
 0x192   : > { %3058 = vmatmul.msk.f32.gmra.mxu1 %vm407_vm0, %v3463_v27  ;;  %906 = vmatpush.msra.mxu3 %v3070_v38 }
 0x193   : > { %3464 = vpow2.f32 %v543_v28  ;;  %v1417_v61 = vsel %vm407_vm0, %v4561_v26, -inf }
 0x194   : > { %907 = vmatpush.msra.mxu3 %v3069_v42 }
 0x195   : > { %v4496_v35 = vpop.f32.mrf.mxu0 }
 0x196   : > { %908 = vmatpush.msra.mxu3 %v3068_v46  ;;  %v4593_v46 = vadd.f32 %v4487_v51, %v4272_v34  ;;  %v992_v51 = vld [vmem:[%s4100_s23 + $0x28] sm:$0xff] }
 0x199   : > { %v3465_v40 = vpop.eup %3464 }
 0x19a   : > { %3059 = vmatmul.msk.f32.gmra.mxu1 %vm407_vm0, %v3465_v40  ;;  %v566_v24 = vsel %vm407_vm0, %v3465_v40, 0.0 }
 0x19b   : > { %2559 = vrot.lane.b32.xlu2 %v4499_v37, %s3938_s21 }
 0x19d   : > { %v2012_v52 = vpop.f32.mrf.mxu0 }
 0x19e   : > { %v4579_v13 = vadd.f32 %v2012_v52, %v4300_v48 }
 0x19f   : > { %2563 = vrot.lane.b32.xlu0 %v4507_v45, %s3938_s21 }
 0x1a0   : > { %v2036_v42 = vsel %vm407_vm0, %v4579_v13, -inf }
 0x1a2   : > { %3124 = vmatmul.msk.f32.vlgmr.msrb.gmra.mxu1 %vm407_vm0, %v4162_v23 }
 0x1a4   : > { %2561 = vrot.lane.b32.xlu1 %v4513_v56, %s3938_s21 }
 0x1a5   : > { %v4519_v57 = vpop.f32.mrf.mxu0 }
 0x1ad   : > { %v4521_v62 = vpop.f32.mrf.mxu0 }
 0x1b3   : > { %v799_v0 = vpop.xlane.xlu1 %798 }
 0x1b4   : > { %v821_v2 = vsub.f32 %v4381_v33, %v799_v0  ;;  %v563_v33 = vsel %vm407_vm0, %v3463_v27, 0.0  ;;  %v3155_v0 = vld [vmem:[%s4115_s8 + $0xf8] sm:$0xff] }
 0x1b5   : > { %v2021_v9 = vpop.f32.mrf.mxu0  ;;  %1518 = vmatpush.msrb.mxu2 %v3155_v0 }
 0x1b6   : > { %v829_v5 = vmul.f32 1.442695, %v821_v2  ;;  %v4596_v52 = vadd.f32 %v2021_v9, %v4329_v63  ;;  %v2030_v2 = vsel %vm407_vm0, %v4593_v46, -inf }
 0x1b8   : > { %3466 = vpow2.f32 %v829_v5  ;;  %v3154_v5 = vld [vmem:[%s4115_s8 + $0xf0] sm:$0xff]  ;;  %v2045_v9 = vsel %vm407_vm0, %v4596_v52, -inf }
 0x1b9   : > { %1519 = vmatpush.msrb.mxu2 %v3154_v5 }
 0x1bb   : > { %v802_v60 = vpop.xlane.xlu0 %801 }
 0x1bc   : > { %v822_v10 = vsub.f32 %v4390_v44, %v802_v60 }
 0x1bd   : > { %v4527_v23 = vpop.f32.mrf.mxu0 }
 0x1be   : > { %v4525_v12 = vpop.eup %3466  ;;  %v831_v14 = vmul.f32 1.442695, %v822_v10  ;;  %v1000_v10 = vmul.f32 0.125, %v992_v51 }
 0x1bf   : > { %3092 = vmatmul.msk.f32.vlgmr.msra.gmra.mxu3 %vm407_vm0, %v4525_v12 }
 0x1c0   : > { %3468 = vpow2.f32 %v831_v14  ;;  %3125 = vmatmul.msk.f32.gmra.mxu1 %vm407_vm0, %v1000_v10 }
 0x1c3   : > { %v805_v36 = vpop.xlane.xlu2 %804 }
 0x1c4   : > { %v823_v16 = vsub.f32 %v4396_v49, %v805_v36  ;;  %564 = vadd.xlane.f32.xlu2 %v563_v33  ;;  %v1420_v49 = vsel %vm407_vm0, %v4535_v17, -inf  ;;  %v4613_v36 = vadd.f32 %v4443_v31, %v4320_v58 }
 0x1c5   : > { %v4539_v19 = vpop.f32.mrf.mxu0 }
 0x1c6   : > { %v4537_v44 = vpop.eup %3468  ;;  %v833_v18 = vmul.f32 1.442695, %v823_v16 }
 0x1c7   : > { %3093 = vmatmul.msk.f32.gmra.mxu3 %vm407_vm0, %v4537_v44 }
 0x1c8   : > { %3470 = vpow2.f32 %v833_v18  ;;  %v3153_v18 = vld [vmem:[%s4115_s8 + $0xe8] sm:$0xff] }
 0x1c9   : > { %1421 = vmax.xlane.f32.xlu0 %v1420_v49  ;;  %1520 = vmatpush.msrb.mxu2 %v3153_v18 }
 0x1cb   : > { %v808_v8 = vpop.xlane.xlu1 %807 }
 0x1cc   : > { %v824_v22 = vsub.f32 %v4404_v59, %v808_v8  ;;  %567 = vadd.xlane.f32.xlu2 %v566_v24  ;;  %v4569_v59 = vadd.f32 %v4476_v15, %v4350_v11  ;;  %v4620_v8 = vadd.f32 %v4519_v57, %v4311_v53 }
 0x1cd   : > { %v4563_v28 = vpop.f32.mrf.mxu0 }
 0x1ce   : > { %v4557_v55 = vpop.eup %3470  ;;  %v835_v27 = vmul.f32 1.442695, %v824_v22  ;;  %1430 = vmax.xlane.f32.xlu1 %v1429_v6  ;;  %v1435_v32 = vsel %vm407_vm0, %v4569_v59, -inf  ;;  %v1426_v6 = vsel %vm407_vm0, %v4613_v36, -inf }
 0x1cf   : > { %3094 = vmatmul.msk.f32.gmra.mxu3 %vm407_vm0, %v4557_v55 }
 0x1d0   : > { %3472 = vpow2.f32 %v835_v27  ;;  %v3151_v27 = vld [vmem:[%s4115_s8 + $0xd8] sm:$0xff] }
 0x1d1   : > { %1433 = vmax.xlane.f32.xlu0 %v1432_v3  ;;  %v4637_v3 = vadd.f32 %v4539_v19, %v4350_v11  ;;  %v3149_v19 = vld [vmem:[%s4115_s8 + $0xc8] sm:$0xff] }
 0x1d3   : > { %v811_v29 = vpop.xlane.xlu0 %810  ;;  %v2051_v0 = vsel %vm407_vm0, %v4637_v3, -inf }
 0x1d4   : > { %v825_v30 = vsub.f32 %v4413_v7, %v811_v29  ;;  %1418 = vmax.xlane.f32.xlu2 %v1417_v61  ;;  %v4587_v7 = vadd.f32 %v4428_v43, %v4311_v53  ;;  %v3150_v61 = vld [vmem:[%s4115_s8 + $0xd0] sm:$0xff]  ;;  %v2039_v29 = vsel %vm407_vm0, %v4620_v8, -inf }
 0x1d5   : > { %v2625_v40 = vpop.f32.mrf.mxu0 }
 0x1d6   : > { %v4581_v15 = vpop.eup %3472  ;;  %v837_v38 = vmul.f32 1.442695, %v825_v30  ;;  %1436 = vmax.xlane.f32.xlu1 %v1435_v32  ;;  %v547_v39 = vpop.xlane.xlu2 %546  ;;  %v1423_v54 = vsel %vm407_vm0, %v4587_v7, -inf  ;;  %v993_v30 = vld [vmem:[%s4100_s23 + $0x48] sm:$0xff]  ;;  %v4654_v5 = vadd.f32 %v2625_v40, %v4286_v41 }
 0x1d7   : > { %3095 = vmatmul.msk.f32.gmra.mxu3 %vm407_vm0, %v4581_v15  ;;  %v994_v40 = vld [vmem:[%s4100_s23 + $0x68] sm:$0xff] }
 0x1d8   : > { %3474 = vpow2.f32 %v837_v38  ;;  %v1002_v10 = vmul.f32 0.125, %v994_v40 }
 0x1d9   : > { %3476 = vrcp.f32 %v547_v39  ;;  %2037 = vmax.xlane.f32.xlu0 %v2036_v42  ;;  %v4645_v39 = vadd.f32 %v4496_v35, %v4286_v41  ;;  %v3148_v35 = vld [vmem:[%s4115_s8 + $0xc0] sm:$0xff]  ;;  %v2649_v41 = vsel %vm407_vm0, %v4654_v5, -inf }
 0x1dc   : > { %1424 = vmax.xlane.f32.xlu2 %v1423_v54 }
 0x1dd   : > { %v4622_v22 = vpop.f32.mrf.mxu0 }
 0x1de   : > { %v4601_v43 = vpop.eup %3474  ;;  %2031 = vmax.xlane.f32.xlu1 %v2030_v2  ;;  %v814_v60 = vpop.xlane.xlu2 %813 }
 0x1df   : > { %3096 = vmatmul.msk.f32.gmra.mxu3 %vm407_vm0, %v4601_v43  ;;  %v550_v63 = vpop.xlane.xlu0 %549  ;;  %v3477_v14 = vpop.eup %3476  ;;  %v826_v16 = vsub.f32 %v4426_v20, %v814_v60  ;;  %v3152_v20 = vld [vmem:[%s4115_s8 + $0xe0] sm:$0xff]  ;;  %v2033_v60 = vsel %vm407_vm0, %v4645_v39, -inf }
 0x1e0   : > { %v610_v33 = vpop.f32.mrf.mxu1  ;;  %3478 = vrcp.f32 %v550_v63  ;;  %1521 = vmatpush.msrb.mxu2 %v3152_v20  ;;  %v4665_v63 = vadd.f32 %v4563_v28, %v4272_v34 }
 0x1e1   : > { %v642_v49 = vmul.f32 %v3477_v14, %v610_v33  ;;  %v839_v24 = vmul.f32 1.442695, %v826_v16  ;;  %2046 = vmax.xlane.f32.xlu0 %v2045_v9  ;;  %v4672_v16 = vadd.f32 %v4521_v62, %v4320_v58 }
 0x1e2   : > { %1522 = vmatpush.msrb.mxu2 %v3151_v27 }
 0x1e3   : > { %650 = vst.msk [vmem:[%s4627_s27] sm:$0xff] %vm407_vm0, %v642_v49  ;;  %v817_v31 = vpop.xlane.xlu1 %816  ;;  %3480 = vpow2.f32 %v839_v24  ;;  %v2646_v49 = vsel %vm407_vm0, %v4665_v63, -inf }
 0x1e4   : > { %v827_v57 = vsub.f32 %v4440_v50, %v817_v31  ;;  %1427 = vmax.xlane.f32.xlu2 %v1426_v6  ;;  %v1001_v50 = vmul.f32 0.125, %v993_v30  ;;  %1523 = vmatpush.msrb.mxu2 %v3150_v61  ;;  %v995_v6 = vld [vmem:[%s4100_s23 + $0x88] sm:$0xff]  ;;  %v4694_v30 = vadd.f32 %v4527_v23, %v4338_v4 }
 0x1e5   : > { %v2631_v51 = vpop.f32.mrf.mxu0 }
 0x1e6   : > { %2040 = vmax.xlane.f32.xlu1 %v2039_v29  ;;  %v553_v32 = vpop.xlane.xlu2 %552  ;;  %v3479_v38 = vpop.eup %3478  ;;  %v841_v42 = vmul.f32 1.442695, %v827_v57  ;;  %3126 = vmatmul.msk.f32.gmra.mxu1 %vm407_vm0, %v1001_v50  ;;  %v4687_v62 = vadd.f32 %v2631_v51, %v4311_v53  ;;  %v848_v57 = vsel %vm407_vm0, %v4537_v44, 0.0  ;;  %v1003_v29 = vmul.f32 0.125, %v995_v6 }
 0x1e7   : > { %3482 = vrcp.f32 %v553_v32  ;;  %1524 = vmatpush.msrb.mxu2 %v3149_v19  ;;  %v2048_v4 = vsel %vm407_vm0, %v4694_v30, -inf }
 0x1e8   : > { %v613_v11 = vpop.f32.mrf.mxu1  ;;  %3484 = vpow2.f32 %v841_v42  ;;  %v2655_v53 = vsel %vm407_vm0, %v4687_v62, -inf  ;;  %v996_v42 = vld [vmem:[%s4100_s23 + $0xa8] sm:$0xff] }
 0x1e9   : > { %v643_v54 = vmul.f32 %v3479_v38, %v613_v11  ;;  %v4651_v2 = vpop.eup %3480  ;;  %2052 = vmax.xlane.f32.xlu0 %v2051_v0  ;;  %1525 = vmatpush.msrb.mxu2 %v3148_v35  ;;  %v4713_v35 = vadd.f32 %v4622_v22, %v4300_v48  ;;  %v3187_v22 = vld [vmem:[%s4108_s30 + $0x138] sm:$0xff] }
 0x1ea   : > { %3097 = vmatmul.msk.f32.gmra.mxu3 %vm407_vm0, %v4651_v2  ;;  %3196 = vmatpush.xpose.msk.msra.mxu1 %vm407_vm0, %v3187_v22 }
 0x1eb   : > { %651 = vst.msk [vmem:[%s4627_s27 + $0x20] sm:$0xff] %vm407_vm0, %v643_v54  ;;  %v1004_v54 = vmul.f32 0.125, %v996_v42  ;;  %v2652_v48 = vsel %vm407_vm0, %v4713_v35, -inf  ;;  %v3180_v42 = vld [vmem:[%s4108_s30 + $0x100] sm:$0xff] }
 0x1ec   : > { %2034 = vmax.xlane.f32.xlu2 %v2033_v60 }
 0x1ed   : > { %v3483_v14 = vpop.eup %3482  ;;  %v2634_v31 = vpop.f32.mrf.mxu0 }
 0x1ee   : > { %2650 = vmax.xlane.f32.xlu1 %v2649_v41  ;;  %v820_v9 = vpop.xlane.xlu2 %819  ;;  %3127 = vmatmul.msk.f32.gmra.mxu1 %vm407_vm0, %v1002_v10  ;;  %v4678_v24 = vpop.eup %3484  ;;  %v4702_v44 = vadd.f32 %v2634_v31, %v4320_v58  ;;  %v997_v31 = vld [vmem:[%s4100_s23 + $0xc8] sm:$0xff] }
 0x1ef   : > { %v828_v33 = vsub.f32 %v4455_v47, %v820_v9  ;;  %v2042_v47 = vsel %vm407_vm0, %v4672_v16, -inf }
 0x1f0   : > { %v616_v18 = vpop.f32.mrf.mxu1  ;;  %v2658_v38 = vsel %vm407_vm0, %v4702_v44, -inf }
 0x1f1   : > { %v644_v28 = vmul.f32 %v3483_v14, %v616_v18  ;;  %v843_v20 = vmul.f32 1.442695, %v828_v33  ;;  %2647 = vmax.xlane.f32.xlu0 %v2646_v49  ;;  %v845_v18 = vsel %vm407_vm0, %v4525_v12, 0.0  ;;  %v3185_v49 = vld [vmem:[%s4108_s30 + $0x128] sm:$0xff] }
 0x1f2   : > { %3098 = vmatmul.msk.f32.gmra.mxu3 %vm407_vm0, %v4678_v24 }
 0x1f3   : > { %652 = vst.msk [vmem:[%s4627_s27 + $0x40] sm:$0xff] %vm407_vm0, %v644_v28  ;;  %3486 = vpow2.f32 %v843_v20  ;;  %v3186_v28 = vld [vmem:[%s4108_s30 + $0x130] sm:$0xff] }
 0x1f4   : > { %2043 = vmax.xlane.f32.xlu2 %v2042_v47  ;;  %3197 = vmatpush.xpose.msk.msra.mxu1 %vm407_vm0, %v3186_v28  ;;  %v3184_v47 = vld [vmem:[%s4108_s30 + $0x120] sm:$0xff] }
 0x1f6   : > { %v556_v27 = vpop.xlane.xlu2 %555  ;;  %849 = vadd.xlane.f32.xlu1 %v848_v57  ;;  %v559_v61 = vpop.xlane.xlu0 %558  ;;  %3128 = vmatmul.msk.f32.gmra.mxu1 %vm407_vm0, %v1003_v29  ;;  %v1005_v57 = vmul.f32 0.125, %v997_v31  ;;  %v998_v29 = vld [vmem:[%s4100_s23 + $0xe8] sm:$0xff] }
 0x1f7   : > { %3488 = vrcp.f32 %v556_v27  ;;  %v3183_v27 = vld [vmem:[%s4108_s30 + $0x118] sm:$0xff] }
 0x1f8   : > { %v619_v32 = vpop.f32.mrf.mxu1  ;;  %3490 = vrcp.f32 %v559_v61  ;;  %3198 = vmatpush.xpose.msk.msra.mxu1 %vm407_vm0, %v3185_v49  ;;  %v3182_v61 = vld [vmem:[%s4108_s30 + $0x110] sm:$0xff] }
 0x1f9   : > { %v4699_v50 = vpop.eup %3486  ;;  %2656 = vmax.xlane.f32.xlu0 %v2655_v53 }
 0x1fa   : > { %3099 = vmatmul.msk.f32.gmra.mxu3 %vm407_vm0, %v4699_v50 }
 0x1fc   : > { %2049 = vmax.xlane.f32.xlu2 %v2048_v4  ;;  %3199 = vmatpush.xpose.msk.msra.mxu1 %vm407_vm0, %v3184_v47  ;;  %v3267_v47 = vld [vmem:[%s4108_s30 + $0x1b8] sm:$0xff] }
 0x1fd   : > { %v3489_v23 = vpop.eup %3488 }
 0x1fe   : > { %v645_v11 = vmul.f32 %v3489_v23, %v619_v32  ;;  %v562_v19 = vpop.xlane.xlu1 %561  ;;  %v2560_v58 = vpop.permute.xlu2 %2559  ;;  %2659 = vmax.xlane.f32.xlu1 %v2658_v38  ;;  %3129 = vmatmul.msk.f32.gmra.mxu1 %vm407_vm0, %v1004_v54  ;;  %v1006_v32 = vmul.f32 0.125, %v998_v29  ;;  %v3181_v23 = vld [vmem:[%s4108_s30 + $0x108] sm:$0xff] }
 0x1ff   : > { %v3491_v0 = vpop.eup %3490  ;;  %v1416_v51 = vpop.xlane.xlu0 %1415  ;;  %3329 = vmatmul.msk.f32.gmra.mxu0 %vm407_vm0, %v2560_v58  ;;  %3492 = vrcp.f32 %v562_v19  ;;  %v1608_v58 = vld [vmem:[%s4100_s23 + $0x30] sm:$0xff]  ;;  %v3265_v29 = vld [vmem:[%s4108_s30 + $0x1a8] sm:$0xff] }
 0x200   : > { %v622_v60 = vpop.f32.mrf.mxu1  ;;  %653 = vst.msk [vmem:[%s4627_s27 + $0x60] sm:$0xff] %vm407_vm0, %v645_v11  ;;  %v1438_v41 = vsub.f32 %v4480_v1, %v1416_v51  ;;  %3200 = vmatpush.xpose.msk.msra.mxu1 %vm407_vm0, %v3183_v27  ;;  %v1607_v11 = vld [vmem:[%s4100_s23 + $0x10] sm:$0xff]  ;;  %v1616_v54 = vmul.f32 0.125, %v1608_v58 }
 0x201   : > { %v646_v40 = vmul.f32 %v3491_v0, %v622_v60  ;;  %v1615_v19 = vmul.f32 0.125, %v1607_v11  ;;  %v860_v0 = vsel %vm407_vm0, %v4651_v2, 0.0  ;;  %v1609_v51 = vld [vmem:[%s4100_s23 + $0x50] sm:$0xff] }
 0x202   : > { %v1446_v9 = vmul.f32 1.442695, %v1438_v41  ;;  %v1617_v60 = vmul.f32 0.125, %v1609_v51  ;;  %v1611_v2 = vld [vmem:[%s4100_s23 + $0x90] sm:$0xff] }
 0x203   : > { %654 = vst.msk [vmem:[%s4627_s27 + $0x80] sm:$0xff] %vm407_vm0, %v646_v40  ;;  %v1610_v40 = vld [vmem:[%s4100_s23 + $0x70] sm:$0xff] }
 0x204   : > { %3494 = vpow2.f32 %v1446_v9  ;;  %2653 = vmax.xlane.f32.xlu2 %v2652_v48  ;;  %3201 = vmatpush.xpose.msk.msra.mxu1 %vm407_vm0, %v3182_v61  ;;  %v1618_v9 = vmul.f32 0.125, %v1610_v40  ;;  %v3234_v51 = vld [vmem:[%s4115_s8 + $0x170] sm:$0xff] }
 0x205   : > { %v3493_v1 = vpop.eup %3492 }
 0x206   : > { %3130 = vmatmul.msk.f32.gmra.mxu1 %vm407_vm0, %v1005_v57 }
 0x208   : > { %v625_v10 = vpop.f32.mrf.mxu1  ;;  %3202 = vmatpush.xpose.msk.msra.mxu1 %vm407_vm0, %v3181_v23  ;;  %v1613_v23 = vld [vmem:[%s4100_s23 + $0xd0] sm:$0xff] }
 0x209   : > { %v647_v14 = vmul.f32 %v3493_v1, %v625_v10 }
 0x20a   : > { %v4726_v33 = vpop.eup %3494 }
 0x20b   : > { %655 = vst.msk [vmem:[%s4627_s27 + $0xa0] sm:$0xff] %vm407_vm0, %v647_v14  ;;  %3172 = vmatmul.msk.f32.vlgmr.msrb.gmra.mxu2 %vm407_vm0, %v4726_v33  ;;  %v1619_v14 = vmul.f32 0.125, %v1611_v2 }
 0x20c   : > { %846 = vadd.xlane.f32.xlu2 %v845_v18  ;;  %3203 = vmatpush.xpose.msk.msra.mxu1 %vm407_vm0, %v3180_v42 }
 0x20e   : > { %3131 = vmatmul.msk.f32.gmra.mxu1 %vm407_vm0, %v1006_v32 }
 0x210   : > { %v628_v20 = vpop.f32.mrf.mxu1  ;;  %3276 = vmatpush.xpose.msk.msrb.mxu1 %vm407_vm0, %v3267_v47 }
 0x211   : > { %v4769_v48 = vpop.permute.xlu0 %2563 }
 0x216   : > { %v2562_v6 = vpop.permute.xlu1 %2561  ;;  %3204 = vmatmul.msk.f32.vlgmr.msra.gmra.mxu1 %vm407_vm0, %v1615_v19  ;;  %v3263_v19 = vld [vmem:[%s4108_s30 + $0x198] sm:$0xff] }
 0x217   : > { %3330 = vmatmul.msk.f32.gmra.mxu0 %vm407_vm0, %v2562_v6  ;;  %v3266_v6 = vld [vmem:[%s4108_s30 + $0x1b0] sm:$0xff] }
 0x218   : > { %v631_v12 = vpop.f32.mrf.mxu1  ;;  %3277 = vmatpush.xpose.msk.msrb.mxu1 %vm407_vm0, %v3266_v6  ;;  %v3229_v6 = vld [vmem:[%s4115_s8 + $0x148] sm:$0xff] }
 0x21c   : > { %3278 = vmatpush.xpose.msk.msrb.mxu1 %vm407_vm0, %v3265_v29  ;;  %v2224_v29 = vld [vmem:[%s4100_s23 + $0x38] sm:$0xff] }
 0x21e   : > { %3205 = vmatmul.msk.f32.gmra.mxu1 %vm407_vm0, %v1616_v54  ;;  %v3235_v54 = vld [vmem:[%s4115_s8 + $0x178] sm:$0xff] }
 0x21f   : > { %2134 = vmatpush.msra.mxu2 %v3235_v54  ;;  %v2225_v54 = vld [vmem:[%s4100_s23 + $0x58] sm:$0xff] }
 0x220   : > { %v1090_v53 = vpop.f32.mrf.mxu1 }
 0x221   : > { %v4749_v4 = vadd.f32 %v1090_v53, %v4272_v34  ;;  %v851_v34 = vsel %vm407_vm0, %v4557_v55, 0.0  ;;  %v3264_v53 = vld [vmem:[%s4108_s30 + $0x1a0] sm:$0xff]  ;;  %2135 = vmatpush.msra.mxu2 %v3234_v51  ;;  %v3710_v51 = vld [vmem:[%s4108_s30 + $0x1d8] sm:$0xff] }
 0x222   : > { %3279 = vmatpush.xpose.msk.msrb.mxu1 %vm407_vm0, %v3264_v53  ;;  %v2232_v53 = vmul.f32 0.125, %v2224_v29 }
 0x223   : > { %v1114_v38 = vsel %vm407_vm0, %v4749_v4, -inf }
 0x224   : > { %1115 = vmax.xlane.f32.xlu0 %v1114_v38  ;;  %v1621_v38 = vmul.f32 0.125, %v1613_v23  ;;  %v3708_v23 = vld [vmem:[%s4108_s30 + $0x1e8] sm:$0xff] }
 0x226   : > { %3206 = vmatmul.msk.f32.gmra.mxu1 %vm407_vm0, %v1617_v60  ;;  %v1614_v60 = vld [vmem:[%s4100_s23 + $0xf0] sm:$0xff] }
 0x227   : > { %3280 = vmatpush.xpose.msk.msrb.mxu1 %vm407_vm0, %v3263_v19 }
 0x22c   : > { %852 = vadd.xlane.f32.xlu0 %v851_v34 }
 0x22e   : > { %3207 = vmatmul.msk.f32.gmra.mxu1 %vm407_vm0, %v1618_v9  ;;  %v3261_v9 = vld [vmem:[%s4108_s30 + $0x188] sm:$0xff] }
 0x234   : > { %861 = vadd.xlane.f32.xlu0 %v860_v0  ;;  %v3262_v0 = vld [vmem:[%s4108_s30 + $0x190] sm:$0xff] }
 0x235   : > { %3281 = vmatpush.xpose.msk.msrb.mxu1 %vm407_vm0, %v3262_v0  ;;  %v2233_v0 = vmul.f32 0.125, %v2225_v54 }
 0x236   : > { %3208 = vmatmul.msk.f32.gmra.mxu1 %vm407_vm0, %v1619_v14  ;;  %v3260_v14 = vld [vmem:[%s4108_s30 + $0x180] sm:$0xff] }
 0x237   : > { %v565_v41 = vpop.xlane.xlu2 %564 }
 0x238   : > { %3496 = vrcp.f32 %v565_v41  ;;  %v1622_v41 = vmul.f32 0.125, %v1614_v60 }
 0x239   : > { %3282 = vmatpush.xpose.msk.msrb.mxu1 %vm407_vm0, %v3261_v9 }
 0x23d   : > { %3283 = vmatpush.xpose.msk.msrb.mxu1 %vm407_vm0, %v3260_v14  ;;  %v4877_v14 = vld [vmem:[%s4118_s25 + $0x28] sm:$0xff] }
 0x23e   : > { %v3497_v55 = vpop.eup %3496 }
 0x23f   : > { %v648_v22 = vmul.f32 %v3497_v55, %v628_v20  ;;  %v568_v1 = vpop.xlane.xlu2 %567  ;;  %v1422_v20 = vpop.xlane.xlu0 %1421 }
 0x240   : > { %3498 = vrcp.f32 %v568_v1  ;;  %v1440_v57 = vsub.f32 %v4535_v17, %v1422_v20  ;;  %v3232_v1 = vld [vmem:[%s4115_s8 + $0x160] sm:$0xff] }
 0x241   : > { %656 = vst.msk [vmem:[%s4627_s27 + $0xc0] sm:$0xff] %vm407_vm0, %v648_v22  ;;  %v1431_v22 = vpop.xlane.xlu1 %1430 }
 0x242   : > { %v1450_v61 = vmul.f32 1.442695, %v1440_v57 }
 0x246   : > { %v3499_v10 = vpop.eup %3498 }
 0x247   : > { %v649_v18 = vmul.f32 %v3499_v10, %v631_v12  ;;  %v1419_v28 = vpop.xlane.xlu2 %1418  ;;  %v1612_v12 = vld [vmem:[%s4100_s23 + $0xb0] sm:$0xff]  ;;  %v3231_v10 = vld [vmem:[%s4115_s8 + $0x158] sm:$0xff] }
 0x248   : > { %v1439_v49 = vsub.f32 %v4561_v26, %v1419_v28  ;;  %v1620_v26 = vmul.f32 0.125, %v1612_v12  ;;  %v2223_v28 = vld [vmem:[%s4100_s23 + $0x18] sm:$0xff]  ;;  %v3228_v12 = vld [vmem:[%s4115_s8 + $0x140] sm:$0xff] }
 0x249   : > { %657 = vst.msk [vmem:[%s4627_s27 + $0xe0] sm:$0xff] %vm407_vm0, %v649_v18  ;;  %v1443_v18 = vsub.f32 %v4545_v21, %v1431_v22  ;;  %v2231_v47 = vmul.f32 0.125, %v2223_v28  ;;  %v2226_v28 = vld [vmem:[%s4100_s23 + $0x78] sm:$0xff] }
 0x24a   : > { %v1448_v31 = vmul.f32 1.442695, %v1439_v49  ;;  %3209 = vmatmul.msk.f32.gmra.mxu1 %vm407_vm0, %v1620_v26  ;;  %v3230_v49 = vld [vmem:[%s4115_s8 + $0x150] sm:$0xff] }
 0x24b   : > { %v1456_v21 = vmul.f32 1.442695, %v1443_v18 }
 0x24c   : > { %3500 = vpow2.f32 %v1448_v31  ;;  %v3706_v31 = vld [vmem:[%s4108_s30 + $0x1f8] sm:$0xff] }
 0x24d   : > { %3502 = vpow2.f32 %v1450_v61  ;;  %3350 = vmatpush.xpose.msk.msra.mxu1 %vm407_vm0, %v3706_v31 }
 0x24f   : > { %v1425_v27 = vpop.xlane.xlu2 %1424 }
 0x250   : > { %v1441_v17 = vsub.f32 %v4587_v7, %v1425_v27  ;;  %v1434_v7 = vpop.xlane.xlu0 %1433  ;;  %v3707_v27 = vld [vmem:[%s4108_s30 + $0x1f0] sm:$0xff] }
 0x251   : > { %3351 = vmatpush.xpose.msk.msra.mxu1 %vm407_vm0, %v3707_v27  ;;  %v1444_v61 = vsub.f32 %v4555_v25, %v1434_v7  ;;  %v3709_v25 = vld [vmem:[%s4108_s30 + $0x1e0] sm:$0xff] }
 0x252   : > { %v4788_v32 = vpop.eup %3500  ;;  %v1452_v11 = vmul.f32 1.442695, %v1441_v17  ;;  %3210 = vmatmul.msk.f32.gmra.mxu1 %vm407_vm0, %v1621_v38  ;;  %v4843_v17 = vpop.f32.mrf.mxu1  ;;  %v3714_v27 = vld [vmem:[%s4108_s30 + $0x1c0] sm:$0xff] }
 0x253   : > { %3173 = vmatmul.msk.f32.gmra.mxu2 %vm407_vm0, %v4788_v32  ;;  %v4799_v34 = vpop.eup %3502  ;;  %v1437_v38 = vpop.xlane.xlu1 %1436 }
 0x254   : > { %3504 = vpow2.f32 %v1452_v11  ;;  %v1458_v11 = vmul.f32 1.442695, %v1444_v61  ;;  %v1445_v7 = vsub.f32 %v4569_v59, %v1437_v38  ;;  %v3711_v59 = vld [vmem:[%s4108_s30 + $0x1d0] sm:$0xff]  ;;  %v910_v38 = vpop.f32.mrf.mxu3 }
 0x255   : > { %3352 = vmatpush.xpose.msk.msra.mxu1 %vm407_vm0, %v3708_v23 }
 0x257   : > { %v1428_v42 = vpop.xlane.xlu2 %1427 }
 0x258   : > { %v1442_v58 = vsub.f32 %v4613_v36, %v1428_v42  ;;  %v3233_v36 = vld [vmem:[%s4115_s8 + $0x168] sm:$0xff]  ;;  %v4826_v20 = vpop.xlane.xlu0 %2037 }
 0x259   : > { %2136 = vmatpush.msra.mxu2 %v3233_v36  ;;  %3353 = vmatpush.xpose.msk.msra.mxu1 %vm407_vm0, %v3709_v25  ;;  %v854_v25 = vsel %vm407_vm0, %v4581_v15, 0.0 }
 0x25a   : > { %v1454_v55 = vmul.f32 1.442695, %v1442_v58  ;;  %3211 = vmatmul.msk.f32.gmra.mxu1 %vm407_vm0, %v1622_v41  ;;  %v4816_v2 = vpop.eup %3504  ;;  %v1460_v41 = vmul.f32 1.442695, %v1445_v7 }
 0x25b   : > { %3174 = vmatmul.msk.f32.gmra.mxu2 %vm407_vm0, %v4799_v34  ;;  %v2032_v36 = vpop.xlane.xlu1 %2031 }
 0x25c   : > { %3506 = vpow2.f32 %v1454_v55  ;;  %2137 = vmatpush.msra.mxu2 %v3232_v1  ;;  %v2054_v1 = vsub.f32 %v4593_v46, %v2032_v36  ;;  %v3115_v36 = vld [vmem:[%s4115_s8 + $0xb8] sm:$0xff] }
 0x25d   : > { %3508 = vpow2.f32 %v1456_v21  ;;  %3354 = vmatpush.xpose.msk.msra.mxu1 %vm407_vm0, %v3710_v51  ;;  %v863_v51 = vsel %vm407_vm0, %v4678_v24, 0.0  ;;  %1218 = vmatpush.msrb.mxu3 %v3115_v36  ;;  %v3113_v24 = vld [vmem:[%s4115_s8 + $0xa8] sm:$0xff] }
 0x25e   : > { %2138 = vmatpush.msra.mxu2 %v3231_v10  ;;  %3510 = vpow2.f32 %v1458_v11  ;;  %v2062_v21 = vmul.f32 1.442695, %v2054_v1 }
 0x25f   : > { %v4809_v40 = vpop.xlane.xlu2 %2034  ;;  %3512 = vpow2.f32 %v1460_v41 }
 0x260   : > { %2139 = vmatpush.msra.mxu2 %v3230_v49  ;;  %v4849_v19 = vpop.xlane.xlu0 %2046  ;;  %v2234_v49 = vmul.f32 0.125, %v2226_v28  ;;  %v2055_v61 = vsub.f32 %v4645_v39, %v4809_v40  ;;  %v2056_v40 = vsub.f32 %v4579_v13, %v4826_v20  ;;  %v4922_v13 = vld [vmem:[%s4118_s25 + $0x8] sm:$0xff] }
 0x261   : > { %3355 = vmatpush.xpose.msk.msra.mxu1 %vm407_vm0, %v3711_v59  ;;  %v3114_v59 = vld [vmem:[%s4115_s8 + $0xb0] sm:$0xff]  ;;  %v4926_v20 = vadd.f32 %v4922_v13, %v4843_v17 }
 0x262   : > { %3284 = vmatmul.msk.f32.vlgmr.msrb.gmra.mxu1 %vm407_vm0, %v2231_v47  ;;  %v4835_v26 = vpop.eup %3506  ;;  %2140 = vmatpush.msra.mxu2 %v3229_v6  ;;  %v3713_v47 = vld [vmem:[%s4108_s30 + $0x1c8] sm:$0xff]  ;;  %v2064_v54 = vmul.f32 1.442695, %v2055_v61  ;;  %v2066_v41 = vmul.f32 1.442695, %v2056_v40 }
 0x263   : > { %3175 = vmatmul.msk.f32.gmra.mxu2 %vm407_vm0, %v4816_v2  ;;  %v4852_v58 = vpop.eup %3508  ;;  %v4864_v55 = vpop.f32.mrf.mxu1  ;;  %1219 = vmatpush.msrb.mxu3 %v3114_v59 }
 0x264   : > { %2141 = vmatpush.msra.mxu2 %v3228_v12  ;;  %v4867_v9 = vpop.eup %3510  ;;  %v2041_v1 = vpop.xlane.xlu1 %2040 }
 0x265   : > { %3356 = vmatpush.xpose.msk.msra.mxu1 %vm407_vm0, %v3713_v47  ;;  %v4888_v46 = vpop.eup %3512  ;;  %v4936_v47 = vld [vmem:[%s4118_s25 + $0x30] sm:$0xff]  ;;  %1220 = vmatpush.msrb.mxu3 %v3113_v24  ;;  %v4993_v24 = vld [vmem:[%s4115_s8 + $0x1d8] sm:$0xff] }
 0x266   : > { %5827 = vst [vmem:[#allocation23_spill] sm:$0xff] %v4993_v24 }
 0x267   : > { %v4830_v57 = vpop.xlane.xlu2 %2043 }
 0x268   : > { %v4869_v22 = vpop.xlane.xlu0 %2052  ;;  %v2058_v40 = vsub.f32 %v4672_v16, %v4830_v57  ;;  %v4976_v16 = vld [vmem:[%s4115_s8 + $0x1e8] sm:$0xff] }
 0x269   : > { %3357 = vmatpush.xpose.msk.msra.mxu1 %vm407_vm0, %v3714_v27  ;;  %5825 = vst [vmem:[#allocation21_spill] sm:$0xff] %v4976_v16 }
 0x26a   : > { %3285 = vmatmul.msk.f32.gmra.mxu1 %vm407_vm0, %v2232_v53  ;;  %v2227_v53 = vld [vmem:[%s4100_s23 + $0x98] sm:$0xff]  ;;  %v2070_v59 = vmul.f32 1.442695, %v2058_v40 }
 0x26b   : > { %3176 = vmatmul.msk.f32.gmra.mxu2 %vm407_vm0, %v4835_v26  ;;  %v4890_v12 = vpop.f32.mrf.mxu1  ;;  %v2235_v11 = vmul.f32 0.125, %v2227_v53  ;;  %v3111_v53 = vld [vmem:[%s4115_s8 + $0x98] sm:$0xff] }
 0x26c   : > { %v4973_v36 = vpop.xlane.xlu1 %2650 }
 0x26f   : > { %v4847_v42 = vpop.xlane.xlu2 %2049 }
 0x270   : > { %v4898_v29 = vpop.xlane.xlu0 %2647 }
 0x272   : > { %3286 = vmatmul.msk.f32.gmra.mxu1 %vm407_vm0, %v2233_v0 }
 0x273   : > { %3177 = vmatmul.msk.f32.gmra.mxu2 %vm407_vm0, %v4852_v58  ;;  %v4911_v15 = vpop.f32.mrf.mxu1 }
 0x277   : > { %v4862_v60 = vpop.xlane.xlu2 %2653 }
 0x278   : > { %v4913_v0 = vpop.xlane.xlu0 %2656 }
 0x27a   : > { %3287 = vmatmul.msk.f32.gmra.mxu1 %vm407_vm0, %v2234_v49  ;;  %v3112_v49 = vld [vmem:[%s4115_s8 + $0xa0] sm:$0xff] }
 0x27b   : > { %3178 = vmatmul.msk.f32.gmra.mxu2 %vm407_vm0, %v4867_v9  ;;  %1221 = vmatpush.msrb.mxu3 %v3112_v49  ;;  %v5005_v49 = vld [vmem:[%s4115_s8 + $0x1c8] sm:$0xff] }
 0x27c   : > { %v2637_v10 = vpop.f32.mrf.mxu0  ;;  %5829 = vst [vmem:[#allocation25_spill] sm:$0xff] %v5005_v49 }
 0x27d   : > { %v4880_v18 = vadd.f32 %v4877_v14, %v2637_v10  ;;  %1222 = vmatpush.msrb.mxu3 %v3111_v53 }
 0x27f   : > { %v847_v31 = vpop.xlane.xlu2 %846  ;;  %v2661_v6 = vsel %vm407_vm0, %v4880_v18, -inf }
 0x280   : > { %3514 = vrcp.f32 %v847_v31  ;;  %2662 = vmax.xlane.f32.xlu2 %v2661_v6  ;;  %v1117_v31 = vsel %vm407_vm0, %v4926_v20, -inf }
 0x281   : > { %3516 = vpow2.f32 %v2062_v21  ;;  %v1105_v21 = vpop.f32.mrf.mxu1 }
 0x282   : > { %3288 = vmatmul.msk.f32.gmra.mxu1 %vm407_vm0, %v2235_v11  ;;  %3518 = vpow2.f32 %v2064_v54  ;;  %v4949_v11 = vadd.f32 %v4877_v14, %v1105_v21  ;;  %v4962_v54 = vld [vmem:[%s4115_s8 + $0x1f0] sm:$0xff] }
 0x283   : > { %3179 = vmatmul.msk.f32.gmra.mxu2 %vm407_vm0, %v4888_v46  ;;  %3520 = vpow2.f32 %v2066_v41  ;;  %5824 = vst [vmem:[#allocation20_spill] sm:$0xff] %v4962_v54  ;;  %v857_v41 = vsel %vm407_vm0, %v4601_v43, 0.0 }
 0x286   : > { %v3515_v23 = vpop.eup %3514 }
 0x287   : > { %v942_v7 = vmul.f32 %v3515_v23, %v910_v38  ;;  %v4905_v39 = vpop.eup %3516  ;;  %v3110_v23 = vld [vmem:[%s4115_s8 + $0x90] sm:$0xff] }
 0x288   : > { %855 = vadd.xlane.f32.xlu2 %v854_v25  ;;  %v4928_v10 = vpop.eup %3518  ;;  %1223 = vmatpush.msrb.mxu3 %v3110_v23  ;;  %v4958_v25 = vld [vmem:[%s4115_s8 + $0x1f8] sm:$0xff] }
 0x289   : > { %958 = vrot.lane.b32.xlu0 %v942_v7, %s3938_s21  ;;  %v3109_v7 = vld [vmem:[%s4115_s8 + $0x88] sm:$0xff]  ;;  %2750 = vmatpush.msrb.mxu2 %v4958_v25 }
 0x28a   : > { %3289 = vmatmul.msk.f32.gmra.mxu1 %vm407_vm0, %v4499_v37  ;;  %v2057_v37 = vsub.f32 %v4620_v8, %v2041_v1  ;;  %1224 = vmatpush.msrb.mxu3 %v3109_v7  ;;  %v4984_v1 = vld [vmem:[%s4115_s8 + $0x1e0] sm:$0xff] }
 0x28b   : > { %3252 = vmatmul.msk.f32.vlgmr.msra.gmra.mxu2 %vm407_vm0, %v4905_v39  ;;  %5826 = vst [vmem:[#allocation22_spill] sm:$0xff] %v4984_v1 }
 0x28c   : > { %v2068_v61 = vmul.f32 1.442695, %v2057_v37  ;;  %2751 = vmatpush.msrb.mxu2 %v4962_v54  ;;  %v2059_v37 = vsub.f32 %v4596_v52, %v4849_v19  ;;  %v5018_v19 = vld [vmem:[%s4115_s8 + $0x1c0] sm:$0xff] }
 0x28d   : > { %5830 = vst [vmem:[#allocation26_spill] sm:$0xff] %v5018_v19 }
 0x28e   : > { %2752 = vmatpush.msrb.mxu2 %v4976_v16 }
 0x290   : > { %864 = vadd.xlane.f32.xlu2 %v863_v51  ;;  %v1129_v51 = vsel %vm407_vm0, %v4949_v11, -inf  ;;  %2753 = vmatpush.msrb.mxu2 %v4984_v1 }
 0x292   : > { %3290 = vmatmul.msk.f32.gmra.mxu1 %vm407_vm0, %v4513_v56  ;;  %v3108_v56 = vld [vmem:[%s4115_s8 + $0x80] sm:$0xff]  ;;  %2754 = vmatpush.msrb.mxu2 %v4993_v24 }
 0x293   : > { %3253 = vmatmul.msk.f32.gmra.mxu2 %vm407_vm0, %v4928_v10  ;;  %1225 = vmatpush.msrb.mxu3 %v3108_v56 }
 0x294   : > { %v2640_v28 = vpop.f32.mrf.mxu0 }
 0x295   : > { %v4939_v17 = vadd.f32 %v4936_v47, %v2640_v28  ;;  %v866_v28 = vsel %vm407_vm0, %v4699_v50, 0.0  ;;  %v850_v50 = vpop.xlane.xlu1 %849 }
 0x297   : > { %v1116_v6 = vpop.xlane.xlu0 %1115  ;;  %v2664_v8 = vsel %vm407_vm0, %v4939_v17, -inf }
 0x298   : > { %v1138_v27 = vsub.f32 %v4749_v4, %v1116_v6  ;;  %1118 = vmax.xlane.f32.xlu2 %v1117_v31  ;;  %2665 = vmax.xlane.f32.xlu1 %v2664_v8  ;;  %v4953_v4 = vpop.eup %3520  ;;  %v2072_v31 = vmul.f32 1.442695, %v2059_v37  ;;  %v5009_v6 = vld [vmem:[%s4118_s25 + $0x10] sm:$0xff]  ;;  %v1108_v8 = vpop.f32.mrf.mxu1 }
 0x299   : > { %v5013_v52 = vadd.f32 %v5009_v6, %v4864_v55 }
 0x29a   : > { %v1146_v38 = vmul.f32 1.442695, %v1138_v27  ;;  %3291 = vmatmul.msk.f32.gmra.mxu1 %vm407_vm0, %v4507_v45  ;;  %v4999_v45 = vld [vmem:[%s4115_s8 + $0x1d0] sm:$0xff]  ;;  %v2060_v27 = vsub.f32 %v4694_v30, %v4847_v42  ;;  %v2061_v30 = vsub.f32 %v4637_v3, %v4869_v22  ;;  %v913_v42 = vpop.f32.mrf.mxu3  ;;  %v2670_v3 = vsub.f32 %v4665_v63, %v4898_v29 }
 0x29b   : > { %3254 = vmatmul.msk.f32.gmra.mxu2 %vm407_vm0, %v4953_v4  ;;  %5828 = vst [vmem:[#allocation24_spill] sm:$0xff] %v4999_v45  ;;  %v2672_v29 = vsub.f32 %v4713_v35, %v4862_v60  ;;  %v5087_v60 = vadd.f32 %v4936_v47, %v1108_v8 }
 0x29c   : > { %3522 = vpow2.f32 %v1146_v38  ;;  %2755 = vmatpush.msrb.mxu2 %v4999_v45  ;;  %v2074_v55 = vmul.f32 1.442695, %v2060_v27  ;;  %v2678_v37 = vmul.f32 1.442695, %v2670_v3 }
 0x29d   : > { %3524 = vpow2.f32 %v2068_v61  ;;  %v5031_v61 = vld [vmem:[%s4118_s25 + $0x18] sm:$0xff]  ;;  %v1132_v3 = vsel %vm407_vm0, %v5087_v60, -inf }
 0x29e   : > { %3526 = vpow2.f32 %v2070_v59  ;;  %2756 = vmatpush.msrb.mxu2 %v5005_v49  ;;  %v5035_v53 = vadd.f32 %v5031_v61, %v4890_v12  ;;  %v5047_v12 = vld [vmem:[%s4118_s25 + $0x20] sm:$0xff] }
 0x29f   : > { %3528 = vpow2.f32 %v2072_v31  ;;  %v853_v63 = vpop.xlane.xlu0 %852 }
 0x2a0   : > { %1130 = vmax.xlane.f32.xlu2 %v1129_v51  ;;  %858 = vadd.xlane.f32.xlu1 %v857_v41  ;;  %3530 = vrcp.f32 %v850_v50  ;;  %v1123_v7 = vsel %vm407_vm0, %v5035_v53, -inf  ;;  %v1111_v56 = vpop.f32.mrf.mxu1  ;;  %v2076_v51 = vmul.f32 1.442695, %v2061_v30  ;;  %v5051_v41 = vadd.f32 %v5047_v12, %v4911_v15 }
 0x2a1   : > { %2757 = vmatpush.msrb.mxu2 %v5018_v19  ;;  %3532 = vpow2.f32 %v2074_v55  ;;  %v2671_v15 = vsub.f32 %v4654_v5, %v4973_v36  ;;  %v2682_v55 = vmul.f32 1.442695, %v2672_v29  ;;  %v2673_v36 = vsub.f32 %v4687_v62, %v4913_v0  ;;  %v3721_v29 = vld [vmem:[%s4118_s25] sm:$0xff] }
 0x2a2   : > { %v4978_v57 = vpop.eup %3522  ;;  %3331 = vmatmul.msk.f32.vlgmr.msra.gmra.mxu1 %vm407_vm0, %v4769_v48  ;;  %v1120_v48 = vsel %vm407_vm0, %v5013_v52, -inf  ;;  %3534 = vpow2.f32 %v2076_v51  ;;  %v1126_v22 = vsel %vm407_vm0, %v5051_v41, -inf  ;;  %v2660_v51 = vpop.xlane.xlu1 %2659 }
 0x2a3   : > { %v4986_v43 = vpop.eup %3524  ;;  %3132 = vmatmul.msk.f32.vlgmr.msrb.gmra.mxu3 %vm407_vm0, %v4978_v57  ;;  %3536 = vpow2.f32 %v2678_v37  ;;  %v2680_v50 = vmul.f32 1.442695, %v2671_v15  ;;  %v2674_v62 = vsub.f32 %v4702_v44, %v2660_v51  ;;  %v5099_v15 = vld [vmem:[%s4118_s25 + $0x38] sm:$0xff] }
 0x2a4   : > { %3255 = vmatmul.msk.f32.gmra.mxu2 %vm407_vm0, %v4986_v43  ;;  %v5020_v21 = vpop.eup %3526  ;;  %v5102_v8 = vadd.f32 %v5099_v15, %v1111_v56 }
 0x2a5   : > { %v5037_v23 = vpop.eup %3528  ;;  %3538 = vpow2.f32 %v2680_v50 }
 0x2a6   : > { %v3531_v38 = vpop.eup %3530  ;;  %3540 = vrcp.f32 %v853_v63  ;;  %v1135_v44 = vsel %vm407_vm0, %v5102_v8, -inf }
 0x2a7   : > { %v943_v40 = vmul.f32 %v3531_v38, %v913_v42  ;;  %v5053_v59 = vpop.eup %3532  ;;  %3542 = vpow2.f32 %v2682_v55  ;;  %v916_v42 = vpop.f32.mrf.mxu3 }
 0x2a8   : > { %867 = vadd.xlane.f32.xlu1 %v866_v28  ;;  %v1706_v28 = vpop.f32.mrf.mxu1  ;;  %v5061_v31 = vpop.eup %3534 }
 0x2a9   : > { %v5067_v27 = vpop.eup %3536  ;;  %v5111_v55 = vadd.f32 %v3721_v29, %v1706_v28 }
 0x2ab   : > { %v5075_v38 = vpop.eup %3538  ;;  %v1730_v56 = vsel %vm407_vm0, %v5111_v55, -inf }
 0x2ac   : > { %3256 = vmatmul.msk.f32.gmra.mxu2 %vm407_vm0, %v5020_v21  ;;  %v3541_v5 = vpop.eup %3540 }
 0x2ad   : > { %v5084_v35 = vpop.eup %3542 }
 0x2b0   : > { %1121 = vmax.xlane.f32.xlu1 %v1120_v48  ;;  %v5069_v48 = vpop.f32.mrf.mxu1 }
 0x2b1   : > { %v5171_v54 = vadd.f32 %v4922_v13, %v5069_v48 }
 0x2b4   : > { %3257 = vmatmul.msk.f32.gmra.mxu2 %vm407_vm0, %v5037_v23 }
 0x2b8   : > { %960 = vrot.lane.b32.xlu2 %v943_v40, %s3938_s21  ;;  %1124 = vmax.xlane.f32.xlu1 %v1123_v7  ;;  %v5081_v30 = vpop.f32.mrf.mxu1  ;;  %v944_v7 = vmul.f32 %v3541_v5, %v916_v42  ;;  %v2684_v40 = vmul.f32 1.442695, %v2673_v36  ;;  %v5119_v36 = vpop.xlane.xlu0 %861 }
 0x2ba   : > { %3544 = vpow2.f32 %v2684_v40 }
 0x2bc   : > { %3258 = vmatmul.msk.f32.gmra.mxu2 %vm407_vm0, %v5053_v59 }
 0x2c0   : > { %1127 = vmax.xlane.f32.xlu1 %v1126_v22  ;;  %v5092_v0 = vpop.f32.mrf.mxu1  ;;  %v2686_v22 = vmul.f32 1.442695, %v2674_v62  ;;  %v5096_v37 = vpop.eup %3544 }
 0x2c2   : > { %3546 = vpow2.f32 %v2686_v22 }
 0x2c4   : > { %3259 = vmatmul.msk.f32.gmra.mxu2 %vm407_vm0, %v5061_v31 }
 0x2c8   : > { %v1718_v50 = vpop.f32.mrf.mxu1  ;;  %v5108_v63 = vpop.eup %3546 }
 0x2c9   : > { %v5123_v62 = vadd.f32 %v5047_v12, %v1718_v50 }
 0x2cc   : > { %3332 = vmatmul.msk.f32.vlgmr.msrb.gmra.mxu2 %vm407_vm0, %v5067_v27 }
 0x2d0   : > { %v5117_v5 = vpop.f32.mrf.mxu1 }
 0x2d4   : > { %3333 = vmatmul.msk.f32.gmra.mxu2 %vm407_vm0, %v5075_v38 }
 0x2d9   : > { %962 = vrot.lane.b32.xlu1 %v944_v7, %s3938_s21 }
 0x2dc   : > { %3334 = vmatmul.msk.f32.gmra.mxu2 %vm407_vm0, %v5084_v35 }
 0x2e1   : > { %1133 = vmax.xlane.f32.xlu2 %v1132_v3  ;;  %v5125_v3 = vpop.f32.mrf.mxu1 }
 0x2e4   : > { %3335 = vmatmul.msk.f32.gmra.mxu2 %vm407_vm0, %v5096_v37 }
 0x2e9   : > { %1136 = vmax.xlane.f32.xlu2 %v1135_v44 }
 0x2ec   : > { %3336 = vmatmul.msk.f32.gmra.mxu2 %vm407_vm0, %v5108_v63 }
 0x2f1   : > { %1731 = vmax.xlane.f32.xlu2 %v1730_v56  ;;  %v919_v56 = vpop.f32.mrf.mxu3 }
 0x2f3   : > { %v2663_v42 = vpop.xlane.xlu2 %2662 }
 0x2f4   : > { %v2675_v7 = vsub.f32 %v4880_v18, %v2663_v42  ;;  %v1742_v18 = vsel %vm407_vm0, %v5123_v62, -inf }
 0x2f6   : > { %v2688_v40 = vmul.f32 1.442695, %v2675_v7  ;;  %v1727_v7 = vpop.f32.mrf.mxu1 }
 0x2f8   : > { %3548 = vpow2.f32 %v2688_v40  ;;  %v1462_v40 = vsel %vm407_vm0, %v4726_v33, 0.0  ;;  %v5145_v33 = vadd.f32 %v5099_v15, %v1727_v7 }
 0x2fb   : > { %v856_v28 = vpop.xlane.xlu2 %855  ;;  %v959_v51 = vpop.permute.xlu0 %958 }
 0x2fc   : > { %3550 = vrcp.f32 %v856_v28  ;;  %983 = vst.msk [vmem:[%s4627_s27] sm:$0xff] %vm982_vm1, %v959_v51 }
 0x2fe   : > { %v5129_v22 = vpop.eup %3548  ;;  %v2322_v1 = vpop.f32.mrf.mxu1 }
 0x2ff   : > { %3337 = vmatmul.msk.f32.gmra.mxu2 %vm407_vm0, %v5129_v22 }
 0x302   : > { %v3551_v44 = vpop.eup %3550 }
 0x303   : > { %v5135_v42 = vpop.xlane.xlu2 %864  ;;  %1743 = vmax.xlane.f32.xlu1 %v1742_v18  ;;  %v945_v50 = vmul.f32 %v3551_v44, %v919_v56  ;;  %v1471_v18 = vsel %vm407_vm0, %v4816_v2, 0.0  ;;  %v1751_v2 = vsel %vm407_vm0, %v5145_v33, -inf }
 0x305   : > { %964 = vrot.lane.b32.xlu0 %v945_v50, %s3938_s21 }
 0x30b   : > { %v1119_v28 = vpop.xlane.xlu2 %1118  ;;  %v2666_v51 = vpop.xlane.xlu1 %2665  ;;  %1463 = vadd.xlane.f32.xlu1 %v1462_v40  ;;  %v5161_v40 = vadd.f32 %v3721_v29, %v2322_v1  ;;  %v1480_v1 = vsel %vm407_vm0, %v4867_v9, 0.0 }
 0x30c   : > { %v1139_v19 = vsub.f32 %v4926_v20, %v1119_v28  ;;  %v2676_v49 = vsub.f32 %v4939_v17, %v2666_v51 }
 0x30d   : > { %v2346_v28 = vsel %vm407_vm0, %v5161_v40, -inf }
 0x30e   : > { %v1148_v45 = vmul.f32 1.442695, %v1139_v19  ;;  %v2690_v24 = vmul.f32 1.442695, %v2676_v49 }
 0x310   : > { %3552 = vpow2.f32 %v1148_v45  ;;  %v5157_v45 = vpop.f32.mrf.mxu1 }
 0x311   : > { %3554 = vpow2.f32 %v2690_v24  ;;  %v922_v24 = vpop.f32.mrf.mxu3 }
 0x313   : > { %v1131_v44 = vpop.xlane.xlu2 %1130  ;;  %v859_v56 = vpop.xlane.xlu1 %858  ;;  %1472 = vadd.xlane.f32.xlu1 %v1471_v18 }
 0x314   : > { %3556 = vrcp.f32 %v859_v56 }
 0x316   : > { %v5147_v50 = vpop.eup %3552 }
 0x317   : > { %v5149_v20 = vpop.eup %3554  ;;  %3133 = vmatmul.msk.f32.gmra.mxu3 %vm407_vm0, %v5147_v50 }
 0x318   : > { %3338 = vmatmul.msk.f32.gmra.mxu2 %vm407_vm0, %v5149_v20  ;;  %v2328_v56 = vpop.f32.mrf.mxu1 }
 0x31a   : > { %v3557_v17 = vpop.eup %3556 }
 0x31b   : > { %v961_v49 = vpop.permute.xlu2 %960  ;;  %v5159_v19 = vpop.xlane.xlu1 %867  ;;  %1752 = vmax.xlane.f32.xlu1 %v1751_v2  ;;  %v946_v7 = vmul.f32 %v3557_v17, %v922_v24  ;;  %v5176_v2 = vadd.f32 %v5009_v6, %v2328_v56  ;;  %v2081_v56 = vsel %vm407_vm0, %v4928_v10, 0.0  ;;  %v2090_v10 = vsel %vm407_vm0, %v5020_v21, 0.0 }
 0x31c   : > { %984 = vst.msk [vmem:[%s4627_s27 + $0x20] sm:$0xff] %vm982_vm1, %v961_v49  ;;  %v5221_v21 = vpop.f32.mrf.mxu2 }
 0x31d   : > { %966 = vrot.lane.b32.xlu2 %v946_v7, %s3938_s21  ;;  %v2352_v9 = vsel %vm407_vm0, %v5176_v2, -inf }
 0x320   : > { %v5183_v7 = vpop.f32.mrf.mxu1 }
 0x323   : > { %v1122_v51 = vpop.xlane.xlu1 %1121  ;;  %2347 = vmax.xlane.f32.xlu1 %v2346_v28 }
 0x324   : > { %v1140_v18 = vsub.f32 %v5013_v52, %v1122_v51  ;;  %v1733_v52 = vsel %vm407_vm0, %v5171_v54, -inf  ;;  %v1143_v51 = vsub.f32 %v4949_v11, %v1131_v44  ;;  %v925_v11 = vpop.f32.mrf.mxu3 }
 0x326   : > { %v1150_v16 = vmul.f32 1.442695, %v1140_v18 }
 0x328   : > { %3558 = vpow2.f32 %v1150_v16  ;;  %v5196_v18 = vpop.f32.mrf.mxu1 }
 0x32b   : > { %v1125_v29 = vpop.xlane.xlu1 %1124  ;;  %1481 = vadd.xlane.f32.xlu1 %v1480_v1 }
 0x32c   : > { %v1141_v17 = vsub.f32 %v5035_v53, %v1125_v29 }
 0x32e   : > { %v5181_v24 = vpop.eup %3558  ;;  %v1152_v49 = vmul.f32 1.442695, %v1141_v17  ;;  %v3195_v17 = vld [vmem:[%s4115_s8 + $0x138] sm:$0xff] }
 0x32f   : > { %1734 = vmax.xlane.f32.xlu0 %v1733_v52  ;;  %3134 = vmatmul.msk.f32.gmra.mxu3 %vm407_vm0, %v5181_v24  ;;  %v3194_v52 = vld [vmem:[%s4115_s8 + $0x130] sm:$0xff] }
 0x330   : > { %3560 = vpow2.f32 %v1152_v49  ;;  %1834 = vmatpush.msra.mxu3 %v3195_v17  ;;  %v2337_v49 = vpop.f32.mrf.mxu1  ;;  %v2099_v17 = vsel %vm407_vm0, %v5061_v31, 0.0  ;;  %v1474_v31 = vsel %vm407_vm0, %v4835_v26, 0.0 }
 0x331   : > { %3562 = vrcp.f32 %v5119_v36  ;;  %v5204_v36 = vadd.f32 %v5009_v6, %v5081_v30  ;;  %v5216_v30 = vadd.f32 %v4877_v14, %v2337_v49  ;;  %v1465_v49 = vsel %vm407_vm0, %v4788_v32, 0.0 }
 0x332   : > { %1835 = vmatpush.msra.mxu3 %v3194_v52 }
 0x333   : > { %v1128_v16 = vpop.xlane.xlu1 %1127  ;;  %2353 = vmax.xlane.f32.xlu1 %v2352_v9  ;;  %v1736_v6 = vsel %vm407_vm0, %v5204_v36, -inf  ;;  %v3193_v9 = vld [vmem:[%s4115_s8 + $0x128] sm:$0xff] }
 0x334   : > { %v1142_v53 = vsub.f32 %v5051_v41, %v1128_v16  ;;  %v1156_v41 = vmul.f32 1.442695, %v1143_v51  ;;  %1836 = vmatpush.msra.mxu3 %v3193_v9  ;;  %v2361_v51 = vsel %vm407_vm0, %v5216_v30, -inf }
 0x336   : > { %v5190_v48 = vpop.eup %3560  ;;  %v1154_v28 = vmul.f32 1.442695, %v1142_v53  ;;  %v5225_v53 = vadd.f32 %v4877_v14, %v5117_v5  ;;  %v5239_v14 = vpop.f32.mrf.mxu2  ;;  %v3188_v5 = vld [vmem:[%s4115_s8 + $0x100] sm:$0xff] }
 0x337   : > { %3135 = vmatmul.msk.f32.gmra.mxu3 %vm407_vm0, %v5190_v48  ;;  %v3563_v1 = vpop.eup %3562 }
 0x338   : > { %3564 = vpow2.f32 %v1154_v28  ;;  %v947_v44 = vmul.f32 %v3563_v1, %v925_v11  ;;  %v3192_v28 = vld [vmem:[%s4115_s8 + $0x120] sm:$0xff]  ;;  %v1745_v11 = vsel %vm407_vm0, %v5225_v53, -inf }
 0x339   : > { %3566 = vpow2.f32 %v1156_v41  ;;  %1837 = vmatpush.msra.mxu3 %v3192_v28  ;;  %v3190_v41 = vld [vmem:[%s4115_s8 + $0x110] sm:$0xff]  ;;  %v2700_v28 = vsel %vm407_vm0, %v5084_v35, 0.0 }
 0x33b   : > { %2082 = vadd.xlane.f32.xlu1 %v2081_v56  ;;  %v3191_v56 = vld [vmem:[%s4115_s8 + $0x118] sm:$0xff] }
 0x33c   : > { %1838 = vmatpush.msra.mxu3 %v3191_v56 }
 0x33e   : > { %v5200_v29 = vpop.eup %3564  ;;  %1839 = vmatpush.msra.mxu3 %v3190_v41  ;;  %v5247_v9 = vpop.f32.mrf.mxu2 }
 0x33f   : > { %3136 = vmatmul.msk.f32.gmra.mxu3 %vm407_vm0, %v5200_v29  ;;  %v5219_v16 = vpop.eup %3566 }
 0x343   : > { %2091 = vadd.xlane.f32.xlu1 %v2090_v10  ;;  %968 = vrot.lane.b32.xlu0 %v947_v44, %s3938_s21  ;;  %v3189_v44 = vld [vmem:[%s4115_s8 + $0x108] sm:$0xff] }
 0x344   : > { %1840 = vmatpush.msra.mxu3 %v3189_v44  ;;  %v5266_v44 = vadd.f32 %v4922_v13, %v5157_v45 }
 0x346   : > { %1737 = vmax.xlane.f32.xlu2 %v1736_v6  ;;  %1841 = vmatpush.msra.mxu3 %v3188_v5  ;;  %v5255_v32 = vpop.f32.mrf.mxu2 }
 0x347   : > { %3137 = vmatmul.msk.f32.gmra.mxu3 %vm407_vm0, %v5219_v16 }
 0x34b   : > { %2362 = vmax.xlane.f32.xlu1 %v2361_v51  ;;  %v963_v1 = vpop.permute.xlu1 %962 }
 0x34c   : > { %985 = vst.msk [vmem:[%s4627_s27 + $0x40] sm:$0xff] %vm982_vm1, %v963_v1  ;;  %v2709_v1 = vsel %vm407_vm0, %v5129_v22, 0.0 }
 0x34e   : > { %1746 = vmax.xlane.f32.xlu2 %v1745_v11  ;;  %v5278_v22 = vpop.f32.mrf.mxu2 }
 0x353   : > { %2100 = vadd.xlane.f32.xlu1 %v2099_v17  ;;  %v5270_v17 = vadd.f32 %v5031_v61, %v5092_v0  ;;  %v5284_v0 = vadd.f32 %v4936_v47, %v5125_v3 }
 0x354   : > { %v1134_v52 = vpop.xlane.xlu2 %1133 }
 0x355   : > { %v1144_v10 = vsub.f32 %v5087_v60, %v1134_v52  ;;  %v1739_v13 = vsel %vm407_vm0, %v5270_v17, -inf  ;;  %v1748_v52 = vsel %vm407_vm0, %v5284_v0, -inf }
 0x356   : > { %1466 = vadd.xlane.f32.xlu2 %v1465_v49  ;;  %v5296_v3 = vpop.f32.mrf.mxu2 }
 0x357   : > { %v1158_v6 = vmul.f32 1.442695, %v1144_v10  ;;  %v2084_v10 = vsel %vm407_vm0, %v4953_v4, 0.0 }
 0x359   : > { %3568 = vpow2.f32 %v1158_v6  ;;  %v5300_v6 = vadd.f32 %v5031_v61, %v5183_v7  ;;  %v1477_v7 = vsel %vm407_vm0, %v4852_v58, 0.0 }
 0x35b   : > { %2701 = vadd.xlane.f32.xlu1 %v2700_v28  ;;  %v2355_v4 = vsel %vm407_vm0, %v5300_v6, -inf }
 0x35c   : > { %v1137_v51 = vpop.xlane.xlu2 %1136 }
 0x35d   : > { %v1145_v56 = vsub.f32 %v5102_v8, %v1137_v51  ;;  %v1483_v8 = vsel %vm407_vm0, %v4888_v46, 0.0  ;;  %v2349_v46 = vsel %vm407_vm0, %v5266_v44, -inf }
 0x35e   : > { %1475 = vadd.xlane.f32.xlu2 %v1474_v31  ;;  %v5313_v61 = vpop.f32.mrf.mxu2 }
 0x35f   : > { %v3569_v60 = vpop.eup %3568  ;;  %v1160_v41 = vmul.f32 1.442695, %v1145_v56  ;;  %v1468_v56 = vsel %vm407_vm0, %v4799_v34, 0.0  ;;  %v2078_v34 = vsel %vm407_vm0, %v4905_v39, 0.0 }
 0x360   : > { %3138 = vmatmul.msk.f32.gmra.mxu3 %vm407_vm0, %v3569_v60 }
 0x361   : > { %3570 = vpow2.f32 %v1160_v41 }
 0x363   : > { %2710 = vadd.xlane.f32.xlu1 %v2709_v1 }
 0x364   : > { %v1732_v35 = vpop.xlane.xlu2 %1731 }
 0x365   : > { %v1754_v11 = vsub.f32 %v5111_v55, %v1732_v35  ;;  %v1162_v55 = vsel %vm407_vm0, %v4978_v57, 0.0  ;;  %v1171_v57 = vsel %vm407_vm0, %v5190_v48, 0.0  ;;  %v1180_v48 = vsel %vm407_vm0, %v3569_v60, 0.0 }
 0x366   : > { %1484 = vadd.xlane.f32.xlu2 %v1483_v8  ;;  %v2093_v60 = vsel %vm407_vm0, %v5037_v23, 0.0  ;;  %v5321_v1 = vpop.f32.mrf.mxu2  ;;  %v2694_v35 = vsel %vm407_vm0, %v5067_v27, 0.0  ;;  %v2096_v27 = vsel %vm407_vm0, %v5053_v59, 0.0 }
 0x367   : > { %v5262_v26 = vpop.eup %3570  ;;  %v1762_v5 = vmul.f32 1.442695, %v1754_v11  ;;  %v2340_v11 = vpop.f32.mrf.mxu1 }
 0x368   : > { %3139 = vmatmul.msk.f32.gmra.mxu3 %vm407_vm0, %v5262_v26  ;;  %v5328_v58 = vadd.f32 %v4936_v47, %v2340_v11  ;;  %v2703_v47 = vsel %vm407_vm0, %v5096_v37, 0.0  ;;  %v2712_v37 = vsel %vm407_vm0, %v5149_v20, 0.0 }
 0x369   : > { %3572 = vpow2.f32 %v1762_v5  ;;  %v2087_v5 = vsel %vm407_vm0, %v4986_v43, 0.0 }
 0x36a   : > { %v2364_v23 = vsel %vm407_vm0, %v5328_v58, -inf }
 0x36b   : > { %1163 = vadd.xlane.f32.xlu1 %v1162_v55 }
 0x36d   : > { %1740 = vmax.xlane.f32.xlu0 %v1739_v13 }
 0x36e   : > { %2350 = vmax.xlane.f32.xlu2 %v2349_v46  ;;  %v5334_v55 = vpop.f32.mrf.mxu2  ;;  %v5344_v46 = vadd.f32 %v5047_v12, %v5196_v18 }
 0x36f   : > { %v5286_v45 = vpop.eup %3572 }
 0x370   : > { %3212 = vmatmul.msk.f32.vlgmr.msra.gmra.mxu3 %vm407_vm0, %v5286_v45 }
 0x373   : > { %1172 = vadd.xlane.f32.xlu1 %v1171_v57 }
 0x375   : > { %1749 = vmax.xlane.f32.xlu0 %v1748_v52  ;;  %v2358_v52 = vsel %vm407_vm0, %v5344_v46, -inf }
 0x376   : > { %2085 = vadd.xlane.f32.xlu2 %v2084_v10  ;;  %v1744_v49 = vpop.xlane.xlu1 %1743  ;;  %v5348_v43 = vpop.f32.mrf.mxu2 }
 0x377   : > { %v967_v28 = vpop.permute.xlu2 %966  ;;  %v965_v51 = vpop.permute.xlu0 %964  ;;  %v1758_v59 = vsub.f32 %v5123_v62, %v1744_v49  ;;  %v1165_v62 = vsel %vm407_vm0, %v5147_v50, 0.0 }
 0x378   : > { %987 = vst.msk [vmem:[%s4627_s27 + $0x80] sm:$0xff] %vm982_vm1, %v967_v28 }
 0x379   : > { %986 = vst.msk [vmem:[%s4627_s27 + $0x60] sm:$0xff] %vm982_vm1, %v965_v51  ;;  %v1770_v51 = vmul.f32 1.442695, %v1758_v59 }
 0x37b   : > { %1181 = vadd.xlane.f32.xlu1 %v1180_v48  ;;  %v2697_v48 = vsel %vm407_vm0, %v5075_v38, 0.0 }
 0x37d   : > { %1469 = vadd.xlane.f32.xlu0 %v1468_v56  ;;  %v5362_v56 = vpop.f32.mrf.mxu3 }
 0x37e   : > { %2356 = vmax.xlane.f32.xlu2 %v2355_v4  ;;  %v5311_v31 = vpop.xlane.xlu1 %1463  ;;  %v5358_v18 = vpop.f32.mrf.mxu2 }
 0x385   : > { %1478 = vadd.xlane.f32.xlu0 %v1477_v7 }
 0x386   : > { %2094 = vadd.xlane.f32.xlu2 %v2093_v60  ;;  %v5319_v41 = vpop.xlane.xlu1 %1472  ;;  %v5373_v60 = vpop.f32.mrf.mxu2 }
 0x38d   : > { %2079 = vadd.xlane.f32.xlu0 %v2078_v34  ;;  %v2343_v34 = vpop.f32.mrf.mxu1 }
 0x38e   : > { %2695 = vadd.xlane.f32.xlu2 %v2694_v35  ;;  %v1753_v8 = vpop.xlane.xlu1 %1752  ;;  %v1174_v35 = vsel %vm407_vm0, %v5200_v29, 0.0  ;;  %v5380_v11 = vadd.f32 %v5099_v15, %v2343_v34 }
 0x390   : > { %v2367_v29 = vsel %vm407_vm0, %v5380_v11, -inf }
 0x395   : > { %2088 = vadd.xlane.f32.xlu0 %v2087_v5  ;;  %v5386_v5 = vpop.f32.mrf.mxu3  ;;  %v2643_v59 = vpop.f32.mrf.mxu1 }
 0x396   : > { %2365 = vmax.xlane.f32.xlu2 %v2364_v23  ;;  %v5336_v39 = vpop.xlane.xlu1 %2347 }
 0x39d   : > { %2097 = vadd.xlane.f32.xlu0 %v2096_v27 }
 0x39e   : > { %2704 = vadd.xlane.f32.xlu2 %v2703_v47  ;;  %v5346_v13 = vpop.xlane.xlu1 %1481 }
 0x3a2   : > { %v1735_v57 = vpop.xlane.xlu0 %1734 }
 0x3a3   : > { %v1755_v10 = vsub.f32 %v5171_v54, %v1735_v57  ;;  %v1761_v54 = vsub.f32 %v5145_v33, %v1753_v8  ;;  %v2706_v33 = vsel %vm407_vm0, %v5108_v63, 0.0 }
 0x3a5   : > { %v1764_v28 = vmul.f32 1.442695, %v1755_v10  ;;  %2359 = vmax.xlane.f32.xlu0 %v2358_v52  ;;  %v1776_v38 = vmul.f32 1.442695, %v1761_v54  ;;  %v2155_v10 = vpop.f32.mrf.mxu2 }
 0x3a6   : > { %2713 = vadd.xlane.f32.xlu2 %v2712_v37  ;;  %v5356_v12 = vpop.xlane.xlu1 %2353 }
 0x3a7   : > { %3574 = vpow2.f32 %v1764_v28  ;;  %v1183_v28 = vsel %vm407_vm0, %v5262_v26, 0.0  ;;  %v2370_v26 = vsub.f32 %v5161_v40, %v5336_v39  ;;  %v1168_v40 = vsel %vm407_vm0, %v5181_v24, 0.0 }
 0x3a8   : > { %3576 = vpow2.f32 %v1770_v51 }
 0x3a9   : > { %3578 = vpow2.f32 %v1776_v38 }
 0x3ad   : > { %v3575_v4 = vpop.eup %3574  ;;  %2698 = vadd.xlane.f32.xlu0 %v2697_v48  ;;  %v1227_v48 = vpop.f32.mrf.mxu3 }
 0x3ae   : > { %1166 = vadd.xlane.f32.xlu2 %v1165_v62  ;;  %v5367_v20 = vpop.xlane.xlu1 %2082  ;;  %3213 = vmatmul.msk.f32.gmra.mxu3 %vm407_vm0, %v3575_v4  ;;  %v1781_v49 = vsel %vm407_vm0, %v3575_v4, 0.0  ;;  %v5371_v7 = vpop.eup %3576  ;;  %v5402_v4 = vadd.f32 %v5099_v15, %v2643_v59 }
 0x3af   : > { %1782 = vadd.xlane.f32.xlu1 %v1781_v49  ;;  %v1790_v23 = vsel %vm407_vm0, %v5371_v7, 0.0  ;;  %v5391_v47 = vpop.eup %3578 }
 0x3b0   : > { %v2667_v34 = vsel %vm407_vm0, %v5402_v4, -inf }
 0x3b5   : > { %2707 = vadd.xlane.f32.xlu0 %v2706_v33  ;;  %v969_v50 = vpop.permute.xlu0 %968 }
 0x3b6   : > { %988 = vst.msk [vmem:[%s4627_s27 + $0xa0] sm:$0xff] %vm982_vm1, %v969_v50  ;;  %1175 = vadd.xlane.f32.xlu2 %v1174_v35  ;;  %v2092_v8 = vpop.xlane.xlu1 %2091  ;;  %v5413_v50 = vpop.f32.mrf.mxu3 }
 0x3b7   : > { %3580 = vrcp.f32 %v2092_v8  ;;  %1791 = vadd.xlane.f32.xlu1 %v1790_v23 }
 0x3b9   : > { %v1738_v63 = vpop.xlane.xlu2 %1737 }
 0x3ba   : > { %v1756_v27 = vsub.f32 %v5204_v36, %v1738_v63  ;;  %v1799_v36 = vsel %vm407_vm0, %v5391_v47, 0.0 }
 0x3bc   : > { %v1766_v57 = vmul.f32 1.442695, %v1756_v27 }
 0x3bd   : > { %v3581_v52 = vpop.eup %3580  ;;  %2368 = vmax.xlane.f32.xlu0 %v2367_v29 }
 0x3be   : > { %3582 = vpow2.f32 %v1766_v57  ;;  %1184 = vadd.xlane.f32.xlu2 %v1183_v28  ;;  %v5395_v37 = vpop.xlane.xlu1 %2362  ;;  %v5399_v51 = vmul.f32 %v3581_v52, %v2155_v10  ;;  %v5426_v63 = vpop.f32.mrf.mxu3  ;;  %v1177_v52 = vsel %vm407_vm0, %v5219_v16, 0.0 }
 0x3bf   : > { %1800 = vadd.xlane.f32.xlu1 %v1799_v36  ;;  %v1778_v36 = vsel %vm407_vm0, %v5286_v45, 0.0 }
 0x3c1   : > { %v1747_v54 = vpop.xlane.xlu2 %1746 }
 0x3c2   : > { %v1759_v62 = vsub.f32 %v5225_v53, %v1747_v54  ;;  %v2378_v53 = vmul.f32 1.442695, %v2370_v26 }
 0x3c4   : > { %v3583_v49 = vpop.eup %3582  ;;  %v1772_v38 = vmul.f32 1.442695, %v1759_v62 }
 0x3c5   : > { %2668 = vmax.xlane.f32.xlu0 %v2667_v34  ;;  %3214 = vmatmul.msk.f32.gmra.mxu3 %vm407_vm0, %v3583_v49  ;;  %v1784_v33 = vsel %vm407_vm0, %v3583_v49, 0.0  ;;  %v3274_v34 = vld [vmem:[%s4115_s8 + $0x1b0] sm:$0xff] }
 0x3c6   : > { %3584 = vpow2.f32 %v1772_v38  ;;  %1785 = vadd.xlane.f32.xlu2 %v1784_v33  ;;  %v5411_v15 = vpop.xlane.xlu1 %2100  ;;  %v1236_v59 = vpop.f32.mrf.mxu3  ;;  %v3275_v38 = vld [vmem:[%s4115_s8 + $0x1b8] sm:$0xff] }
 0x3c7   : > { %3586 = vpow2.f32 %v2378_v53  ;;  %2450 = vmatpush.msrb.mxu3 %v3275_v38 }
 0x3c8   : > { %3588 = vrcp.f32 %v5135_v42 }
 0x3c9   : > { %v5415_v35 = vpop.xlane.xlu2 %1466  ;;  %2451 = vmatpush.msrb.mxu3 %v3274_v34 }
 0x3cc   : > { %v5417_v8 = vpop.eup %3584 }
 0x3cd   : > { %1169 = vadd.xlane.f32.xlu0 %v1168_v40  ;;  %v1793_v39 = vsel %vm407_vm0, %v5417_v8, 0.0  ;;  %v5430_v29 = vpop.eup %3586 }
 0x3ce   : > { %1794 = vadd.xlane.f32.xlu2 %v1793_v39  ;;  %v5424_v23 = vpop.xlane.xlu1 %2701  ;;  %v3589_v57 = vpop.eup %3588  ;;  %v2394_v42 = vsel %vm407_vm0, %v5430_v29, 0.0 }
 0x3cf   : > { %v948_v10 = vmul.f32 %v3589_v57, %v5362_v56  ;;  %v5448_v56 = vpop.f32.mrf.mxu3  ;;  %v3273_v57 = vld [vmem:[%s4115_s8 + $0x1a8] sm:$0xff] }
 0x3d0   : > { %2452 = vmatpush.msrb.mxu3 %v3273_v57 }
 0x3d1   : > { %v5428_v27 = vpop.xlane.xlu2 %1475 }
 0x3d5   : > { %1178 = vadd.xlane.f32.xlu0 %v1177_v52 }
 0x3d6   : > { %2395 = vadd.xlane.f32.xlu2 %v2394_v42  ;;  %v5436_v24 = vpop.xlane.xlu1 %2710 }
 0x3d8   : > { %970 = vrot.lane.b32.xlu1 %v948_v10, %s3938_s21 }
 0x3d9   : > { %v5440_v28 = vpop.xlane.xlu2 %1484 }
 0x3dd   : > { %1779 = vadd.xlane.f32.xlu0 %v1778_v36 }
 0x3de   : > { %v1164_v16 = vpop.xlane.xlu1 %1163 }
 0x3df   : > { %3590 = vrcp.f32 %v1164_v16 }
 0x3e0   : > { %v1741_v54 = vpop.xlane.xlu0 %1740  ;;  %3592 = vrcp.f32 %v5159_v19 }
 0x3e1   : > { %v1757_v62 = vsub.f32 %v5270_v17, %v1741_v54  ;;  %v5445_v49 = vpop.xlane.xlu2 %2350  ;;  %v3271_v54 = vld [vmem:[%s4115_s8 + $0x198] sm:$0xff] }
 0x3e3   : > { %v1768_v26 = vmul.f32 1.442695, %v1757_v62 }
 0x3e5   : > { %v3591_v33 = vpop.eup %3590  ;;  %3594 = vpow2.f32 %v1768_v26  ;;  %v3270_v26 = vld [vmem:[%s4115_s8 + $0x190] sm:$0xff] }
 0x3e6   : > { %v1259_v45 = vmul.f32 %v3591_v33, %v1227_v48  ;;  %v1173_v53 = vpop.xlane.xlu1 %1172  ;;  %v3593_v40 = vpop.eup %3592  ;;  %v3272_v48 = vld [vmem:[%s4115_s8 + $0x1a0] sm:$0xff] }
 0x3e7   : > { %3596 = vrcp.f32 %v1173_v53  ;;  %v949_v36 = vmul.f32 %v3593_v40, %v5386_v5  ;;  %2453 = vmatpush.msrb.mxu3 %v3272_v48  ;;  %v2372_v5 = vsub.f32 %v5176_v2, %v5356_v12  ;;  %v3269_v53 = vld [vmem:[%s4115_s8 + $0x188] sm:$0xff] }
 0x3e8   : > { %1267 = vst.msk [vmem:[%s4627_s27 + $0x8] sm:$0xff] %vm407_vm0, %v1259_v45  ;;  %v1750_v17 = vpop.xlane.xlu0 %1749  ;;  %v5832_v48 = vld [vmem:[#allocation21_spill] sm:$0xff] }
 0x3e9   : > { %v1760_v19 = vsub.f32 %v5284_v0, %v1750_v17  ;;  %v2086_v39 = vpop.xlane.xlu2 %2085  ;;  %v5461_v0 = vpop.f32.mrf.mxu3  ;;  %2454 = vmatpush.msrb.mxu3 %v3271_v54  ;;  %v3268_v17 = vld [vmem:[%s4115_s8 + $0x180] sm:$0xff] }
 0x3ea   : > { %3598 = vrcp.f32 %v2086_v39 }
 0x3eb   : > { %v3595_v52 = vpop.eup %3594  ;;  %3600 = vrcp.f32 %v5319_v41  ;;  %v1774_v42 = vmul.f32 1.442695, %v1760_v19  ;;  %2455 = vmatpush.msrb.mxu3 %v3270_v26  ;;  %v2382_v19 = vmul.f32 1.442695, %v2372_v5 }
 0x3ec   : > { %3215 = vmatmul.msk.f32.gmra.mxu3 %vm407_vm0, %v3595_v52  ;;  %v1787_v10 = vsel %vm407_vm0, %v3595_v52, 0.0 }
 0x3ed   : > { %v3597_v16 = vpop.eup %3596  ;;  %3602 = vpow2.f32 %v1774_v42  ;;  %1788 = vadd.xlane.f32.xlu0 %v1787_v10  ;;  %2456 = vmatpush.msrb.mxu3 %v3269_v53  ;;  %v5831_v42 = vld [vmem:[#allocation20_spill] sm:$0xff] }
 0x3ee   : > { %v1262_v62 = vmul.f32 %v3597_v16, %v1236_v59  ;;  %972 = vrot.lane.b32.xlu2 %v949_v36, %s3938_s21  ;;  %v1182_v41 = vpop.xlane.xlu1 %1181 }
 0x3ef   : > { %3604 = vrcp.f32 %v1182_v41  ;;  %2457 = vmatpush.msrb.mxu3 %v3268_v17  ;;  %v5836_v41 = vld [vmem:[#allocation25_spill] sm:$0xff] }
 0x3f0   : > { %v3599_v38 = vpop.eup %3598  ;;  %1270 = vst.msk [vmem:[%s4627_s27 + $0x68] sm:$0xff] %vm407_vm0, %v1262_v62  ;;  %v5470_v34 = vpop.xlane.xlu0 %1469  ;;  %3606 = vpow2.f32 %v2382_v19  ;;  %v5835_v62 = vld [vmem:[#allocation24_spill] sm:$0xff] }
 0x3f1   : > { %v3601_v33 = vpop.eup %3600  ;;  %v2357_v45 = vpop.xlane.xlu2 %2356  ;;  %v5474_v59 = vmul.f32 %v3599_v38, %v5358_v18  ;;  %3358 = vmatpush.msra.mxu3 %v4958_v25  ;;  %3608 = vrcp.f32 %v5311_v31  ;;  %v5834_v25 = vld [vmem:[#allocation23_spill] sm:$0xff] }
 0x3f2   : > { %v1562_v12 = vmul.f32 %v3601_v33, %v5255_v32  ;;  %v1245_v57 = vpop.f32.mrf.mxu3  ;;  %v5833_v32 = vld [vmem:[#allocation22_spill] sm:$0xff]  ;;  %v2371_v33 = vsub.f32 %v5266_v44, %v5445_v49  ;;  %v2373_v53 = vsub.f32 %v5300_v6, %v2357_v45  ;;  %3610 = vrcp.f32 %v5415_v35 }
 0x3f3   : > { %v3603_v40 = vpop.eup %3602  ;;  %3359 = vmatpush.msra.mxu3 %v5831_v42 }
 0x3f4   : > { %3216 = vmatmul.msk.f32.gmra.mxu3 %vm407_vm0, %v5371_v7  ;;  %v1796_v2 = vsel %vm407_vm0, %v3603_v40, 0.0  ;;  %v2380_v17 = vmul.f32 1.442695, %v2371_v33 }
 0x3f5   : > { %v3605_v39 = vpop.eup %3604  ;;  %1797 = vadd.xlane.f32.xlu0 %v1796_v2  ;;  %3360 = vmatpush.msra.mxu3 %v5832_v48 }
 0x3f6   : > { %v1265_v52 = vmul.f32 %v3605_v39, %v1245_v57  ;;  %1581 = vrot.lane.b32.xlu2 %v1562_v12, %s3938_s21  ;;  %v3607_v10 = vpop.eup %3606  ;;  %3612 = vpow2.f32 %v2380_v17 }
 0x3f7   : > { %3361 = vmatpush.msra.mxu3 %v5833_v32  ;;  %v2400_v54 = vsel %vm407_vm0, %v3607_v10, 0.0  ;;  %v3609_v26 = vpop.eup %3608 }
 0x3f8   : > { %1273 = vst.msk [vmem:[%s4627_s27 + $0xc8] sm:$0xff] %vm407_vm0, %v1265_v52  ;;  %v5485_v18 = vpop.xlane.xlu0 %1478  ;;  %v1559_v31 = vmul.f32 %v3609_v26, %v5221_v21  ;;  %v2384_v21 = vmul.f32 1.442695, %v2373_v53  ;;  %v3611_v2 = vpop.eup %3610 }
 0x3f9   : > { %v5488_v7 = vpop.xlane.xlu2 %2094  ;;  %3362 = vmatpush.msra.mxu3 %v5834_v25  ;;  %v1560_v6 = vmul.f32 %v3611_v2, %v5239_v14 }
 0x3fa   : > { %3614 = vpow2.f32 %v2384_v21  ;;  %v1248_v39 = vpop.f32.mrf.mxu3 }
 0x3fb   : > { %3363 = vmatpush.msra.mxu3 %v5835_v62  ;;  %3616 = vrcp.f32 %v5428_v27 }
 0x3fc   : > { %3217 = vmatmul.msk.f32.gmra.mxu3 %vm407_vm0, %v5417_v8  ;;  %v5837_v8 = vld [vmem:[#allocation26_spill] sm:$0xff]  ;;  %v3613_v35 = vpop.eup %3612 }
 0x3fd   : > { %3364 = vmatpush.msra.mxu3 %v5836_v41 }
 0x3ff   : > { %3365 = vmatpush.msra.mxu3 %v5837_v8 }
 0x400   : > { %v5496_v36 = vpop.xlane.xlu0 %2079  ;;  %v3615_v49 = vpop.eup %3614 }
 0x401   : > { %v5498_v16 = vpop.xlane.xlu2 %2695  ;;  %v3617_v45 = vpop.eup %3616  ;;  %v2403_v12 = vsel %vm407_vm0, %v3615_v49, 0.0 }
 0x402   : > { %2401 = vadd.xlane.f32.xlu1 %v2400_v54  ;;  %v1563_v57 = vmul.f32 %v3617_v45, %v5278_v22  ;;  %v5538_v32 = vpop.f32.mrf.mxu3  ;;  %v2375_v22 = vsub.f32 %v5216_v30, %v5395_v37  ;;  %v5558_v30 = vpop.f32.mrf.mxu2 }
 0x404   : > { %3218 = vmatmul.msk.f32.gmra.mxu3 %vm407_vm0, %v3603_v40  ;;  %v2388_v26 = vmul.f32 1.442695, %v2375_v22 }
 0x408   : > { %v5506_v38 = vpop.xlane.xlu0 %2088 }
 0x409   : > { %v5508_v5 = vpop.xlane.xlu2 %2365  ;;  %1575 = vrot.lane.b32.xlu0 %v1559_v31, %s3938_s21 }
 0x40a   : > { %v2376_v37 = vsub.f32 %v5328_v58, %v5508_v5  ;;  %v5572_v5 = vpop.f32.mrf.mxu2 }
 0x40c   : > { %3219 = vmatmul.msk.f32.gmra.mxu3 %vm407_vm0, %v5391_v47 }
 0x410   : > { %v5517_v40 = vpop.xlane.xlu0 %2097 }
 0x411   : > { %v5519_v19 = vpop.xlane.xlu2 %2704 }
 0x412   : > { %v5585_v22 = vpop.f32.mrf.mxu2 }
 0x414   : > { %3292 = vmatmul.msk.f32.vlgmr.msrb.gmra.mxu3 %vm407_vm0, %v5430_v29 }
 0x418   : > { %v2360_v44 = vpop.xlane.xlu0 %2359 }
 0x419   : > { %v5524_v47 = vpop.xlane.xlu2 %2713  ;;  %v2374_v14 = vsub.f32 %v5344_v46, %v2360_v44  ;;  %v2390_v44 = vmul.f32 1.442695, %v2376_v37 }
 0x41b   : > { %1577 = vrot.lane.b32.xlu1 %v1560_v6, %s3938_s21  ;;  %v2386_v25 = vmul.f32 1.442695, %v2374_v14 }
 0x41c   : > { %3293 = vmatmul.msk.f32.gmra.mxu3 %vm407_vm0, %v3613_v35 }
 0x41f   : > { %2404 = vadd.xlane.f32.xlu2 %v2403_v12 }
 0x420   : > { %v5530_v29 = vpop.xlane.xlu0 %2698 }
 0x421   : > { %v1167_v27 = vpop.xlane.xlu2 %1166 }
 0x422   : > { %3618 = vrcp.f32 %v1167_v27  ;;  %v1783_v42 = vpop.xlane.xlu1 %1782 }
 0x423   : > { %1583 = vrot.lane.b32.xlu1 %v1563_v57, %s3938_s21 }
 0x424   : > { %3294 = vmatmul.msk.f32.gmra.mxu3 %vm407_vm0, %v3607_v10 }
 0x428   : > { %v3619_v52 = vpop.eup %3618  ;;  %v5536_v48 = vpop.xlane.xlu0 %2707 }
 0x429   : > { %v1260_v54 = vmul.f32 %v3619_v52, %v5413_v50  ;;  %v1176_v62 = vpop.xlane.xlu2 %1175 }
 0x42a   : > { %3620 = vrcp.f32 %v1176_v62  ;;  %v5564_v2 = vpop.xlane.xlu1 %1791 }
 0x42b   : > { %1268 = vst.msk [vmem:[%s4627_s27 + $0x28] sm:$0xff] %vm407_vm0, %v1260_v54  ;;  %3622 = vrcp.f32 %v1783_v42 }
 0x42c   : > { %3624 = vrcp.f32 %v5346_v13  ;;  %3295 = vmatmul.msk.f32.gmra.mxu3 %vm407_vm0, %v3615_v49  ;;  %v2397_v13 = vsel %vm407_vm0, %v3613_v35, 0.0 }
 0x42d   : > { %3626 = vpow2.f32 %v2386_v25 }
 0x430   : > { %v3621_v46 = vpop.eup %3620  ;;  %v2369_v10 = vpop.xlane.xlu0 %2368 }
 0x431   : > { %v3623_v41 = vpop.eup %3622  ;;  %v1263_v50 = vmul.f32 %v3621_v46, %v5448_v56  ;;  %v1185_v8 = vpop.xlane.xlu2 %1184 }
 0x432   : > { %v1846_v31 = vpop.f32.mrf.mxu3  ;;  %v3625_v33 = vpop.eup %3624  ;;  %3628 = vrcp.f32 %v1185_v8 }
 0x433   : > { %v1876_v53 = vmul.f32 %v3623_v41, %v1846_v31  ;;  %v5549_v17 = vpop.eup %3626  ;;  %1271 = vst.msk [vmem:[%s4627_s27 + $0x88] sm:$0xff] %vm407_vm0, %v1263_v50  ;;  %2398 = vadd.xlane.f32.xlu0 %v2397_v13  ;;  %3630 = vrcp.f32 %v5367_v20  ;;  %v1565_v56 = vmul.f32 %v3625_v33, %v5313_v61  ;;  %v2377_v61 = vsub.f32 %v5380_v11, %v2369_v10  ;;  %v5577_v14 = vpop.xlane.xlu1 %1800 }
 0x434   : > { %3296 = vmatmul.msk.f32.gmra.mxu3 %vm407_vm0, %v5549_v17  ;;  %3632 = vpow2.f32 %v2388_v26  ;;  %v2759_v13 = vpop.f32.mrf.mxu2 }
 0x435   : > { %1884 = vst.msk [vmem:[%s4627_s27 + $0x30] sm:$0xff] %vm407_vm0, %v1876_v53  ;;  %3634 = vrcp.f32 %v5470_v34 }
 0x436   : > { %3636 = vpow2.f32 %v2390_v44 }
 0x437   : > { %1587 = vrot.lane.b32.xlu2 %v1565_v56, %s3938_s21 }
 0x438   : > { %v3629_v21 = vpop.eup %3628  ;;  %v2669_v20 = vpop.xlane.xlu0 %2668 }
 0x439   : > { %v1266_v6 = vmul.f32 %v3629_v21, %v1248_v39  ;;  %v1786_v35 = vpop.xlane.xlu2 %1785  ;;  %v3631_v49 = vpop.eup %3630  ;;  %v2392_v39 = vmul.f32 1.442695, %v2377_v61 }
 0x43a   : > { %v3633_v45 = vpop.eup %3632  ;;  %v2176_v58 = vmul.f32 %v3631_v49, %v5348_v43  ;;  %v2677_v43 = vsub.f32 %v5402_v4, %v2669_v20 }
 0x43b   : > { %1274 = vst.msk [vmem:[%s4627_s27 + $0xe8] sm:$0xff] %vm407_vm0, %v1266_v6  ;;  %v3635_v57 = vpop.eup %3634 }
 0x43c   : > { %3297 = vmatmul.msk.f32.gmra.mxu3 %vm407_vm0, %v3633_v45  ;;  %v3637_v34 = vpop.eup %3636  ;;  %v1561_v11 = vmul.f32 %v3635_v57, %v5247_v9 }
 0x43f   : > { %2193 = vrot.lane.b32.xlu2 %v2176_v58, %s3938_s21 }
 0x440   : > { %v1170_v12 = vpop.xlane.xlu0 %1169 }
 0x441   : > { %3638 = vrcp.f32 %v1170_v12  ;;  %v5575_v27 = vpop.xlane.xlu2 %1794 }
 0x442   : > { %3640 = vrcp.f32 %v1786_v35 }
 0x443   : > { %3642 = vrcp.f32 %v5485_v18  ;;  %v2692_v18 = vmul.f32 1.442695, %v2677_v43 }
 0x444   : > { %3298 = vmatmul.msk.f32.gmra.mxu3 %vm407_vm0, %v3637_v34  ;;  %3644 = vpow2.f32 %v2392_v39  ;;  %v2406_v39 = vsel %vm407_vm0, %v5549_v17, 0.0 }
 0x447   : > { %v3639_v52 = vpop.eup %3638  ;;  %1579 = vrot.lane.b32.xlu0 %v1561_v11, %s3938_s21 }
 0x448   : > { %v3641_v42 = vpop.eup %3640  ;;  %v1261_v25 = vmul.f32 %v3639_v52, %v5426_v63  ;;  %v1849_v54 = vpop.f32.mrf.mxu3  ;;  %v2409_v63 = vsel %vm407_vm0, %v3633_v45, 0.0 }
 0x449   : > { %v1179_v62 = vpop.xlane.xlu0 %1178  ;;  %v1877_v46 = vmul.f32 %v3641_v42, %v1849_v54  ;;  %v5587_v10 = vpop.xlane.xlu2 %2395 }
 0x44a   : > { %3646 = vrcp.f32 %v1179_v62  ;;  %v3643_v4 = vpop.eup %3642  ;;  %1269 = vst.msk [vmem:[%s4627_s27 + $0x48] sm:$0xff] %vm407_vm0, %v1261_v25  ;;  %v971_v9 = vpop.permute.xlu1 %970 }
 0x44b   : > { %v5591_v41 = vpop.eup %3644  ;;  %1885 = vst.msk [vmem:[%s4627_s27 + $0x50] sm:$0xff] %vm407_vm0, %v1877_v46  ;;  %3648 = vpow2.f32 %v2692_v18  ;;  %v1564_v26 = vmul.f32 %v3643_v4, %v5296_v3 }
 0x44c   : > { %989 = vst.msk [vmem:[%s4627_s27 + $0xc0] sm:$0xff] %vm982_vm1, %v971_v9  ;;  %3299 = vmatmul.msk.f32.gmra.mxu3 %vm407_vm0, %v5591_v41 }
 0x44d   : > { %2410 = vadd.xlane.f32.xlu1 %v2409_v63 }
 0x44f   : > { %1585 = vrot.lane.b32.xlu0 %v1564_v26, %s3938_s21 }
 0x450   : > { %v3647_v50 = vpop.eup %3646 }
 0x451   : > { %v1264_v8 = vmul.f32 %v3647_v50, %v5461_v0  ;;  %v1780_v31 = vpop.xlane.xlu0 %1779  ;;  %v973_v33 = vpop.permute.xlu2 %972 }
 0x452   : > { %3650 = vrcp.f32 %v1780_v31  ;;  %v5605_v53 = vpop.eup %3648  ;;  %990 = vst.msk [vmem:[%s4627_s27 + $0xe0] sm:$0xff] %vm982_vm1, %v973_v33  ;;  %v5617_v0 = vpop.f32.mrf.mxu2 }
 0x453   : > { %1272 = vst.msk [vmem:[%s4627_s27 + $0xa8] sm:$0xff] %vm407_vm0, %v1264_v8  ;;  %3652 = vrcp.f32 %v5440_v28 }
 0x454   : > { %3339 = vmatmul.msk.f32.vlgmr.msra.gmra.mxu3 %vm407_vm0, %v5605_v53 }
 0x458   : > { %v3651_v3 = vpop.eup %3650 }
 0x459   : > { %v1875_v37 = vmul.f32 %v3651_v3, %v5538_v32  ;;  %v1582_v56 = vpop.permute.xlu2 %1581  ;;  %v3653_v21 = vpop.eup %3652  ;;  %v2412_v32 = vsel %vm407_vm0, %v3637_v34, 0.0 }
 0x45a   : > { %1602 = vst.msk [vmem:[%s4627_s27 + $0x68] sm:$0xff] %vm982_vm1, %v1582_v56  ;;  %v1566_v20 = vmul.f32 %v3653_v21, %v5321_v1  ;;  %v5621_v6 = vpop.f32.mrf.mxu2 }
 0x45b   : > { %1883 = vst.msk [vmem:[%s4627_s27 + $0x10] sm:$0xff] %vm407_vm0, %v1875_v37 }
 0x460   : > { %v1789_v44 = vpop.xlane.xlu0 %1788 }
 0x461   : > { %3654 = vrcp.f32 %v1789_v44 }
 0x462   : > { %3656 = vrcp.f32 %v5488_v7  ;;  %v2768_v1 = vpop.f32.mrf.mxu2 }
 0x463   : > { %3658 = vrcp.f32 %v5564_v2 }
 0x464   : > { %3660 = vrcp.f32 %v5498_v16 }
 0x465   : > { %3662 = vrcp.f32 %v5575_v27 }
 0x466   : > { %1589 = vrot.lane.b32.xlu1 %v1566_v20, %s3938_s21  ;;  %3664 = vrcp.f32 %v5519_v19 }
 0x467   : > { %v3655_v28 = vpop.eup %3654  ;;  %3666 = vrcp.f32 %v5411_v15 }
 0x468   : > { %2413 = vadd.xlane.f32.xlu2 %v2412_v32  ;;  %v3657_v45 = vpop.eup %3656  ;;  %v1798_v61 = vpop.xlane.xlu0 %1797 }
 0x469   : > { %v2180_v58 = vmul.f32 %v3657_v45, %v5558_v30  ;;  %v3659_v7 = vpop.eup %3658  ;;  %3668 = vrcp.f32 %v1798_v61 }
 0x46a   : > { %v3661_v57 = vpop.eup %3660  ;;  %v5638_v2 = vpop.f32.mrf.mxu2  ;;  %3670 = vrcp.f32 %v5496_v36 }
 0x46b   : > { %v2791_v30 = vmul.f32 %v3661_v57, %v2759_v13  ;;  %v3663_v17 = vpop.eup %3662  ;;  %3672 = vrcp.f32 %v5524_v47 }
 0x46c   : > { %v3665_v27 = vpop.eup %3664  ;;  %3674 = vrcp.f32 %v5424_v23 }
 0x46d   : > { %v3667_v19 = vpop.eup %3666  ;;  %v2794_v15 = vmul.f32 %v3665_v27, %v2768_v1  ;;  %3676 = vrcp.f32 %v5577_v14 }
 0x46e   : > { %2195 = vrot.lane.b32.xlu1 %v5474_v59, %s3938_s21  ;;  %v2182_v42 = vmul.f32 %v3667_v19, %v5585_v22  ;;  %3678 = vrcp.f32 %v5506_v38 }
 0x46f   : > { %v1852_v35 = vpop.f32.mrf.mxu3  ;;  %3680 = vrcp.f32 %v5436_v24 }
 0x470   : > { %v1878_v49 = vmul.f32 %v3655_v28, %v1852_v35  ;;  %3682 = vrcp.f32 %v5587_v10 }
 0x471   : > { %3684 = vrcp.f32 %v5517_v40 }
 0x472   : > { %1886 = vst.msk [vmem:[%s4627_s27 + $0x70] sm:$0xff] %vm407_vm0, %v1878_v49  ;;  %v2774_v11 = vpop.f32.mrf.mxu2 }
 0x475   : > { %v2402_v52 = vpop.xlane.xlu1 %2401 }
 0x476   : > { %2201 = vrot.lane.b32.xlu1 %v2180_v58, %s3938_s21  ;;  %3686 = vrcp.f32 %v2402_v52  ;;  %v2415_v58 = vsel %vm407_vm0, %v5591_v41, 0.0 }
 0x477   : > { %v1855_v59 = vpop.f32.mrf.mxu3 }
 0x478   : > { %v1879_v12 = vmul.f32 %v3659_v7, %v1855_v59 }
 0x479   : > { %2407 = vadd.xlane.f32.xlu0 %v2406_v39  ;;  %v2715_v39 = vsel %vm407_vm0, %v5605_v53, 0.0 }
 0x47a   : > { %1887 = vst.msk [vmem:[%s4627_s27 + $0x90] sm:$0xff] %vm407_vm0, %v1879_v12  ;;  %v2777_v47 = vpop.f32.mrf.mxu2 }
 0x47b   : > { %v1576_v16 = vpop.permute.xlu0 %1575 }
 0x47c   : > { %1599 = vst.msk [vmem:[%s4627_s27 + $0x8] sm:$0xff] %vm982_vm1, %v1576_v16 }
 0x47e   : > { %2807 = vrot.lane.b32.xlu1 %v2791_v30, %s3938_s21 }
 0x47f   : > { %v1858_v34 = vpop.f32.mrf.mxu3 }
 0x480   : > { %v1880_v43 = vmul.f32 %v3663_v17, %v1858_v34  ;;  %2199 = vrot.lane.b32.xlu2 %v5399_v51, %s3938_s21  ;;  %v3669_v51 = vpop.eup %3668 }
 0x481   : > { %v3671_v54 = vpop.eup %3670 }
 0x482   : > { %1888 = vst.msk [vmem:[%s4627_s27 + $0xb0] sm:$0xff] %vm407_vm0, %v1880_v43  ;;  %v3673_v62 = vpop.eup %3672  ;;  %v2175_v18 = vmul.f32 %v3671_v54, %v5334_v55 }
 0x483   : > { %v3675_v23 = vpop.eup %3674  ;;  %v2797_v22 = vmul.f32 %v3673_v62, %v2777_v47 }
 0x484   : > { %v2793_v38 = vmul.f32 %v3675_v23, %v5621_v6  ;;  %v3677_v14 = vpop.eup %3676 }
 0x485   : > { %v3679_v9 = vpop.eup %3678 }
 0x486   : > { %2813 = vrot.lane.b32.xlu1 %v2794_v15, %s3938_s21  ;;  %v3681_v24 = vpop.eup %3680  ;;  %v2178_v26 = vmul.f32 %v3679_v9, %v5373_v60 }
 0x487   : > { %v1861_v25 = vpop.f32.mrf.mxu3  ;;  %v2796_v8 = vmul.f32 %v3681_v24, %v2774_v11  ;;  %v3683_v31 = vpop.eup %3682 }
 0x488   : > { %v1881_v36 = vmul.f32 %v3669_v51, %v1861_v25  ;;  %2205 = vrot.lane.b32.xlu2 %v2182_v42, %s3938_s21  ;;  %v3685_v13 = vpop.eup %3684 }
 0x489   : > { %v2181_v60 = vmul.f32 %v3685_v13, %v5572_v5  ;;  %v3687_v21 = vpop.eup %3686 }
 0x48a   : > { %1889 = vst.msk [vmem:[%s4627_s27 + $0xd0] sm:$0xff] %vm407_vm0, %v1881_v36 }
 0x48d   : > { %v1578_v46 = vpop.permute.xlu1 %1577  ;;  %2191 = vrot.lane.b32.xlu0 %v2175_v18, %s3938_s21 }
 0x48e   : > { %1600 = vst.msk [vmem:[%s4627_s27 + $0x28] sm:$0xff] %vm982_vm1, %v1578_v46  ;;  %2819 = vrot.lane.b32.xlu1 %v2797_v22, %s3938_s21 }
 0x48f   : > { %v1864_v4 = vpop.f32.mrf.mxu3 }
 0x490   : > { %v1882_v63 = vmul.f32 %v3677_v14, %v1864_v4  ;;  %2811 = vrot.lane.b32.xlu2 %v2793_v38, %s3938_s21 }
 0x492   : > { %1890 = vst.msk [vmem:[%s4627_s27 + $0xf0] sm:$0xff] %vm407_vm0, %v1882_v63  ;;  %v2405_v55 = vpop.xlane.xlu2 %2404 }
 0x495   : > { %v1584_v50 = vpop.permute.xlu1 %1583  ;;  %2197 = vrot.lane.b32.xlu0 %v2178_v26, %s3938_s21 }
 0x496   : > { %1603 = vst.msk [vmem:[%s4627_s27 + $0x88] sm:$0xff] %vm982_vm1, %v1584_v50 }
 0x497   : > { %v2459_v33 = vpop.f32.mrf.mxu3 }
 0x498   : > { %v2491_v10 = vmul.f32 %v3683_v31, %v2459_v33  ;;  %2817 = vrot.lane.b32.xlu2 %v2796_v8, %s3938_s21 }
 0x49a   : > { %2499 = vst.msk [vmem:[%s4627_s27 + $0x18] sm:$0xff] %vm407_vm0, %v2491_v10  ;;  %v1588_v40 = vpop.permute.xlu2 %1587 }
 0x49b   : > { %1605 = vst.msk [vmem:[%s4627_s27 + $0xc8] sm:$0xff] %vm982_vm1, %v1588_v40 }
 0x49d   : > { %2203 = vrot.lane.b32.xlu0 %v2181_v60, %s3938_s21 }
 0x49f   : > { %v2462_v3 = vpop.f32.mrf.mxu3 }
 0x4a2   : > { %v2194_v37 = vpop.permute.xlu2 %2193 }
 0x4a3   : > { %2216 = vst.msk [vmem:[%s4627_s27 + $0x30] sm:$0xff] %vm982_vm1, %v2194_v37 }
 0x4a6   : > { %v2399_v56 = vpop.xlane.xlu0 %2398 }
 0x4a7   : > { %3688 = vrcp.f32 %v2399_v56  ;;  %v2465_v20 = vpop.f32.mrf.mxu3 }
 0x4a8   : > { %v2493_v44 = vmul.f32 %v3687_v21, %v2465_v20  ;;  %3690 = vrcp.f32 %v2405_v55 }
 0x4aa   : > { %2501 = vst.msk [vmem:[%s4627_s27 + $0x58] sm:$0xff] %vm407_vm0, %v2493_v44 }
 0x4ad   : > { %v3689_v5 = vpop.eup %3688 }
 0x4ae   : > { %v2492_v6 = vmul.f32 %v3689_v5, %v2462_v3  ;;  %v3691_v32 = vpop.eup %3690 }
 0x4af   : > { %v2468_v28 = vpop.f32.mrf.mxu3 }
 0x4b0   : > { %2500 = vst.msk [vmem:[%s4627_s27 + $0x38] sm:$0xff] %vm407_vm0, %v2492_v6  ;;  %v2494_v35 = vmul.f32 %v3691_v32, %v2468_v28 }
 0x4b2   : > { %2502 = vst.msk [vmem:[%s4627_s27 + $0x78] sm:$0xff] %vm407_vm0, %v2494_v35 }
 0x4b7   : > { %v2471_v45 = vpop.f32.mrf.mxu3 }
 0x4b9   : > { %v1580_v49 = vpop.permute.xlu0 %1579 }
 0x4ba   : > { %1601 = vst.msk [vmem:[%s4627_s27 + $0x48] sm:$0xff] %vm982_vm1, %v1580_v49 }
 0x4bf   : > { %v2474_v59 = vpop.f32.mrf.mxu3 }
 0x4c0   : > { %v2411_v1 = vpop.xlane.xlu1 %2410 }
 0x4c1   : > { %3692 = vrcp.f32 %v2411_v1  ;;  %v1586_v61 = vpop.permute.xlu0 %1585 }
 0x4c2   : > { %1604 = vst.msk [vmem:[%s4627_s27 + $0xa8] sm:$0xff] %vm982_vm1, %v1586_v61  ;;  %3694 = vrcp.f32 %v5530_v29 }
 0x4c7   : > { %v3693_v7 = vpop.eup %3692  ;;  %2416 = vadd.xlane.f32.xlu0 %v2415_v58  ;;  %v2477_v34 = vpop.f32.mrf.mxu3 }
 0x4c8   : > { %v2496_v12 = vmul.f32 %v3693_v7, %v2474_v59  ;;  %v3695_v41 = vpop.eup %3694 }
 0x4c9   : > { %v2792_v53 = vmul.f32 %v3695_v41, %v5617_v0 }
 0x4ca   : > { %2504 = vst.msk [vmem:[%s4627_s27 + $0xb8] sm:$0xff] %vm407_vm0, %v2496_v12 }
 0x4cf   : > { %2716 = vadd.xlane.f32.xlu0 %v2715_v39  ;;  %v2480_v18 = vpop.f32.mrf.mxu3 }
 0x4d7   : > { %v2780_v4 = vpop.f32.mrf.mxu3 }
 0x4d8   : > { %v1590_v57 = vpop.permute.xlu1 %1589 }
 0x4d9   : > { %1606 = vst.msk [vmem:[%s4627_s27 + $0xe8] sm:$0xff] %vm982_vm1, %v1590_v57 }
 0x4db   : > { %v2414_v16 = vpop.xlane.xlu2 %2413 }
 0x4dc   : > { %3696 = vrcp.f32 %v2414_v16 }
 0x4dd   : > { %3698 = vrcp.f32 %v5536_v48 }
 0x4e0   : > { %v2196_v30 = vpop.permute.xlu1 %2195 }
 0x4e1   : > { %2217 = vst.msk [vmem:[%s4627_s27 + $0x50] sm:$0xff] %vm982_vm1, %v2196_v30 }
 0x4e2   : > { %v3697_v17 = vpop.eup %3696 }
 0x4e3   : > { %v2497_v29 = vmul.f32 %v3697_v17, %v2477_v34  ;;  %v2200_v43 = vpop.permute.xlu2 %2199  ;;  %2809 = vrot.lane.b32.xlu0 %v2792_v53, %s3938_s21  ;;  %v3699_v48 = vpop.eup %3698 }
 0x4e4   : > { %2219 = vst.msk [vmem:[%s4627_s27 + $0x90] sm:$0xff] %vm982_vm1, %v2200_v43  ;;  %v2795_v0 = vmul.f32 %v3699_v48, %v5638_v2 }
 0x4e5   : > { %2505 = vst.msk [vmem:[%s4627_s27 + $0xd8] sm:$0xff] %vm407_vm0, %v2497_v29 }
 0x4e8   : > { %v2202_v27 = vpop.permute.xlu1 %2201 }
 0x4e9   : > { %2220 = vst.msk [vmem:[%s4627_s27 + $0xb0] sm:$0xff] %vm982_vm1, %v2202_v27 }
 0x4eb   : > { %v2206_v19 = vpop.permute.xlu2 %2205  ;;  %2815 = vrot.lane.b32.xlu0 %v2795_v0, %s3938_s21 }
 0x4ec   : > { %2222 = vst.msk [vmem:[%s4627_s27 + $0xf0] sm:$0xff] %vm982_vm1, %v2206_v19  ;;  %v2408_v11 = vpop.xlane.xlu0 %2407 }
 0x4ed   : > { %3700 = vrcp.f32 %v2408_v11 }
 0x4f0   : > { %v2808_v15 = vpop.permute.xlu1 %2807 }
 0x4f1   : > { %2831 = vst.msk [vmem:[%s4627_s27 + $0x18] sm:$0xff] %vm982_vm1, %v2808_v15 }
 0x4f3   : > { %v3701_v52 = vpop.eup %3700  ;;  %v2812_v42 = vpop.permute.xlu2 %2811 }
 0x4f4   : > { %v2495_v51 = vmul.f32 %v3701_v52, %v2471_v45  ;;  %2833 = vst.msk [vmem:[%s4627_s27 + $0x58] sm:$0xff] %vm982_vm1, %v2812_v42 }
 0x4f6   : > { %2503 = vst.msk [vmem:[%s4627_s27 + $0x98] sm:$0xff] %vm407_vm0, %v2495_v51 }
 0x4f8   : > { %v2814_v2 = vpop.permute.xlu1 %2813 }
 0x4f9   : > { %2834 = vst.msk [vmem:[%s4627_s27 + $0x78] sm:$0xff] %vm982_vm1, %v2814_v2 }
 0x4fb   : > { %v2818_v25 = vpop.permute.xlu2 %2817 }
 0x4fc   : > { %2836 = vst.msk [vmem:[%s4627_s27 + $0xb8] sm:$0xff] %vm982_vm1, %v2818_v25 }
 0x4ff   : > { %v2192_v54 = vpop.permute.xlu0 %2191 }
 0x500   : > { %2215 = vst.msk [vmem:[%s4627_s27 + $0x10] sm:$0xff] %vm982_vm1, %v2192_v54  ;;  %v2820_v36 = vpop.permute.xlu1 %2819 }
 0x501   : > { %2837 = vst.msk [vmem:[%s4627_s27 + $0xd8] sm:$0xff] %vm982_vm1, %v2820_v36 }
 0x507   : > { %v2198_v62 = vpop.permute.xlu0 %2197 }
 0x508   : > { %2218 = vst.msk [vmem:[%s4627_s27 + $0x70] sm:$0xff] %vm982_vm1, %v2198_v62 }
 0x50f   : > { %v2204_v23 = vpop.permute.xlu0 %2203 }
 0x510   : > { %2221 = vst.msk [vmem:[%s4627_s27 + $0xd0] sm:$0xff] %vm982_vm1, %v2204_v23 }
 0x53a   : > { %v2417_v47 = vpop.xlane.xlu0 %2416 }
 0x53b   : > { %3702 = vrcp.f32 %v2417_v47 }
 0x541   : > { %v3703_v22 = vpop.eup %3702 }
 0x542   : > { %v2498_v46 = vmul.f32 %v3703_v22, %v2480_v18  ;;  %v2717_v38 = vpop.xlane.xlu0 %2716 }
 0x543   : > { %3704 = vrcp.f32 %v2717_v38 }
 0x544   : > { %2506 = vst.msk [vmem:[%s4627_s27 + $0xf8] sm:$0xff] %vm407_vm0, %v2498_v46 }
 0x549   : > { %v3705_v14 = vpop.eup %3704 }
 0x54a   : > { %v2798_v9 = vmul.f32 %v3705_v14, %v2780_v4 }
 0x54c   : > { %2821 = vrot.lane.b32.xlu0 %v2798_v9, %s3938_s21 }
 0x555   : > { %v2810_v63 = vpop.permute.xlu0 %2809 }
 0x556   : > { %2832 = vst.msk [vmem:[%s4627_s27 + $0x38] sm:$0xff] %vm982_vm1, %v2810_v63 }
 0x55d   : > { %v2816_v55 = vpop.permute.xlu0 %2815 }
 0x55e   : > { %2835 = vst.msk [vmem:[%s4627_s27 + $0x98] sm:$0xff] %vm982_vm1, %v2816_v55 }
 0x5be   : > { %v2822_v24 = vpop.permute.xlu0 %2821 }
 0x5bf   : > { %2838 = vst.msk [vmem:[%s4627_s27 + $0xf8] sm:$0xff] %vm982_vm1, %v2822_v24 }
 0x5c0   : > { %3869 = shalt.err (!%p3866_p13)
}
 0x5c1   : > { %s3939_s1 = smov 512   ;;  %s3940_s0 = smov 32  }
 0x5c2   : > { %3374 = dma.vmem_to_hbm [thread:$0]  (%p4021_p9), %s2856_s9, 4096, %s2858_s22, %s2840_s10, %s3939_s1, %s3939_s1, %s3940_s0  }
 0x5c3 PF: > { %s5839_s29 = sld [smem:[#allocation16_spill]]  ;;  %s2872_s30 = sand.u32 1, %s3912_s15  }
 0x5c4   : > { %p3390_p0 = pnand %p3017_p12, %p4028_p11  ;;  %s2873_s5 = scalar_lea.sflag [#allocation4], %s2872_s30 }
 0x5c6   : > { %p3391_p1 = pneg %p3390_p0 }
 0x5c8   : > { %3907 = dma.done.wait (%p3391_p1), %s2873_s5, 4096  }
 0x5c9   : > { %3909 = vsyncadd (%p3391_p1), %s2873_s5, 4294963200  ;;  %s26_s20 = sadd.s32 1, %s5839_s29   ;;  %s5840_s8 = sld [smem:[#allocation15_spill]] }
 0x5ca   : > { %p23_p2 = scmp.ge.s32.totalorder %s26_s20, 4   ;;  %s5841_s17 = sld [smem:[#allocation18_spill]] }
 0x5cb   : > { %s5842_s28 = sld [smem:[#allocation17_spill]]  ;;  %s5843_s15 = smov %s3916_s16 }
 0x5cc   : > { %s5845_s18 = smov %s3928_s19 }
 0x5cd   :  { %25 = sbr.rel (!%p23_p2) target bundleno = 14 (0xe), region = 132 }
 0x5cf   : > { %s5844_s16 = smov %s5840_s8 }
 0x5d1   : > { %s5846_s19 = smov %s5842_s28 }
 0x5d2   :  { %2879 = vsyncpa [#allocation3], 1 }
 0x5d3   :  { %2881 = vsyncpa [#allocation3 + $0x1], 1 }
 0x5d4   :  { %2882 = vsyncpa [#allocation6], 1 }
 0x5d5   :  { %2884 = vsyncpa [#allocation6 + $0x1], 1 }
 0x5d6   :  { %2885 = vsyncpa [#allocation9], 1 }
 0x5d7   :  { %2887 = vsyncpa [#allocation9 + $0x1], 1 }
 0x5d8   :  { %2888 = vsyncpa [#allocation4], 1 }
 0x5d9   :  { %2890 = vsyncpa [#allocation4 + $0x1], 1 }

</bundles_post_ra>
